<compile_context>
chip_gen: v7x
topology: tpu7x:2x2x1
jax: 0.10.0
libtpu: 0.0.40
codegen_flags: <defaults>
</compile_context>

<pallas_src>
import math
from functools import partial

import jax
import jax.numpy as jnp
from jax.experimental import pallas as pl
from jax.experimental.pallas import tpu as pltpu

VMEM_SPEC = pl.BlockSpec(memory_space=pltpu.MemorySpace.VMEM)

_NEG_INF = -1000000000.0  # same constant as the PyTorch masked_fill
_LN_EPS = 1e-5


def _round_up(x, m):
    return (x + m - 1) // m * m


# --------------------------------------------------------------------------
# Kernel: fused multi-head attention + output projection + residual + LayerNorm
# (one grid step == one batch element; everything stays in VMEM / vregs)
# --------------------------------------------------------------------------
def _mha_ln_kernel(xq_ref, xkv_ref, mask_ref, wq_ref, bq_ref, wkv_ref, bkv_ref,
                   wo_ref, bo_ref, g_ref, beta_ref, o_ref, *, n_heads, d_k, scale):
    xq = xq_ref[...]                       # (Sq, D)  f32
    xkv = xkv_ref[...]                     # (Sk, D)  f32
    hdk = n_heads * d_k

    # Fused projections (bf16 MXU, f32 accumulate).
    q = jnp.dot(xq.astype(jnp.bfloat16), wq_ref[...],
                preferred_element_type=jnp.float32) + bq_ref[...]          # (Sq, H*dk)
    kv = jnp.dot(xkv.astype(jnp.bfloat16), wkv_ref[...],
                 preferred_element_type=jnp.float32) + bkv_ref[...]        # (Sk, 2*H*dk)

    # Compact mask -> additive bias, computed once and reused by every head.
    bias = jnp.where(mask_ref[...] == 0.0, _NEG_INF, 0.0)                  # (Sm, Sk)

    heads = []
    for h in range(n_heads):
        qh = q[:, h * d_k:(h + 1) * d_k].astype(jnp.bfloat16)              # (Sq, dk)
        kh = kv[:, h * d_k:(h + 1) * d_k].astype(jnp.bfloat16)             # (Sk, dk)
        vh = kv[:, hdk + h * d_k: hdk + (h + 1) * d_k].astype(jnp.bfloat16)

        s = jnp.einsum('qd,kd->qk', qh, kh,
                       preferred_element_type=jnp.float32) * scale + bias  # (Sq, Sk)
        mx = jnp.max(s, axis=-1, keepdims=True)
        e = jnp.exp(s - mx)
        p = e * pl.reciprocal(jnp.sum(e, axis=-1, keepdims=True), approx=True)
        heads.append(jnp.dot(p.astype(jnp.bfloat16), vh,
                             preferred_element_type=jnp.float32))          # (Sq, dk)

    ctx = jnp.concatenate(heads, axis=-1)                                  # (Sq, H*dk)
    attn = jnp.dot(ctx.astype(jnp.bfloat16), wo_ref[...],
                   preferred_element_type=jnp.float32) + bo_ref[...]       # (Sq, D)

    # Residual + LayerNorm (f32, PyTorch eps, biased variance). Dropout = identity.
    z = xq + attn
    mean = jnp.mean(z, axis=-1, keepdims=True)
    var = jnp.mean(jnp.square(z - mean), axis=-1, keepdims=True)
    o_ref[...] = (z - mean) * jax.lax.rsqrt(var + _LN_EPS) * g_ref[...] + beta_ref[...]


def mha_ln_layer(p_attn, p_ln, x_q, x_kv, mask, n_heads, d_k):
    B, Sq, D = x_q.shape
    Sk = x_kv.shape[1]
    Sm = mask.shape[1]          # 1 (broadcast over queries) or Sq
    hdk = n_heads * d_k
    kernel = partial(_mha_ln_kernel, n_heads=n_heads, d_k=d_k,
                     scale=1.0 / math.sqrt(d_k))
    return pl.pallas_call(
        kernel,
        out_shape=jax.ShapeDtypeStruct((B, Sq, D), jnp.float32),
        grid=(B,),
        in_specs=[
            pl.BlockSpec((None, Sq, D), lambda b: (b, 0, 0)),      # x_q (per-batch)
            pl.BlockSpec((None, Sk, D), lambda b: (b, 0, 0)),      # x_kv
            pl.BlockSpec((None, Sm, Sk), lambda b: (b, 0, 0)),     # compact mask
            pl.BlockSpec((D, hdk), lambda b: (0, 0)),              # wq (bf16)
            pl.BlockSpec((1, hdk), lambda b: (0, 0)),              # bq
            pl.BlockSpec((D, 2 * hdk), lambda b: (0, 0)),          # wkv (bf16)
            pl.BlockSpec((1, 2 * hdk), lambda b: (0, 0)),          # bkv
            pl.BlockSpec((hdk, D), lambda b: (0, 0)),              # wo (bf16)
            pl.BlockSpec((1, D), lambda b: (0, 0)),                # bo
            pl.BlockSpec((1, D), lambda b: (0, 0)),                # gamma
            pl.BlockSpec((1, D), lambda b: (0, 0)),                # beta
        ],
        out_specs=pl.BlockSpec((None, Sq, D), lambda b: (b, 0, 0)),
        compiler_params=pltpu.CompilerParams(dimension_semantics=("parallel",)),
    )(x_q, x_kv, mask, p_attn['wq'], p_attn['bq'], p_attn['wkv'], p_attn['bkv'],
      p_attn['wo'], p_attn['bo'], p_ln['gamma'], p_ln['beta'])


# --------------------------------------------------------------------------
# Kernel: fused FFN (w1 + ReLU + w2) + residual + LayerNorm, gridded over batch
# --------------------------------------------------------------------------
def _ffn_ln_kernel(x_ref, w1_ref, b1_ref, w2_ref, b2_ref, g_ref, beta_ref, o_ref):
    x = x_ref[...]                                                          # (S, D) f32
    h = jnp.dot(x.astype(jnp.bfloat16), w1_ref[...],
                preferred_element_type=jnp.float32) + b1_ref[...]
    h = jnp.maximum(h, 0.0)
    y = jnp.dot(h.astype(jnp.bfloat16), w2_ref[...],
                preferred_element_type=jnp.float32) + b2_ref[...]
    z = x + y
    mean = jnp.mean(z, axis=-1, keepdims=True)
    var = jnp.mean(jnp.square(z - mean), axis=-1, keepdims=True)
    o_ref[...] = (z - mean) * jax.lax.rsqrt(var + _LN_EPS) * g_ref[...] + beta_ref[...]


def ffn_ln_layer(p_ff, p_ln, x):
    B, S, D = x.shape
    d_ff = p_ff['w1'].shape[1]
    return pl.pallas_call(
        _ffn_ln_kernel,
        out_shape=jax.ShapeDtypeStruct((B, S, D), jnp.float32),
        grid=(B,),
        in_specs=[
            pl.BlockSpec((None, S, D), lambda b: (b, 0, 0)),
            pl.BlockSpec((D, d_ff), lambda b: (0, 0)),             # w1 (bf16)
            pl.BlockSpec((1, d_ff), lambda b: (0, 0)),             # b1
            pl.BlockSpec((d_ff, D), lambda b: (0, 0)),             # w2 (bf16)
            pl.BlockSpec((1, D), lambda b: (0, 0)),                # b2
            pl.BlockSpec((1, D), lambda b: (0, 0)),                # gamma
            pl.BlockSpec((1, D), lambda b: (0, 0)),                # beta
        ],
        out_specs=pl.BlockSpec((None, S, D), lambda b: (b, 0, 0)),
        compiler_params=pltpu.CompilerParams(dimension_semantics=("parallel",)),
    )(x, p_ff['w1'], p_ff['b1'], p_ff['w2'], p_ff['b2'], p_ln['gamma'], p_ln['beta'])


# --------------------------------------------------------------------------
# Kernel: sqrt(d_model) * embedding + positional embedding (elementwise)
# --------------------------------------------------------------------------
def _embed_kernel(emb_ref, pe_ref, o_ref, *, scale):
    o_ref[...] = scale * emb_ref[...] + pe_ref[...]   # pe (1,S,D) broadcasts over batch


def embed_scale_add(emb, pe, d_model):
    return pl.pallas_call(
        partial(_embed_kernel, scale=math.sqrt(d_model)),
        out_shape=jax.ShapeDtypeStruct(emb.shape, jnp.float32),
        in_specs=[VMEM_SPEC, VMEM_SPEC],
        out_specs=VMEM_SPEC,
    )(emb, pe)


# --------------------------------------------------------------------------
# Kernel: tiled output (vocab) projection with f32 accumulator scratch
# --------------------------------------------------------------------------
def _matmul_bias_kernel(x_ref, w_ref, b_ref, o_ref, acc_ref):
    k = pl.program_id(2)

    @pl.when(k == 0)
    def _():
        acc_ref[...] = jnp.zeros_like(acc_ref)

    acc_ref[...] += jnp.dot(x_ref[...].astype(jnp.bfloat16), w_ref[...],
                            preferred_element_type=jnp.float32)

    @pl.when(k == pl.num_programs(2) - 1)
    def _():
        o_ref[...] = acc_ref[...] + b_ref[...]


def tiled_linear(x2d, w_bf16, b, *, tm=256, tn=256, tk=512):
    M, D = x2d.shape
    V = w_bf16.shape[1]
    tm = min(tm, _round_up(M, 8))
    tn = min(tn, _round_up(V, 128))      # lane-dense (>=128) output stores
    tk = min(tk, _round_up(D, 128))
    Mp, Dp, Vp = _round_up(M, tm), _round_up(D, tk), _round_up(V, tn)
    xp = jnp.pad(x2d, ((0, Mp - M), (0, Dp - D)))
    wp = jnp.pad(w_bf16, ((0, Dp - D), (0, Vp - V)))
    bp = jnp.pad(b.reshape(1, -1), ((0, 0), (0, Vp - V)))
    out = pl.pallas_call(
        _matmul_bias_kernel,
        out_shape=jax.ShapeDtypeStruct((Mp, Vp), jnp.float32),
        grid=(Mp // tm, Vp // tn, Dp // tk),
        in_specs=[pl.BlockSpec((tm, tk), lambda i, j, k: (i, k)),
                  pl.BlockSpec((tk, tn), lambda i, j, k: (k, j)),
                  pl.BlockSpec((1, tn), lambda i, j, k: (0, j))],
        out_specs=pl.BlockSpec((tm, tn), lambda i, j, k: (i, j)),
        scratch_shapes=[pltpu.VMEM((tm, tn), jnp.float32)],
        compiler_params=pltpu.CompilerParams(
            dimension_semantics=("parallel", "parallel", "arbitrary")),
    )(xp, wp, bp)
    return out[:M, :V]


# --------------------------------------------------------------------------
# Model forward (glue: embedding gather, reshapes, layer loop)
# --------------------------------------------------------------------------
def transformer_forward(params, inp, inp_mask, tgt, tgt_mask, *, d_model, n_heads):
    d_k = d_model // n_heads
    pe = params['pe']

    src_e = embed_scale_add(params['src_embed'][inp], pe[None, :inp.shape[1]], d_model)
    tgt_e = embed_scale_add(params['tgt_embed'][tgt], pe[None, :tgt.shape[1]], d_model)

    # Encoder (each layer shares one LayerNorm across its sublayers, as in the spec).
    x = src_e
    for lp in params['enc_layers']:
        x = mha_ln_layer(lp['attn'], lp['norm'], x, x, inp_mask, n_heads, d_k)
        x = ffn_ln_layer(lp['ff'], lp['norm'], x)
    encoding = x

    # Decoder
    y = tgt_e
    for lp in params['dec_layers']:
        y = mha_ln_layer(lp['self_attn'], lp['norm'], y, y, tgt_mask, n_heads, d_k)
        y = mha_ln_layer(lp['enc_dec_attn'], lp['norm'], y, encoding, inp_mask,
                         n_heads, d_k)
        y = ffn_ln_layer(lp['ff'], lp['norm'], y)

    B, S, D = y.shape
    logits = tiled_linear(y.reshape(B * S, D), params['w_out'], params['b_out'])
    return logits.reshape(B, S, -1)


# --------------------------------------------------------------------------
# Parameter init (xavier-uniform like the PyTorch module; biases zero)
# --------------------------------------------------------------------------
def _xavier(key, shape):
    bound = math.sqrt(6.0 / (shape[0] + shape[1]))
    return jax.random.uniform(key, shape, jnp.float32, -bound, bound)


def _init_mha(key, d_model, n_heads, d_k):
    ks = jax.random.split(key, 3 * n_heads + 1)
    hdk = n_heads * d_k
    wq = jnp.concatenate([_xavier(ks[i], (d_model, d_k)) for i in range(n_heads)], axis=1)
    wk = jnp.concatenate([_xavier(ks[n_heads + i], (d_model, d_k))
                          for i in range(n_heads)], axis=1)
    wv = jnp.concatenate([_xavier(ks[2 * n_heads + i], (d_model, d_k))
                          for i in range(n_heads)], axis=1)
    wo = _xavier(ks[-1], (hdk, d_model))
    return {
        'wq': wq.astype(jnp.bfloat16), 'bq': jnp.zeros((1, hdk), jnp.float32),
        'wkv': jnp.concatenate([wk, wv], axis=1).astype(jnp.bfloat16),
        'bkv': jnp.zeros((1, 2 * hdk), jnp.float32),
        'wo': wo.astype(jnp.bfloat16), 'bo': jnp.zeros((1, d_model), jnp.float32),
    }


def _init_ff(key, d_model, d_ff):
    k1, k2 = jax.random.split(key)
    return {
        'w1': _xavier(k1, (d_model, d_ff)).astype(jnp.bfloat16),
        'b1': jnp.zeros((1, d_ff), jnp.float32),
        'w2': _xavier(k2, (d_ff, d_model)).astype(jnp.bfloat16),
        'b2': jnp.zeros((1, d_model), jnp.float32),
    }


def _init_ln(d_model):
    return {'gamma': jnp.ones((1, d_model), jnp.float32),
            'beta': jnp.zeros((1, d_model), jnp.float32)}


def make_positional_table(d_model, max_len=2000):
    # TODO(synk): assumes even d_model (same implicit assumption as the PyTorch code).
    pos = jnp.arange(max_len, dtype=jnp.float32)[:, None]
    exp_term = jnp.exp(math.log(10000.0) *
                       (-jnp.arange(0, d_model, 2, dtype=jnp.float32) / d_model))
    x = pos * exp_term
    pe = jnp.zeros((max_len, d_model), jnp.float32)
    pe = pe.at[:, 0::2].set(jnp.sin(x))
    pe = pe.at[:, 1::2].set(jnp.cos(x))
    return pe


def init_params(key, src_vocab, tgt_vocab, d_model, n_heads,
                n_enc_layers, n_dec_layers, d_ff=2048, max_len=2000):
    d_k = d_model // n_heads
    n_keys = 2 + 2 * n_enc_layers + 3 * n_dec_layers + 1
    keys = iter(jax.random.split(key, n_keys))
    params = {
        'src_embed': _xavier(next(keys), (src_vocab, d_model)),
        'tgt_embed': _xavier(next(keys), (tgt_vocab, d_model)),
        'pe': make_positional_table(d_model, max_len),      # precomputed once
    }
    enc_layers = []
    for _ in range(n_enc_layers):
        enc_layers.append({
            'attn': _init_mha(next(keys), d_model, n_heads, d_k),
            'ff': _init_ff(next(keys), d_model, d_ff),
            'norm': _init_ln(d_model),      # shared norm within the layer (as in spec)
        })
    dec_layers = []
    for _ in range(n_dec_layers):
        dec_layers.append({
            'self_attn': _init_mha(next(keys), d_model, n_heads, d_k),
            'enc_dec_attn': _init_mha(next(keys), d_model, n_heads, d_k),
            'ff': _init_ff(next(keys), d_model, d_ff),
            'norm': _init_ln(d_model),
        })
    params['enc_layers'] = enc_layers
    params['dec_layers'] = dec_layers
    params['w_out'] = _xavier(next(keys), (d_model, tgt_vocab)).astype(jnp.bfloat16)
    params['b_out'] = jnp.zeros((tgt_vocab,), jnp.float32)
    return params


# ----------------------------------- main -----------------------------------
if __name__ == "__main__":
    B, S_SRC, S_TGT = 2, 8, 8
    D_MODEL, N_HEADS = 32, 4
    N_ENC, N_DEC = 2, 2
    SRC_VOCAB, TGT_VOCAB = 50, 60

    root = jax.random.PRNGKey(0)
    k_params, k_inp, k_tgt = jax.random.split(root, 3)

    params = init_params(k_params, SRC_VOCAB, TGT_VOCAB, D_MODEL, N_HEADS, N_ENC, N_DEC)

    inp = jax.random.randint(k_inp, (B, S_SRC), 0, SRC_VOCAB)
    tgt = jax.random.randint(k_tgt, (B, S_TGT), 0, TGT_VOCAB)
    inp_mask = jnp.ones((B, 1, S_SRC), jnp.float32)                  # broadcast over queries
    tgt_mask = jnp.broadcast_to(
        jnp.tril(jnp.ones((S_TGT, S_TGT), jnp.float32))[None], (B, S_TGT, S_TGT))

    fwd = jax.jit(partial(transformer_forward, d_model=D_MODEL, n_heads=N_HEADS))
    logits = fwd(params, inp, inp_mask, tgt, tgt_mask)
    jax.block_until_ready(logits)

    assert logits.shape == (B, S_TGT, TGT_VOCAB)
    assert bool(jnp.all(jnp.isfinite(logits)))
    print("KERNEL_OK")
</pallas_src>

<mosaic_0001>
module attributes {stable_mosaic.version = 11 : i64} {
  func.func @_ffn_ln_kernel(%arg0: i32, %arg1: memref<1x8x32xf32, #tpu.memory_space<vmem>>, %arg2: memref<32x2048xbf16, #tpu.memory_space<vmem>>, %arg3: memref<1x2048xf32, #tpu.memory_space<vmem>>, %arg4: memref<2048x32xbf16, #tpu.memory_space<vmem>>, %arg5: memref<1x32xf32, #tpu.memory_space<vmem>>, %arg6: memref<1x32xf32, #tpu.memory_space<vmem>>, %arg7: memref<1x32xf32, #tpu.memory_space<vmem>>, %arg8: memref<1x8x32xf32, #tpu.memory_space<vmem>>) attributes {dimension_semantics = [#tpu.dimension_semantics<parallel>], iteration_bounds = array<i64: 2>, scalar_prefetch = 0 : i64, scratch_operands = 0 : i64, tpu.core_type = #tpu.core_type<tc>, window_params = [{transform_indices = @transform_0, window_bounds = array<i64: 1, 8, 32>}, {pipeline_mode = #tpu.pipeline_mode<synchronous>, transform_indices = @transform_1, window_bounds = array<i64: 32, 2048>}, {pipeline_mode = #tpu.pipeline_mode<synchronous>, transform_indices = @transform_2, window_bounds = array<i64: 1, 2048>}, {pipeline_mode = #tpu.pipeline_mode<synchronous>, transform_indices = @transform_3, window_bounds = array<i64: 2048, 32>}, {pipeline_mode = #tpu.pipeline_mode<synchronous>, transform_indices = @transform_4, window_bounds = array<i64: 1, 32>}, {pipeline_mode = #tpu.pipeline_mode<synchronous>, transform_indices = @transform_5, window_bounds = array<i64: 1, 32>}, {pipeline_mode = #tpu.pipeline_mode<synchronous>, transform_indices = @transform_6, window_bounds = array<i64: 1, 32>}, {transform_indices = @transform_7, window_bounds = array<i64: 1, 8, 32>}]} {
    %c0 = arith.constant 0 : index
    %c0_0 = arith.constant 0 : index
    %c0_1 = arith.constant 0 : index
    %0 = vector.load %arg1[%c0, %c0_0, %c0_1] : memref<1x8x32xf32, #tpu.memory_space<vmem>>, vector<1x8x32xf32>
    %1 = vector.shape_cast %0 : vector<1x8x32xf32> to vector<8x32xf32>
    %2 = arith.truncf %1 : vector<8x32xf32> to vector<8x32xbf16>
    %c0_2 = arith.constant 0 : index
    %c0_3 = arith.constant 0 : index
    %3 = vector.load %arg2[%c0_2, %c0_3] : memref<32x2048xbf16, #tpu.memory_space<vmem>>, vector<32x2048xbf16>
    %cst = arith.constant dense<0.000000e+00> : vector<8x2048xf32>
    %4 = tpu.matmul %2, %3, %cst {dimension_numbers = #tpu.dot_dimension_numbers<[1], [0], [0], [1], [0, 0, 1, 1], [], []>} : vector<8x32xbf16>, vector<32x2048xbf16>, vector<8x2048xf32> -> vector<8x2048xf32>
    %c0_4 = arith.constant 0 : index
    %c0_5 = arith.constant 0 : index
    %5 = vector.load %arg3[%c0_4, %c0_5] : memref<1x2048xf32, #tpu.memory_space<vmem>>, vector<1x2048xf32>
    %6 = vector.broadcast %5 : vector<1x2048xf32> to vector<8x2048xf32>
    %7 = arith.addf %4, %6 : vector<8x2048xf32>
    %cst_6 = arith.constant 0.000000e+00 : f32
    %8 = vector.broadcast %cst_6 : f32 to vector<8x2048xf32>
    %9 = arith.maximumf %7, %8 : vector<8x2048xf32>
    %10 = arith.truncf %9 : vector<8x2048xf32> to vector<8x2048xbf16>
    %c0_7 = arith.constant 0 : index
    %c0_8 = arith.constant 0 : index
    %11 = vector.load %arg4[%c0_7, %c0_8] : memref<2048x32xbf16, #tpu.memory_space<vmem>>, vector<2048x32xbf16>
    %cst_9 = arith.constant dense<0.000000e+00> : vector<8x32xf32>
    %12 = tpu.matmul %10, %11, %cst_9 {dimension_numbers = #tpu.dot_dimension_numbers<[1], [0], [0], [1], [0, 0, 1, 1], [], []>} : vector<8x2048xbf16>, vector<2048x32xbf16>, vector<8x32xf32> -> vector<8x32xf32>
    %c0_10 = arith.constant 0 : index
    %c0_11 = arith.constant 0 : index
    %13 = vector.load %arg5[%c0_10, %c0_11] : memref<1x32xf32, #tpu.memory_space<vmem>>, vector<1x32xf32>
    %14 = vector.broadcast %13 : vector<1x32xf32> to vector<8x32xf32>
    %15 = arith.addf %12, %14 : vector<8x32xf32>
    %16 = arith.addf %1, %15 : vector<8x32xf32>
    %cst_12 = arith.constant dense<0.000000e+00> : vector<8xf32>
    %17 = vector.multi_reduction <add>, %16, %cst_12 [1] : vector<8x32xf32> to vector<8xf32>
    %18 = vector.shape_cast %17 : vector<8xf32> to vector<8x1xf32>
    %cst_13 = arith.constant 3.200000e+01 : f32
    %19 = vector.broadcast %cst_13 : f32 to vector<8x1xf32>
    %20 = arith.divf %18, %19 : vector<8x1xf32>
    %21 = vector.broadcast %20 : vector<8x1xf32> to vector<8x32xf32>
    %22 = arith.subf %16, %21 : vector<8x32xf32>
    %23 = arith.mulf %22, %22 : vector<8x32xf32>
    %cst_14 = arith.constant dense<0.000000e+00> : vector<8xf32>
    %24 = vector.multi_reduction <add>, %23, %cst_14 [1] : vector<8x32xf32> to vector<8xf32>
    %25 = vector.shape_cast %24 : vector<8xf32> to vector<8x1xf32>
    %cst_15 = arith.constant 3.200000e+01 : f32
    %26 = vector.broadcast %cst_15 : f32 to vector<8x1xf32>
    %27 = arith.divf %25, %26 : vector<8x1xf32>
    %28 = vector.broadcast %20 : vector<8x1xf32> to vector<8x32xf32>
    %29 = arith.subf %16, %28 : vector<8x32xf32>
    %cst_16 = arith.constant 9.99999974E-6 : f32
    %30 = vector.broadcast %cst_16 : f32 to vector<8x1xf32>
    %31 = arith.addf %27, %30 : vector<8x1xf32>
    %32 = math.rsqrt %31 : vector<8x1xf32>
    %33 = vector.broadcast %32 : vector<8x1xf32> to vector<8x32xf32>
    %34 = arith.mulf %29, %33 : vector<8x32xf32>
    %c0_17 = arith.constant 0 : index
    %c0_18 = arith.constant 0 : index
    %35 = vector.load %arg6[%c0_17, %c0_18] : memref<1x32xf32, #tpu.memory_space<vmem>>, vector<1x32xf32>
    %36 = vector.broadcast %35 : vector<1x32xf32> to vector<8x32xf32>
    %37 = arith.mulf %34, %36 : vector<8x32xf32>
    %c0_19 = arith.constant 0 : index
    %c0_20 = arith.constant 0 : index
    %38 = vector.load %arg7[%c0_19, %c0_20] : memref<1x32xf32, #tpu.memory_space<vmem>>, vector<1x32xf32>
    %39 = vector.broadcast %38 : vector<1x32xf32> to vector<8x32xf32>
    %40 = arith.addf %37, %39 : vector<8x32xf32>
    %c0_21 = arith.constant 0 : index
    %c0_22 = arith.constant 0 : index
    %c0_23 = arith.constant 0 : index
    %41 = vector.load %arg8[%c0_21, %c0_22, %c0_23] : memref<1x8x32xf32, #tpu.memory_space<vmem>>, vector<1x8x32xf32>
    %42 = vector.shape_cast %41 : vector<1x8x32xf32> to vector<8x32xf32>
    %43 = vector.shape_cast %40 : vector<8x32xf32> to vector<1x8x32xf32>
    tpu.vector_store %arg8[%c0_21, %c0_22, %c0_23], %43 {strides = array<i32>} : memref<1x8x32xf32, #tpu.memory_space<vmem>>, vector<1x8x32xf32>,
    return
  }
  func.func @transform_0(%arg0: i32) -> (i32, i32, i32) {
    %c0_i32 = arith.constant 0 : i32
    %c0_i32_0 = arith.constant 0 : i32
    %c0_i32_1 = arith.constant 0 : i32
    return %arg0, %c0_i32, %c0_i32_0 : i32, i32, i32
  }
  func.func @transform_1(%arg0: i32) -> (i32, i32) {
    %c0_i32 = arith.constant 0 : i32
    %c0_i32_0 = arith.constant 0 : i32
    %c0_i32_1 = arith.constant 0 : i32
    return %c0_i32, %c0_i32_0 : i32, i32
  }
  func.func @transform_2(%arg0: i32) -> (i32, i32) {
    %c0_i32 = arith.constant 0 : i32
    %c0_i32_0 = arith.constant 0 : i32
    %c0_i32_1 = arith.constant 0 : i32
    return %c0_i32, %c0_i32_0 : i32, i32
  }
  func.func @transform_3(%arg0: i32) -> (i32, i32) {
    %c0_i32 = arith.constant 0 : i32
    %c0_i32_0 = arith.constant 0 : i32
    %c0_i32_1 = arith.constant 0 : i32
    return %c0_i32, %c0_i32_0 : i32, i32
  }
  func.func @transform_4(%arg0: i32) -> (i32, i32) {
    %c0_i32 = arith.constant 0 : i32
    %c0_i32_0 = arith.constant 0 : i32
    %c0_i32_1 = arith.constant 0 : i32
    return %c0_i32, %c0_i32_0 : i32, i32
  }
  func.func @transform_5(%arg0: i32) -> (i32, i32) {
    %c0_i32 = arith.constant 0 : i32
    %c0_i32_0 = arith.constant 0 : i32
    %c0_i32_1 = arith.constant 0 : i32
    return %c0_i32, %c0_i32_0 : i32, i32
  }
  func.func @transform_6(%arg0: i32) -> (i32, i32) {
    %c0_i32 = arith.constant 0 : i32
    %c0_i32_0 = arith.constant 0 : i32
    %c0_i32_1 = arith.constant 0 : i32
    return %c0_i32, %c0_i32_0 : i32, i32
  }
  func.func @transform_7(%arg0: i32) -> (i32, i32, i32) {
    %c0_i32 = arith.constant 0 : i32
    %c0_i32_0 = arith.constant 0 : i32
    %c0_i32_1 = arith.constant 0 : i32
    return %arg0, %c0_i32, %c0_i32_0 : i32, i32, i32
  }
}

module attributes {stable_mosaic.version = 11 : i64} {
  func.func @_embed_kernel(%arg0: memref<2x8x32xf32, #tpu.memory_space<vmem>>, %arg1: memref<1x8x32xf32, #tpu.memory_space<vmem>>, %arg2: memref<2x8x32xf32, #tpu.memory_space<vmem>>) attributes {dimension_semantics = [], scalar_prefetch = 0 : i64, scratch_operands = 0 : i64, tpu.core_type = #tpu.core_type<tc>} {
    %c0 = arith.constant 0 : index
    %c0_0 = arith.constant 0 : index
    %c0_1 = arith.constant 0 : index
    %0 = vector.load %arg0[%c0, %c0_0, %c0_1] : memref<2x8x32xf32, #tpu.memory_space<vmem>>, vector<2x8x32xf32>
    %cst = arith.constant 5.65685415 : f32
    %1 = vector.broadcast %cst : f32 to vector<2x8x32xf32>
    %2 = arith.mulf %1, %0 : vector<2x8x32xf32>
    %c0_2 = arith.constant 0 : index
    %c0_3 = arith.constant 0 : index
    %c0_4 = arith.constant 0 : index
    %3 = vector.load %arg1[%c0_2, %c0_3, %c0_4] : memref<1x8x32xf32, #tpu.memory_space<vmem>>, vector<1x8x32xf32>
    %4 = vector.broadcast %3 : vector<1x8x32xf32> to vector<2x8x32xf32>
    %5 = arith.addf %2, %4 : vector<2x8x32xf32>
    %c0_5 = arith.constant 0 : index
    %c0_6 = arith.constant 0 : index
    %c0_7 = arith.constant 0 : index
    %6 = vector.load %arg2[%c0_5, %c0_6, %c0_7] : memref<2x8x32xf32, #tpu.memory_space<vmem>>, vector<2x8x32xf32>
    tpu.vector_store %arg2[%c0_5, %c0_6, %c0_7], %5 {strides = array<i32>} : memref<2x8x32xf32, #tpu.memory_space<vmem>>, vector<2x8x32xf32>,
    return
  }
}

module attributes {stable_mosaic.version = 11 : i64} {
  func.func @_mha_ln_kernel(%arg0: i32, %arg1: memref<1x8x32xf32, #tpu.memory_space<vmem>>, %arg2: memref<1x8x32xf32, #tpu.memory_space<vmem>>, %arg3: memref<1x1x8xf32, #tpu.memory_space<vmem>>, %arg4: memref<32x32xbf16, #tpu.memory_space<vmem>>, %arg5: memref<1x32xf32, #tpu.memory_space<vmem>>, %arg6: memref<32x64xbf16, #tpu.memory_space<vmem>>, %arg7: memref<1x64xf32, #tpu.memory_space<vmem>>, %arg8: memref<32x32xbf16, #tpu.memory_space<vmem>>, %arg9: memref<1x32xf32, #tpu.memory_space<vmem>>, %arg10: memref<1x32xf32, #tpu.memory_space<vmem>>, %arg11: memref<1x32xf32, #tpu.memory_space<vmem>>, %arg12: memref<1x8x32xf32, #tpu.memory_space<vmem>>) attributes {dimension_semantics = [#tpu.dimension_semantics<parallel>], iteration_bounds = array<i64: 2>, scalar_prefetch = 0 : i64, scratch_operands = 0 : i64, tpu.core_type = #tpu.core_type<tc>, window_params = [{transform_indices = @transform_0, window_bounds = array<i64: 1, 8, 32>}, {transform_indices = @transform_1, window_bounds = array<i64: 1, 8, 32>}, {transform_indices = @transform_2, window_bounds = array<i64: 1, 1, 8>}, {pipeline_mode = #tpu.pipeline_mode<synchronous>, transform_indices = @transform_3, window_bounds = array<i64: 32, 32>}, {pipeline_mode = #tpu.pipeline_mode<synchronous>, transform_indices = @transform_4, window_bounds = array<i64: 1, 32>}, {pipeline_mode = #tpu.pipeline_mode<synchronous>, transform_indices = @transform_5, window_bounds = array<i64: 32, 64>}, {pipeline_mode = #tpu.pipeline_mode<synchronous>, transform_indices = @transform_6, window_bounds = array<i64: 1, 64>}, {pipeline_mode = #tpu.pipeline_mode<synchronous>, transform_indices = @transform_7, window_bounds = array<i64: 32, 32>}, {pipeline_mode = #tpu.pipeline_mode<synchronous>, transform_indices = @transform_8, window_bounds = array<i64: 1, 32>}, {pipeline_mode = #tpu.pipeline_mode<synchronous>, transform_indices = @transform_9, window_bounds = array<i64: 1, 32>}, {pipeline_mode = #tpu.pipeline_mode<synchronous>, transform_indices = @transform_10, window_bounds = array<i64: 1, 32>}, {transform_indices = @transform_11, window_bounds = array<i64: 1, 8, 32>}]} {
    %c0 = arith.constant 0 : index
    %c0_0 = arith.constant 0 : index
    %c0_1 = arith.constant 0 : index
    %0 = vector.load %arg1[%c0, %c0_0, %c0_1] : memref<1x8x32xf32, #tpu.memory_space<vmem>>, vector<1x8x32xf32>
    %1 = vector.shape_cast %0 : vector<1x8x32xf32> to vector<8x32xf32>
    %c0_2 = arith.constant 0 : index
    %c0_3 = arith.constant 0 : index
    %c0_4 = arith.constant 0 : index
    %2 = vector.load %arg2[%c0_2, %c0_3, %c0_4] : memref<1x8x32xf32, #tpu.memory_space<vmem>>, vector<1x8x32xf32>
    %3 = vector.shape_cast %2 : vector<1x8x32xf32> to vector<8x32xf32>
    %4 = arith.truncf %1 : vector<8x32xf32> to vector<8x32xbf16>
    %c0_5 = arith.constant 0 : index
    %c0_6 = arith.constant 0 : index
    %5 = vector.load %arg4[%c0_5, %c0_6] : memref<32x32xbf16, #tpu.memory_space<vmem>>, vector<32x32xbf16>
    %cst = arith.constant dense<0.000000e+00> : vector<8x32xf32>
    %6 = tpu.matmul %4, %5, %cst {dimension_numbers = #tpu.dot_dimension_numbers<[1], [0], [0], [1], [0, 0, 1, 1], [], []>} : vector<8x32xbf16>, vector<32x32xbf16>, vector<8x32xf32> -> vector<8x32xf32>
    %c0_7 = arith.constant 0 : index
    %c0_8 = arith.constant 0 : index
    %7 = vector.load %arg5[%c0_7, %c0_8] : memref<1x32xf32, #tpu.memory_space<vmem>>, vector<1x32xf32>
    %8 = vector.broadcast %7 : vector<1x32xf32> to vector<8x32xf32>
    %9 = arith.addf %6, %8 : vector<8x32xf32>
    %10 = arith.truncf %3 : vector<8x32xf32> to vector<8x32xbf16>
    %c0_9 = arith.constant 0 : index
    %c0_10 = arith.constant 0 : index
    %11 = vector.load %arg6[%c0_9, %c0_10] : memref<32x64xbf16, #tpu.memory_space<vmem>>, vector<32x64xbf16>
    %cst_11 = arith.constant dense<0.000000e+00> : vector<8x64xf32>
    %12 = tpu.matmul %10, %11, %cst_11 {dimension_numbers = #tpu.dot_dimension_numbers<[1], [0], [0], [1], [0, 0, 1, 1], [], []>} : vector<8x32xbf16>, vector<32x64xbf16>, vector<8x64xf32> -> vector<8x64xf32>
    %c0_12 = arith.constant 0 : index
    %c0_13 = arith.constant 0 : index
    %13 = vector.load %arg7[%c0_12, %c0_13] : memref<1x64xf32, #tpu.memory_space<vmem>>, vector<1x64xf32>
    %14 = vector.broadcast %13 : vector<1x64xf32> to vector<8x64xf32>
    %15 = arith.addf %12, %14 : vector<8x64xf32>
    %c0_14 = arith.constant 0 : index
    %c0_15 = arith.constant 0 : index
    %c0_16 = arith.constant 0 : index
    %16 = vector.load %arg3[%c0_14, %c0_15, %c0_16] : memref<1x1x8xf32, #tpu.memory_space<vmem>>, vector<1x1x8xf32>
    %17 = vector.shape_cast %16 : vector<1x1x8xf32> to vector<1x8xf32>
    %cst_17 = arith.constant 0.000000e+00 : f32
    %18 = vector.broadcast %cst_17 : f32 to vector<1x8xf32>
    %19 = arith.cmpf oeq, %17, %18 : vector<1x8xf32>
    %cst_18 = arith.constant -1.000000e+09 : f32
    %cst_19 = arith.constant 0.000000e+00 : f32
    %20 = vector.broadcast %cst_18 : f32 to vector<1x8xf32>
    %21 = vector.broadcast %cst_19 : f32 to vector<1x8xf32>
    %22 = arith.select %19, %20, %21 : vector<1x8xi1>, vector<1x8xf32>
    %23 = vector.extract_strided_slice %9 {offsets = [0, 0], sizes = [8, 8], strides = [1, 1]} : vector<8x32xf32> to vector<8x8xf32>
    %24 = arith.truncf %23 : vector<8x8xf32> to vector<8x8xbf16>
    %25 = vector.extract_strided_slice %15 {offsets = [0, 0], sizes = [8, 8], strides = [1, 1]} : vector<8x64xf32> to vector<8x8xf32>
    %26 = arith.truncf %25 : vector<8x8xf32> to vector<8x8xbf16>
    %27 = vector.extract_strided_slice %15 {offsets = [0, 32], sizes = [8, 8], strides = [1, 1]} : vector<8x64xf32> to vector<8x8xf32>
    %28 = arith.truncf %27 : vector<8x8xf32> to vector<8x8xbf16>
    "tpu.trace_start"() <{level = 10 : i32, message = "qd,kd->qk"}> : () -> ()
    %cst_20 = arith.constant dense<0.000000e+00> : vector<8x8xf32>
    %29 = tpu.matmul %24, %26, %cst_20 {dimension_numbers = #tpu.dot_dimension_numbers<[1], [1], [0], [0], [0, 0, 1, 0], [], []>} : vector<8x8xbf16>, vector<8x8xbf16>, vector<8x8xf32> -> vector<8x8xf32>
    "tpu.trace_stop"() : () -> ()
    %cst_21 = arith.constant 0.353553385 : f32
    %30 = vector.broadcast %cst_21 : f32 to vector<8x8xf32>
    %31 = arith.mulf %29, %30 : vector<8x8xf32>
    %32 = vector.broadcast %22 : vector<1x8xf32> to vector<8x8xf32>
    %33 = arith.addf %31, %32 : vector<8x8xf32>
    %cst_22 = arith.constant dense<0xFF800000> : vector<8xf32>
    %34 = vector.multi_reduction <maximumf>, %33, %cst_22 [1] : vector<8x8xf32> to vector<8xf32>
    %35 = vector.shape_cast %34 : vector<8xf32> to vector<8x1xf32>
    %36 = vector.broadcast %35 : vector<8x1xf32> to vector<8x8xf32>
    %37 = arith.subf %33, %36 : vector<8x8xf32>
    %38 = math.exp %37 : vector<8x8xf32>
    %cst_23 = arith.constant dense<0.000000e+00> : vector<8xf32>
    %39 = vector.multi_reduction <add>, %38, %cst_23 [1] : vector<8x8xf32> to vector<8xf32>
    %40 = vector.shape_cast %39 : vector<8xf32> to vector<8x1xf32>
    %41 = tpu.reciprocal %40 {approx = true} : vector<8x1xf32> -> vector<8x1xf32>
    %42 = vector.broadcast %41 : vector<8x1xf32> to vector<8x8xf32>
    %43 = arith.mulf %38, %42 : vector<8x8xf32>
    %44 = arith.truncf %43 : vector<8x8xf32> to vector<8x8xbf16>
    %cst_24 = arith.constant dense<0.000000e+00> : vector<8x8xf32>
    %45 = tpu.matmul %44, %28, %cst_24 {dimension_numbers = #tpu.dot_dimension_numbers<[1], [0], [0], [1], [0, 0, 1, 1], [], []>} : vector<8x8xbf16>, vector<8x8xbf16>, vector<8x8xf32> -> vector<8x8xf32>
    %46 = vector.extract_strided_slice %9 {offsets = [0, 8], sizes = [8, 8], strides = [1, 1]} : vector<8x32xf32> to vector<8x8xf32>
    %47 = arith.truncf %46 : vector<8x8xf32> to vector<8x8xbf16>
    %48 = vector.extract_strided_slice %15 {offsets = [0, 8], sizes = [8, 8], strides = [1, 1]} : vector<8x64xf32> to vector<8x8xf32>
    %49 = arith.truncf %48 : vector<8x8xf32> to vector<8x8xbf16>
    %50 = vector.extract_strided_slice %15 {offsets = [0, 40], sizes = [8, 8], strides = [1, 1]} : vector<8x64xf32> to vector<8x8xf32>
    %51 = arith.truncf %50 : vector<8x8xf32> to vector<8x8xbf16>
    "tpu.trace_start"() <{level = 10 : i32, message = "qd,kd->qk"}> : () -> ()
    %cst_25 = arith.constant dense<0.000000e+00> : vector<8x8xf32>
    %52 = tpu.matmul %47, %49, %cst_25 {dimension_numbers = #tpu.dot_dimension_numbers<[1], [1], [0], [0], [0, 0, 1, 0], [], []>} : vector<8x8xbf16>, vector<8x8xbf16>, vector<8x8xf32> -> vector<8x8xf32>
    "tpu.trace_stop"() : () -> ()
    %cst_26 = arith.constant 0.353553385 : f32
    %53 = vector.broadcast %cst_26 : f32 to vector<8x8xf32>
    %54 = arith.mulf %52, %53 : vector<8x8xf32>
    %55 = vector.broadcast %22 : vector<1x8xf32> to vector<8x8xf32>
    %56 = arith.addf %54, %55 : vector<8x8xf32>
    %cst_27 = arith.constant dense<0xFF800000> : vector<8xf32>
    %57 = vector.multi_reduction <maximumf>, %56, %cst_27 [1] : vector<8x8xf32> to vector<8xf32>
    %58 = vector.shape_cast %57 : vector<8xf32> to vector<8x1xf32>
    %59 = vector.broadcast %58 : vector<8x1xf32> to vector<8x8xf32>
    %60 = arith.subf %56, %59 : vector<8x8xf32>
    %61 = math.exp %60 : vector<8x8xf32>
    %cst_28 = arith.constant dense<0.000000e+00> : vector<8xf32>
    %62 = vector.multi_reduction <add>, %61, %cst_28 [1] : vector<8x8xf32> to vector<8xf32>
    %63 = vector.shape_cast %62 : vector<8xf32> to vector<8x1xf32>
    %64 = tpu.reciprocal %63 {approx = true} : vector<8x1xf32> -> vector<8x1xf32>
    %65 = vector.broadcast %64 : vector<8x1xf32> to vector<8x8xf32>
    %66 = arith.mulf %61, %65 : vector<8x8xf32>
    %67 = arith.truncf %66 : vector<8x8xf32> to vector<8x8xbf16>
    %cst_29 = arith.constant dense<0.000000e+00> : vector<8x8xf32>
    %68 = tpu.matmul %67, %51, %cst_29 {dimension_numbers = #tpu.dot_dimension_numbers<[1], [0], [0], [1], [0, 0, 1, 1], [], []>} : vector<8x8xbf16>, vector<8x8xbf16>, vector<8x8xf32> -> vector<8x8xf32>
    %69 = vector.extract_strided_slice %9 {offsets = [0, 16], sizes = [8, 8], strides = [1, 1]} : vector<8x32xf32> to vector<8x8xf32>
    %70 = arith.truncf %69 : vector<8x8xf32> to vector<8x8xbf16>
    %71 = vector.extract_strided_slice %15 {offsets = [0, 16], sizes = [8, 8], strides = [1, 1]} : vector<8x64xf32> to vector<8x8xf32>
    %72 = arith.truncf %71 : vector<8x8xf32> to vector<8x8xbf16>
    %73 = vector.extract_strided_slice %15 {offsets = [0, 48], sizes = [8, 8], strides = [1, 1]} : vector<8x64xf32> to vector<8x8xf32>
    %74 = arith.truncf %73 : vector<8x8xf32> to vector<8x8xbf16>
    "tpu.trace_start"() <{level = 10 : i32, message = "qd,kd->qk"}> : () -> ()
    %cst_30 = arith.constant dense<0.000000e+00> : vector<8x8xf32>
    %75 = tpu.matmul %70, %72, %cst_30 {dimension_numbers = #tpu.dot_dimension_numbers<[1], [1], [0], [0], [0, 0, 1, 0], [], []>} : vector<8x8xbf16>, vector<8x8xbf16>, vector<8x8xf32> -> vector<8x8xf32>
    "tpu.trace_stop"() : () -> ()
    %cst_31 = arith.constant 0.353553385 : f32
    %76 = vector.broadcast %cst_31 : f32 to vector<8x8xf32>
    %77 = arith.mulf %75, %76 : vector<8x8xf32>
    %78 = vector.broadcast %22 : vector<1x8xf32> to vector<8x8xf32>
    %79 = arith.addf %77, %78 : vector<8x8xf32>
    %cst_32 = arith.constant dense<0xFF800000> : vector<8xf32>
    %80 = vector.multi_reduction <maximumf>, %79, %cst_32 [1] : vector<8x8xf32> to vector<8xf32>
    %81 = vector.shape_cast %80 : vector<8xf32> to vector<8x1xf32>
    %82 = vector.broadcast %81 : vector<8x1xf32> to vector<8x8xf32>
    %83 = arith.subf %79, %82 : vector<8x8xf32>
    %84 = math.exp %83 : vector<8x8xf32>
    %cst_33 = arith.constant dense<0.000000e+00> : vector<8xf32>
    %85 = vector.multi_reduction <add>, %84, %cst_33 [1] : vector<8x8xf32> to vector<8xf32>
    %86 = vector.shape_cast %85 : vector<8xf32> to vector<8x1xf32>
    %87 = tpu.reciprocal %86 {approx = true} : vector<8x1xf32> -> vector<8x1xf32>
    %88 = vector.broadcast %87 : vector<8x1xf32> to vector<8x8xf32>
    %89 = arith.mulf %84, %88 : vector<8x8xf32>
    %90 = arith.truncf %89 : vector<8x8xf32> to vector<8x8xbf16>
    %cst_34 = arith.constant dense<0.000000e+00> : vector<8x8xf32>
    %91 = tpu.matmul %90, %74, %cst_34 {dimension_numbers = #tpu.dot_dimension_numbers<[1], [0], [0], [1], [0, 0, 1, 1], [], []>} : vector<8x8xbf16>, vector<8x8xbf16>, vector<8x8xf32> -> vector<8x8xf32>
    %92 = vector.extract_strided_slice %9 {offsets = [0, 24], sizes = [8, 8], strides = [1, 1]} : vector<8x32xf32> to vector<8x8xf32>
    %93 = arith.truncf %92 : vector<8x8xf32> to vector<8x8xbf16>
    %94 = vector.extract_strided_slice %15 {offsets = [0, 24], sizes = [8, 8], strides = [1, 1]} : vector<8x64xf32> to vector<8x8xf32>
    %95 = arith.truncf %94 : vector<8x8xf32> to vector<8x8xbf16>
    %96 = vector.extract_strided_slice %15 {offsets = [0, 56], sizes = [8, 8], strides = [1, 1]} : vector<8x64xf32> to vector<8x8xf32>
    %97 = arith.truncf %96 : vector<8x8xf32> to vector<8x8xbf16>
    "tpu.trace_start"() <{level = 10 : i32, message = "qd,kd->qk"}> : () -> ()
    %cst_35 = arith.constant dense<0.000000e+00> : vector<8x8xf32>
    %98 = tpu.matmul %93, %95, %cst_35 {dimension_numbers = #tpu.dot_dimension_numbers<[1], [1], [0], [0], [0, 0, 1, 0], [], []>} : vector<8x8xbf16>, vector<8x8xbf16>, vector<8x8xf32> -> vector<8x8xf32>
    "tpu.trace_stop"() : () -> ()
    %cst_36 = arith.constant 0.353553385 : f32
    %99 = vector.broadcast %cst_36 : f32 to vector<8x8xf32>
    %100 = arith.mulf %98, %99 : vector<8x8xf32>
    %101 = vector.broadcast %22 : vector<1x8xf32> to vector<8x8xf32>
    %102 = arith.addf %100, %101 : vector<8x8xf32>
    %cst_37 = arith.constant dense<0xFF800000> : vector<8xf32>
    %103 = vector.multi_reduction <maximumf>, %102, %cst_37 [1] : vector<8x8xf32> to vector<8xf32>
    %104 = vector.shape_cast %103 : vector<8xf32> to vector<8x1xf32>
    %105 = vector.broadcast %104 : vector<8x1xf32> to vector<8x8xf32>
    %106 = arith.subf %102, %105 : vector<8x8xf32>
    %107 = math.exp %106 : vector<8x8xf32>
    %cst_38 = arith.constant dense<0.000000e+00> : vector<8xf32>
    %108 = vector.multi_reduction <add>, %107, %cst_38 [1] : vector<8x8xf32> to vector<8xf32>
    %109 = vector.shape_cast %108 : vector<8xf32> to vector<8x1xf32>
    %110 = tpu.reciprocal %109 {approx = true} : vector<8x1xf32> -> vector<8x1xf32>
    %111 = vector.broadcast %110 : vector<8x1xf32> to vector<8x8xf32>
    %112 = arith.mulf %107, %111 : vector<8x8xf32>
    %113 = arith.truncf %112 : vector<8x8xf32> to vector<8x8xbf16>
    %cst_39 = arith.constant dense<0.000000e+00> : vector<8x8xf32>
    %114 = tpu.matmul %113, %97, %cst_39 {dimension_numbers = #tpu.dot_dimension_numbers<[1], [0], [0], [1], [0, 0, 1, 1], [], []>} : vector<8x8xbf16>, vector<8x8xbf16>, vector<8x8xf32> -> vector<8x8xf32>
    %115 = tpu.concatenate %45, %68, %91, %114 in 1 : vector<8x8xf32>, vector<8x8xf32>, vector<8x8xf32>, vector<8x8xf32> -> vector<8x32xf32>
    %116 = arith.truncf %115 : vector<8x32xf32> to vector<8x32xbf16>
    %c0_40 = arith.constant 0 : index
    %c0_41 = arith.constant 0 : index
    %117 = vector.load %arg8[%c0_40, %c0_41] : memref<32x32xbf16, #tpu.memory_space<vmem>>, vector<32x32xbf16>
    %cst_42 = arith.constant dense<0.000000e+00> : vector<8x32xf32>
    %118 = tpu.matmul %116, %117, %cst_42 {dimension_numbers = #tpu.dot_dimension_numbers<[1], [0], [0], [1], [0, 0, 1, 1], [], []>} : vector<8x32xbf16>, vector<32x32xbf16>, vector<8x32xf32> -> vector<8x32xf32>
    %c0_43 = arith.constant 0 : index
    %c0_44 = arith.constant 0 : index
    %119 = vector.load %arg9[%c0_43, %c0_44] : memref<1x32xf32, #tpu.memory_space<vmem>>, vector<1x32xf32>
    %120 = vector.broadcast %119 : vector<1x32xf32> to vector<8x32xf32>
    %121 = arith.addf %118, %120 : vector<8x32xf32>
    %122 = arith.addf %1, %121 : vector<8x32xf32>
    %cst_45 = arith.constant dense<0.000000e+00> : vector<8xf32>
    %123 = vector.multi_reduction <add>, %122, %cst_45 [1] : vector<8x32xf32> to vector<8xf32>
    %124 = vector.shape_cast %123 : vector<8xf32> to vector<8x1xf32>
    %cst_46 = arith.constant 3.200000e+01 : f32
    %125 = vector.broadcast %cst_46 : f32 to vector<8x1xf32>
    %126 = arith.divf %124, %125 : vector<8x1xf32>
    %127 = vector.broadcast %126 : vector<8x1xf32> to vector<8x32xf32>
    %128 = arith.subf %122, %127 : vector<8x32xf32>
    %129 = arith.mulf %128, %128 : vector<8x32xf32>
    %cst_47 = arith.constant dense<0.000000e+00> : vector<8xf32>
    %130 = vector.multi_reduction <add>, %129, %cst_47 [1] : vector<8x32xf32> to vector<8xf32>
    %131 = vector.shape_cast %130 : vector<8xf32> to vector<8x1xf32>
    %cst_48 = arith.constant 3.200000e+01 : f32
    %132 = vector.broadcast %cst_48 : f32 to vector<8x1xf32>
    %133 = arith.divf %131, %132 : vector<8x1xf32>
    %134 = vector.broadcast %126 : vector<8x1xf32> to vector<8x32xf32>
    %135 = arith.subf %122, %134 : vector<8x32xf32>
    %cst_49 = arith.constant 9.99999974E-6 : f32
    %136 = vector.broadcast %cst_49 : f32 to vector<8x1xf32>
    %137 = arith.addf %133, %136 : vector<8x1xf32>
    %138 = math.rsqrt %137 : vector<8x1xf32>
    %139 = vector.broadcast %138 : vector<8x1xf32> to vector<8x32xf32>
    %140 = arith.mulf %135, %139 : vector<8x32xf32>
    %c0_50 = arith.constant 0 : index
    %c0_51 = arith.constant 0 : index
    %141 = vector.load %arg10[%c0_50, %c0_51] : memref<1x32xf32, #tpu.memory_space<vmem>>, vector<1x32xf32>
    %142 = vector.broadcast %141 : vector<1x32xf32> to vector<8x32xf32>
    %143 = arith.mulf %140, %142 : vector<8x32xf32>
    %c0_52 = arith.constant 0 : index
    %c0_53 = arith.constant 0 : index
    %144 = vector.load %arg11[%c0_52, %c0_53] : memref<1x32xf32, #tpu.memory_space<vmem>>, vector<1x32xf32>
    %145 = vector.broadcast %144 : vector<1x32xf32> to vector<8x32xf32>
    %146 = arith.addf %143, %145 : vector<8x32xf32>
    %c0_54 = arith.constant 0 : index
    %c0_55 = arith.constant 0 : index
    %c0_56 = arith.constant 0 : index
    %147 = vector.load %arg12[%c0_54, %c0_55, %c0_56] : memref<1x8x32xf32, #tpu.memory_space<vmem>>, vector<1x8x32xf32>
    %148 = vector.shape_cast %147 : vector<1x8x32xf32> to vector<8x32xf32>
    %149 = vector.shape_cast %146 : vector<8x32xf32> to vector<1x8x32xf32>
    tpu.vector_store %arg12[%c0_54, %c0_55, %c0_56], %149 {strides = array<i32>} : memref<1x8x32xf32, #tpu.memory_space<vmem>>, vector<1x8x32xf32>,
    return
  }
  func.func @transform_0(%arg0: i32) -> (i32, i32, i32) {
    %c0_i32 = arith.constant 0 : i32
    %c0_i32_0 = arith.constant 0 : i32
    %c0_i32_1 = arith.constant 0 : i32
    return %arg0, %c0_i32, %c0_i32_0 : i32, i32, i32
  }
  func.func @transform_1(%arg0: i32) -> (i32, i32, i32) {
    %c0_i32 = arith.constant 0 : i32
    %c0_i32_0 = arith.constant 0 : i32
    %c0_i32_1 = arith.constant 0 : i32
    return %arg0, %c0_i32, %c0_i32_0 : i32, i32, i32
  }
  func.func @transform_2(%arg0: i32) -> (i32, i32, i32) {
    %c0_i32 = arith.constant 0 : i32
    %c0_i32_0 = arith.constant 0 : i32
    %c0_i32_1 = arith.constant 0 : i32
    return %arg0, %c0_i32, %c0_i32_0 : i32, i32, i32
  }
  func.func @transform_3(%arg0: i32) -> (i32, i32) {
    %c0_i32 = arith.constant 0 : i32
    %c0_i32_0 = arith.constant 0 : i32
    %c0_i32_1 = arith.constant 0 : i32
    return %c0_i32, %c0_i32_0 : i32, i32
  }
  func.func @transform_4(%arg0: i32) -> (i32, i32) {
    %c0_i32 = arith.constant 0 : i32
    %c0_i32_0 = arith.constant 0 : i32
    %c0_i32_1 = arith.constant 0 : i32
    return %c0_i32, %c0_i32_0 : i32, i32
  }
  func.func @transform_5(%arg0: i32) -> (i32, i32) {
    %c0_i32 = arith.constant 0 : i32
    %c0_i32_0 = arith.constant 0 : i32
    %c0_i32_1 = arith.constant 0 : i32
    return %c0_i32, %c0_i32_0 : i32, i32
  }
  func.func @transform_6(%arg0: i32) -> (i32, i32) {
    %c0_i32 = arith.constant 0 : i32
    %c0_i32_0 = arith.constant 0 : i32
    %c0_i32_1 = arith.constant 0 : i32
    return %c0_i32, %c0_i32_0 : i32, i32
  }
  func.func @transform_7(%arg0: i32) -> (i32, i32) {
    %c0_i32 = arith.constant 0 : i32
    %c0_i32_0 = arith.constant 0 : i32
    %c0_i32_1 = arith.constant 0 : i32
    return %c0_i32, %c0_i32_0 : i32, i32
  }
  func.func @transform_8(%arg0: i32) -> (i32, i32) {
    %c0_i32 = arith.constant 0 : i32
    %c0_i32_0 = arith.constant 0 : i32
    %c0_i32_1 = arith.constant 0 : i32
    return %c0_i32, %c0_i32_0 : i32, i32
  }
  func.func @transform_9(%arg0: i32) -> (i32, i32) {
    %c0_i32 = arith.constant 0 : i32
    %c0_i32_0 = arith.constant 0 : i32
    %c0_i32_1 = arith.constant 0 : i32
    return %c0_i32, %c0_i32_0 : i32, i32
  }
  func.func @transform_10(%arg0: i32) -> (i32, i32) {
    %c0_i32 = arith.constant 0 : i32
    %c0_i32_0 = arith.constant 0 : i32
    %c0_i32_1 = arith.constant 0 : i32
    return %c0_i32, %c0_i32_0 : i32, i32
  }
  func.func @transform_11(%arg0: i32) -> (i32, i32, i32) {
    %c0_i32 = arith.constant 0 : i32
    %c0_i32_0 = arith.constant 0 : i32
    %c0_i32_1 = arith.constant 0 : i32
    return %arg0, %c0_i32, %c0_i32_0 : i32, i32, i32
  }
}

module attributes {stable_mosaic.version = 11 : i64} {
  func.func @_matmul_bias_kernel(%arg0: i32, %arg1: i32, %arg2: i32, %arg3: memref<16x128xf32, #tpu.memory_space<vmem>>, %arg4: memref<128x128xbf16, #tpu.memory_space<vmem>>, %arg5: memref<1x128xf32, #tpu.memory_space<vmem>>, %arg6: memref<16x128xf32, #tpu.memory_space<vmem>>, %arg7: memref<16x128xf32, #tpu.memory_space<vmem>>) attributes {dimension_semantics = [#tpu.dimension_semantics<parallel>, #tpu.dimension_semantics<parallel>, #tpu.dimension_semantics<arbitrary>], iteration_bounds = array<i64: 1, 1, 1>, scalar_prefetch = 0 : i64, scratch_operands = 1 : i64, tpu.core_type = #tpu.core_type<tc>, window_params = [{transform_indices = @transform_0, window_bounds = array<i64: 16, 128>}, {transform_indices = @transform_1, window_bounds = array<i64: 128, 128>}, {transform_indices = @transform_2, window_bounds = array<i64: 1, 128>}, {transform_indices = @transform_3, window_bounds = array<i64: 16, 128>}]} {
    %c0_i32 = arith.constant 0 : i32
    %0 = arith.cmpi eq, %arg2, %c0_i32 : i32
    %1 = arith.extui %0 : i1 to i32
    %c0_i32_0 = arith.constant 0 : i32
    %2 = arith.cmpi ne, %1, %c0_i32_0 : i32
    scf.if %2 {
      %cst_10 = arith.constant 0.000000e+00 : f32
      %13 = vector.broadcast %cst_10 : f32 to vector<16x128xf32>
      %c0_11 = arith.constant 0 : index
      %c0_12 = arith.constant 0 : index
      %14 = vector.load %arg7[%c0_11, %c0_12] : memref<16x128xf32, #tpu.memory_space<vmem>>, vector<16x128xf32>
      tpu.vector_store %arg7[%c0_11, %c0_12], %13 {strides = array<i32>} : memref<16x128xf32, #tpu.memory_space<vmem>>, vector<16x128xf32>,
    } else {
    }
    %c0 = arith.constant 0 : index
    %c0_1 = arith.constant 0 : index
    %3 = vector.load %arg7[%c0, %c0_1] : memref<16x128xf32, #tpu.memory_space<vmem>>, vector<16x128xf32>
    %c0_2 = arith.constant 0 : index
    %c0_3 = arith.constant 0 : index
    %4 = vector.load %arg3[%c0_2, %c0_3] : memref<16x128xf32, #tpu.memory_space<vmem>>, vector<16x128xf32>
    %5 = arith.truncf %4 : vector<16x128xf32> to vector<16x128xbf16>
    %c0_4 = arith.constant 0 : index
    %c0_5 = arith.constant 0 : index
    %6 = vector.load %arg4[%c0_4, %c0_5] : memref<128x128xbf16, #tpu.memory_space<vmem>>, vector<128x128xbf16>
    %cst = arith.constant dense<0.000000e+00> : vector<16x128xf32>
    %7 = tpu.matmul %5, %6, %cst {dimension_numbers = #tpu.dot_dimension_numbers<[1], [0], [0], [1], [0, 0, 1, 1], [], []>} : vector<16x128xbf16>, vector<128x128xbf16>, vector<16x128xf32> -> vector<16x128xf32>
    %8 = arith.addf %3, %7 : vector<16x128xf32>
    %c0_6 = arith.constant 0 : index
    %c0_7 = arith.constant 0 : index
    %9 = vector.load %arg7[%c0_6, %c0_7] : memref<16x128xf32, #tpu.memory_space<vmem>>, vector<16x128xf32>
    tpu.vector_store %arg7[%c0_6, %c0_7], %8 {strides = array<i32>} : memref<16x128xf32, #tpu.memory_space<vmem>>, vector<16x128xf32>,
    %c0_i32_8 = arith.constant 0 : i32
    %10 = arith.cmpi eq, %arg2, %c0_i32_8 : i32
    %11 = arith.extui %10 : i1 to i32
    %c0_i32_9 = arith.constant 0 : i32
    %12 = arith.cmpi ne, %11, %c0_i32_9 : i32
    scf.if %12 {
      %c0_10 = arith.constant 0 : index
      %c0_11 = arith.constant 0 : index
      %13 = vector.load %arg7[%c0_10, %c0_11] : memref<16x128xf32, #tpu.memory_space<vmem>>, vector<16x128xf32>
      %c0_12 = arith.constant 0 : index
      %c0_13 = arith.constant 0 : index
      %14 = vector.load %arg5[%c0_12, %c0_13] : memref<1x128xf32, #tpu.memory_space<vmem>>, vector<1x128xf32>
      %15 = vector.broadcast %14 : vector<1x128xf32> to vector<16x128xf32>
      %16 = arith.addf %13, %15 : vector<16x128xf32>
      %c0_14 = arith.constant 0 : index
      %c0_15 = arith.constant 0 : index
      %17 = vector.load %arg6[%c0_14, %c0_15] : memref<16x128xf32, #tpu.memory_space<vmem>>, vector<16x128xf32>
      tpu.vector_store %arg6[%c0_14, %c0_15], %16 {strides = array<i32>} : memref<16x128xf32, #tpu.memory_space<vmem>>, vector<16x128xf32>,
    } else {
    }
    return
  }
  func.func @transform_0(%arg0: i32, %arg1: i32, %arg2: i32) -> (i32, i32) {
    %c0_i32 = arith.constant 0 : i32
    return %arg0, %arg2 : i32, i32
  }
  func.func @transform_1(%arg0: i32, %arg1: i32, %arg2: i32) -> (i32, i32) {
    %c0_i32 = arith.constant 0 : i32
    return %arg2, %arg1 : i32, i32
  }
  func.func @transform_2(%arg0: i32, %arg1: i32, %arg2: i32) -> (i32, i32) {
    %c0_i32 = arith.constant 0 : i32
    %c0_i32_0 = arith.constant 0 : i32
    return %c0_i32, %arg1 : i32, i32
  }
  func.func @transform_3(%arg0: i32, %arg1: i32, %arg2: i32) -> (i32, i32) {
    %c0_i32 = arith.constant 0 : i32
    return %arg0, %arg1 : i32, i32
  }
}

module attributes {stable_mosaic.version = 11 : i64} {
  func.func @_mha_ln_kernel(%arg0: i32, %arg1: memref<1x8x32xf32, #tpu.memory_space<vmem>>, %arg2: memref<1x8x32xf32, #tpu.memory_space<vmem>>, %arg3: memref<1x8x8xf32, #tpu.memory_space<vmem>>, %arg4: memref<32x32xbf16, #tpu.memory_space<vmem>>, %arg5: memref<1x32xf32, #tpu.memory_space<vmem>>, %arg6: memref<32x64xbf16, #tpu.memory_space<vmem>>, %arg7: memref<1x64xf32, #tpu.memory_space<vmem>>, %arg8: memref<32x32xbf16, #tpu.memory_space<vmem>>, %arg9: memref<1x32xf32, #tpu.memory_space<vmem>>, %arg10: memref<1x32xf32, #tpu.memory_space<vmem>>, %arg11: memref<1x32xf32, #tpu.memory_space<vmem>>, %arg12: memref<1x8x32xf32, #tpu.memory_space<vmem>>) attributes {dimension_semantics = [#tpu.dimension_semantics<parallel>], iteration_bounds = array<i64: 2>, scalar_prefetch = 0 : i64, scratch_operands = 0 : i64, tpu.core_type = #tpu.core_type<tc>, window_params = [{transform_indices = @transform_0, window_bounds = array<i64: 1, 8, 32>}, {transform_indices = @transform_1, window_bounds = array<i64: 1, 8, 32>}, {transform_indices = @transform_2, window_bounds = array<i64: 1, 8, 8>}, {pipeline_mode = #tpu.pipeline_mode<synchronous>, transform_indices = @transform_3, window_bounds = array<i64: 32, 32>}, {pipeline_mode = #tpu.pipeline_mode<synchronous>, transform_indices = @transform_4, window_bounds = array<i64: 1, 32>}, {pipeline_mode = #tpu.pipeline_mode<synchronous>, transform_indices = @transform_5, window_bounds = array<i64: 32, 64>}, {pipeline_mode = #tpu.pipeline_mode<synchronous>, transform_indices = @transform_6, window_bounds = array<i64: 1, 64>}, {pipeline_mode = #tpu.pipeline_mode<synchronous>, transform_indices = @transform_7, window_bounds = array<i64: 32, 32>}, {pipeline_mode = #tpu.pipeline_mode<synchronous>, transform_indices = @transform_8, window_bounds = array<i64: 1, 32>}, {pipeline_mode = #tpu.pipeline_mode<synchronous>, transform_indices = @transform_9, window_bounds = array<i64: 1, 32>}, {pipeline_mode = #tpu.pipeline_mode<synchronous>, transform_indices = @transform_10, window_bounds = array<i64: 1, 32>}, {transform_indices = @transform_11, window_bounds = array<i64: 1, 8, 32>}]} {
    %c0 = arith.constant 0 : index
    %c0_0 = arith.constant 0 : index
    %c0_1 = arith.constant 0 : index
    %0 = vector.load %arg1[%c0, %c0_0, %c0_1] : memref<1x8x32xf32, #tpu.memory_space<vmem>>, vector<1x8x32xf32>
    %1 = vector.shape_cast %0 : vector<1x8x32xf32> to vector<8x32xf32>
    %c0_2 = arith.constant 0 : index
    %c0_3 = arith.constant 0 : index
    %c0_4 = arith.constant 0 : index
    %2 = vector.load %arg2[%c0_2, %c0_3, %c0_4] : memref<1x8x32xf32, #tpu.memory_space<vmem>>, vector<1x8x32xf32>
    %3 = vector.shape_cast %2 : vector<1x8x32xf32> to vector<8x32xf32>
    %4 = arith.truncf %1 : vector<8x32xf32> to vector<8x32xbf16>
    %c0_5 = arith.constant 0 : index
    %c0_6 = arith.constant 0 : index
    %5 = vector.load %arg4[%c0_5, %c0_6] : memref<32x32xbf16, #tpu.memory_space<vmem>>, vector<32x32xbf16>
    %cst = arith.constant dense<0.000000e+00> : vector<8x32xf32>
    %6 = tpu.matmul %4, %5, %cst {dimension_numbers = #tpu.dot_dimension_numbers<[1], [0], [0], [1], [0, 0, 1, 1], [], []>} : vector<8x32xbf16>, vector<32x32xbf16>, vector<8x32xf32> -> vector<8x32xf32>
    %c0_7 = arith.constant 0 : index
    %c0_8 = arith.constant 0 : index
    %7 = vector.load %arg5[%c0_7, %c0_8] : memref<1x32xf32, #tpu.memory_space<vmem>>, vector<1x32xf32>
    %8 = vector.broadcast %7 : vector<1x32xf32> to vector<8x32xf32>
    %9 = arith.addf %6, %8 : vector<8x32xf32>
    %10 = arith.truncf %3 : vector<8x32xf32> to vector<8x32xbf16>
    %c0_9 = arith.constant 0 : index
    %c0_10 = arith.constant 0 : index
    %11 = vector.load %arg6[%c0_9, %c0_10] : memref<32x64xbf16, #tpu.memory_space<vmem>>, vector<32x64xbf16>
    %cst_11 = arith.constant dense<0.000000e+00> : vector<8x64xf32>
    %12 = tpu.matmul %10, %11, %cst_11 {dimension_numbers = #tpu.dot_dimension_numbers<[1], [0], [0], [1], [0, 0, 1, 1], [], []>} : vector<8x32xbf16>, vector<32x64xbf16>, vector<8x64xf32> -> vector<8x64xf32>
    %c0_12 = arith.constant 0 : index
    %c0_13 = arith.constant 0 : index
    %13 = vector.load %arg7[%c0_12, %c0_13] : memref<1x64xf32, #tpu.memory_space<vmem>>, vector<1x64xf32>
    %14 = vector.broadcast %13 : vector<1x64xf32> to vector<8x64xf32>
    %15 = arith.addf %12, %14 : vector<8x64xf32>
    %c0_14 = arith.constant 0 : index
    %c0_15 = arith.constant 0 : index
    %c0_16 = arith.constant 0 : index
    %16 = vector.load %arg3[%c0_14, %c0_15, %c0_16] : memref<1x8x8xf32, #tpu.memory_space<vmem>>, vector<1x8x8xf32>
    %17 = vector.shape_cast %16 : vector<1x8x8xf32> to vector<8x8xf32>
    %cst_17 = arith.constant 0.000000e+00 : f32
    %18 = vector.broadcast %cst_17 : f32 to vector<8x8xf32>
    %19 = arith.cmpf oeq, %17, %18 : vector<8x8xf32>
    %cst_18 = arith.constant -1.000000e+09 : f32
    %cst_19 = arith.constant 0.000000e+00 : f32
    %20 = vector.broadcast %cst_18 : f32 to vector<8x8xf32>
    %21 = vector.broadcast %cst_19 : f32 to vector<8x8xf32>
    %22 = arith.select %19, %20, %21 : vector<8x8xi1>, vector<8x8xf32>
    %23 = vector.extract_strided_slice %9 {offsets = [0, 0], sizes = [8, 8], strides = [1, 1]} : vector<8x32xf32> to vector<8x8xf32>
    %24 = arith.truncf %23 : vector<8x8xf32> to vector<8x8xbf16>
    %25 = vector.extract_strided_slice %15 {offsets = [0, 0], sizes = [8, 8], strides = [1, 1]} : vector<8x64xf32> to vector<8x8xf32>
    %26 = arith.truncf %25 : vector<8x8xf32> to vector<8x8xbf16>
    %27 = vector.extract_strided_slice %15 {offsets = [0, 32], sizes = [8, 8], strides = [1, 1]} : vector<8x64xf32> to vector<8x8xf32>
    %28 = arith.truncf %27 : vector<8x8xf32> to vector<8x8xbf16>
    "tpu.trace_start"() <{level = 10 : i32, message = "qd,kd->qk"}> : () -> ()
    %cst_20 = arith.constant dense<0.000000e+00> : vector<8x8xf32>
    %29 = tpu.matmul %24, %26, %cst_20 {dimension_numbers = #tpu.dot_dimension_numbers<[1], [1], [0], [0], [0, 0, 1, 0], [], []>} : vector<8x8xbf16>, vector<8x8xbf16>, vector<8x8xf32> -> vector<8x8xf32>
    "tpu.trace_stop"() : () -> ()
    %cst_21 = arith.constant 0.353553385 : f32
    %30 = vector.broadcast %cst_21 : f32 to vector<8x8xf32>
    %31 = arith.mulf %29, %30 : vector<8x8xf32>
    %32 = arith.addf %31, %22 : vector<8x8xf32>
    %cst_22 = arith.constant dense<0xFF800000> : vector<8xf32>
    %33 = vector.multi_reduction <maximumf>, %32, %cst_22 [1] : vector<8x8xf32> to vector<8xf32>
    %34 = vector.shape_cast %33 : vector<8xf32> to vector<8x1xf32>
    %35 = vector.broadcast %34 : vector<8x1xf32> to vector<8x8xf32>
    %36 = arith.subf %32, %35 : vector<8x8xf32>
    %37 = math.exp %36 : vector<8x8xf32>
    %cst_23 = arith.constant dense<0.000000e+00> : vector<8xf32>
    %38 = vector.multi_reduction <add>, %37, %cst_23 [1] : vector<8x8xf32> to vector<8xf32>
    %39 = vector.shape_cast %38 : vector<8xf32> to vector<8x1xf32>
    %40 = tpu.reciprocal %39 {approx = true} : vector<8x1xf32> -> vector<8x1xf32>
    %41 = vector.broadcast %40 : vector<8x1xf32> to vector<8x8xf32>
    %42 = arith.mulf %37, %41 : vector<8x8xf32>
    %43 = arith.truncf %42 : vector<8x8xf32> to vector<8x8xbf16>
    %cst_24 = arith.constant dense<0.000000e+00> : vector<8x8xf32>
    %44 = tpu.matmul %43, %28, %cst_24 {dimension_numbers = #tpu.dot_dimension_numbers<[1], [0], [0], [1], [0, 0, 1, 1], [], []>} : vector<8x8xbf16>, vector<8x8xbf16>, vector<8x8xf32> -> vector<8x8xf32>
    %45 = vector.extract_strided_slice %9 {offsets = [0, 8], sizes = [8, 8], strides = [1, 1]} : vector<8x32xf32> to vector<8x8xf32>
    %46 = arith.truncf %45 : vector<8x8xf32> to vector<8x8xbf16>
    %47 = vector.extract_strided_slice %15 {offsets = [0, 8], sizes = [8, 8], strides = [1, 1]} : vector<8x64xf32> to vector<8x8xf32>
    %48 = arith.truncf %47 : vector<8x8xf32> to vector<8x8xbf16>
    %49 = vector.extract_strided_slice %15 {offsets = [0, 40], sizes = [8, 8], strides = [1, 1]} : vector<8x64xf32> to vector<8x8xf32>
    %50 = arith.truncf %49 : vector<8x8xf32> to vector<8x8xbf16>
    "tpu.trace_start"() <{level = 10 : i32, message = "qd,kd->qk"}> : () -> ()
    %cst_25 = arith.constant dense<0.000000e+00> : vector<8x8xf32>
    %51 = tpu.matmul %46, %48, %cst_25 {dimension_numbers = #tpu.dot_dimension_numbers<[1], [1], [0], [0], [0, 0, 1, 0], [], []>} : vector<8x8xbf16>, vector<8x8xbf16>, vector<8x8xf32> -> vector<8x8xf32>
    "tpu.trace_stop"() : () -> ()
    %cst_26 = arith.constant 0.353553385 : f32
    %52 = vector.broadcast %cst_26 : f32 to vector<8x8xf32>
    %53 = arith.mulf %51, %52 : vector<8x8xf32>
    %54 = arith.addf %53, %22 : vector<8x8xf32>
    %cst_27 = arith.constant dense<0xFF800000> : vector<8xf32>
    %55 = vector.multi_reduction <maximumf>, %54, %cst_27 [1] : vector<8x8xf32> to vector<8xf32>
    %56 = vector.shape_cast %55 : vector<8xf32> to vector<8x1xf32>
    %57 = vector.broadcast %56 : vector<8x1xf32> to vector<8x8xf32>
    %58 = arith.subf %54, %57 : vector<8x8xf32>
    %59 = math.exp %58 : vector<8x8xf32>
    %cst_28 = arith.constant dense<0.000000e+00> : vector<8xf32>
    %60 = vector.multi_reduction <add>, %59, %cst_28 [1] : vector<8x8xf32> to vector<8xf32>
    %61 = vector.shape_cast %60 : vector<8xf32> to vector<8x1xf32>
    %62 = tpu.reciprocal %61 {approx = true} : vector<8x1xf32> -> vector<8x1xf32>
    %63 = vector.broadcast %62 : vector<8x1xf32> to vector<8x8xf32>
    %64 = arith.mulf %59, %63 : vector<8x8xf32>
    %65 = arith.truncf %64 : vector<8x8xf32> to vector<8x8xbf16>
    %cst_29 = arith.constant dense<0.000000e+00> : vector<8x8xf32>
    %66 = tpu.matmul %65, %50, %cst_29 {dimension_numbers = #tpu.dot_dimension_numbers<[1], [0], [0], [1], [0, 0, 1, 1], [], []>} : vector<8x8xbf16>, vector<8x8xbf16>, vector<8x8xf32> -> vector<8x8xf32>
    %67 = vector.extract_strided_slice %9 {offsets = [0, 16], sizes = [8, 8], strides = [1, 1]} : vector<8x32xf32> to vector<8x8xf32>
    %68 = arith.truncf %67 : vector<8x8xf32> to vector<8x8xbf16>
    %69 = vector.extract_strided_slice %15 {offsets = [0, 16], sizes = [8, 8], strides = [1, 1]} : vector<8x64xf32> to vector<8x8xf32>
    %70 = arith.truncf %69 : vector<8x8xf32> to vector<8x8xbf16>
    %71 = vector.extract_strided_slice %15 {offsets = [0, 48], sizes = [8, 8], strides = [1, 1]} : vector<8x64xf32> to vector<8x8xf32>
    %72 = arith.truncf %71 : vector<8x8xf32> to vector<8x8xbf16>
    "tpu.trace_start"() <{level = 10 : i32, message = "qd,kd->qk"}> : () -> ()
    %cst_30 = arith.constant dense<0.000000e+00> : vector<8x8xf32>
    %73 = tpu.matmul %68, %70, %cst_30 {dimension_numbers = #tpu.dot_dimension_numbers<[1], [1], [0], [0], [0, 0, 1, 0], [], []>} : vector<8x8xbf16>, vector<8x8xbf16>, vector<8x8xf32> -> vector<8x8xf32>
    "tpu.trace_stop"() : () -> ()
    %cst_31 = arith.constant 0.353553385 : f32
    %74 = vector.broadcast %cst_31 : f32 to vector<8x8xf32>
    %75 = arith.mulf %73, %74 : vector<8x8xf32>
    %76 = arith.addf %75, %22 : vector<8x8xf32>
    %cst_32 = arith.constant dense<0xFF800000> : vector<8xf32>
    %77 = vector.multi_reduction <maximumf>, %76, %cst_32 [1] : vector<8x8xf32> to vector<8xf32>
    %78 = vector.shape_cast %77 : vector<8xf32> to vector<8x1xf32>
    %79 = vector.broadcast %78 : vector<8x1xf32> to vector<8x8xf32>
    %80 = arith.subf %76, %79 : vector<8x8xf32>
    %81 = math.exp %80 : vector<8x8xf32>
    %cst_33 = arith.constant dense<0.000000e+00> : vector<8xf32>
    %82 = vector.multi_reduction <add>, %81, %cst_33 [1] : vector<8x8xf32> to vector<8xf32>
    %83 = vector.shape_cast %82 : vector<8xf32> to vector<8x1xf32>
    %84 = tpu.reciprocal %83 {approx = true} : vector<8x1xf32> -> vector<8x1xf32>
    %85 = vector.broadcast %84 : vector<8x1xf32> to vector<8x8xf32>
    %86 = arith.mulf %81, %85 : vector<8x8xf32>
    %87 = arith.truncf %86 : vector<8x8xf32> to vector<8x8xbf16>
    %cst_34 = arith.constant dense<0.000000e+00> : vector<8x8xf32>
    %88 = tpu.matmul %87, %72, %cst_34 {dimension_numbers = #tpu.dot_dimension_numbers<[1], [0], [0], [1], [0, 0, 1, 1], [], []>} : vector<8x8xbf16>, vector<8x8xbf16>, vector<8x8xf32> -> vector<8x8xf32>
    %89 = vector.extract_strided_slice %9 {offsets = [0, 24], sizes = [8, 8], strides = [1, 1]} : vector<8x32xf32> to vector<8x8xf32>
    %90 = arith.truncf %89 : vector<8x8xf32> to vector<8x8xbf16>
    %91 = vector.extract_strided_slice %15 {offsets = [0, 24], sizes = [8, 8], strides = [1, 1]} : vector<8x64xf32> to vector<8x8xf32>
    %92 = arith.truncf %91 : vector<8x8xf32> to vector<8x8xbf16>
    %93 = vector.extract_strided_slice %15 {offsets = [0, 56], sizes = [8, 8], strides = [1, 1]} : vector<8x64xf32> to vector<8x8xf32>
    %94 = arith.truncf %93 : vector<8x8xf32> to vector<8x8xbf16>
    "tpu.trace_start"() <{level = 10 : i32, message = "qd,kd->qk"}> : () -> ()
    %cst_35 = arith.constant dense<0.000000e+00> : vector<8x8xf32>
    %95 = tpu.matmul %90, %92, %cst_35 {dimension_numbers = #tpu.dot_dimension_numbers<[1], [1], [0], [0], [0, 0, 1, 0], [], []>} : vector<8x8xbf16>, vector<8x8xbf16>, vector<8x8xf32> -> vector<8x8xf32>
    "tpu.trace_stop"() : () -> ()
    %cst_36 = arith.constant 0.353553385 : f32
    %96 = vector.broadcast %cst_36 : f32 to vector<8x8xf32>
    %97 = arith.mulf %95, %96 : vector<8x8xf32>
    %98 = arith.addf %97, %22 : vector<8x8xf32>
    %cst_37 = arith.constant dense<0xFF800000> : vector<8xf32>
    %99 = vector.multi_reduction <maximumf>, %98, %cst_37 [1] : vector<8x8xf32> to vector<8xf32>
    %100 = vector.shape_cast %99 : vector<8xf32> to vector<8x1xf32>
    %101 = vector.broadcast %100 : vector<8x1xf32> to vector<8x8xf32>
    %102 = arith.subf %98, %101 : vector<8x8xf32>
    %103 = math.exp %102 : vector<8x8xf32>
    %cst_38 = arith.constant dense<0.000000e+00> : vector<8xf32>
    %104 = vector.multi_reduction <add>, %103, %cst_38 [1] : vector<8x8xf32> to vector<8xf32>
    %105 = vector.shape_cast %104 : vector<8xf32> to vector<8x1xf32>
    %106 = tpu.reciprocal %105 {approx = true} : vector<8x1xf32> -> vector<8x1xf32>
    %107 = vector.broadcast %106 : vector<8x1xf32> to vector<8x8xf32>
    %108 = arith.mulf %103, %107 : vector<8x8xf32>
    %109 = arith.truncf %108 : vector<8x8xf32> to vector<8x8xbf16>
    %cst_39 = arith.constant dense<0.000000e+00> : vector<8x8xf32>
    %110 = tpu.matmul %109, %94, %cst_39 {dimension_numbers = #tpu.dot_dimension_numbers<[1], [0], [0], [1], [0, 0, 1, 1], [], []>} : vector<8x8xbf16>, vector<8x8xbf16>, vector<8x8xf32> -> vector<8x8xf32>
    %111 = tpu.concatenate %44, %66, %88, %110 in 1 : vector<8x8xf32>, vector<8x8xf32>, vector<8x8xf32>, vector<8x8xf32> -> vector<8x32xf32>
    %112 = arith.truncf %111 : vector<8x32xf32> to vector<8x32xbf16>
    %c0_40 = arith.constant 0 : index
    %c0_41 = arith.constant 0 : index
    %113 = vector.load %arg8[%c0_40, %c0_41] : memref<32x32xbf16, #tpu.memory_space<vmem>>, vector<32x32xbf16>
    %cst_42 = arith.constant dense<0.000000e+00> : vector<8x32xf32>
    %114 = tpu.matmul %112, %113, %cst_42 {dimension_numbers = #tpu.dot_dimension_numbers<[1], [0], [0], [1], [0, 0, 1, 1], [], []>} : vector<8x32xbf16>, vector<32x32xbf16>, vector<8x32xf32> -> vector<8x32xf32>
    %c0_43 = arith.constant 0 : index
    %c0_44 = arith.constant 0 : index
    %115 = vector.load %arg9[%c0_43, %c0_44] : memref<1x32xf32, #tpu.memory_space<vmem>>, vector<1x32xf32>
    %116 = vector.broadcast %115 : vector<1x32xf32> to vector<8x32xf32>
    %117 = arith.addf %114, %116 : vector<8x32xf32>
    %118 = arith.addf %1, %117 : vector<8x32xf32>
    %cst_45 = arith.constant dense<0.000000e+00> : vector<8xf32>
    %119 = vector.multi_reduction <add>, %118, %cst_45 [1] : vector<8x32xf32> to vector<8xf32>
    %120 = vector.shape_cast %119 : vector<8xf32> to vector<8x1xf32>
    %cst_46 = arith.constant 3.200000e+01 : f32
    %121 = vector.broadcast %cst_46 : f32 to vector<8x1xf32>
    %122 = arith.divf %120, %121 : vector<8x1xf32>
    %123 = vector.broadcast %122 : vector<8x1xf32> to vector<8x32xf32>
    %124 = arith.subf %118, %123 : vector<8x32xf32>
    %125 = arith.mulf %124, %124 : vector<8x32xf32>
    %cst_47 = arith.constant dense<0.000000e+00> : vector<8xf32>
    %126 = vector.multi_reduction <add>, %125, %cst_47 [1] : vector<8x32xf32> to vector<8xf32>
    %127 = vector.shape_cast %126 : vector<8xf32> to vector<8x1xf32>
    %cst_48 = arith.constant 3.200000e+01 : f32
    %128 = vector.broadcast %cst_48 : f32 to vector<8x1xf32>
    %129 = arith.divf %127, %128 : vector<8x1xf32>
    %130 = vector.broadcast %122 : vector<8x1xf32> to vector<8x32xf32>
    %131 = arith.subf %118, %130 : vector<8x32xf32>
    %cst_49 = arith.constant 9.99999974E-6 : f32
    %132 = vector.broadcast %cst_49 : f32 to vector<8x1xf32>
    %133 = arith.addf %129, %132 : vector<8x1xf32>
    %134 = math.rsqrt %133 : vector<8x1xf32>
    %135 = vector.broadcast %134 : vector<8x1xf32> to vector<8x32xf32>
    %136 = arith.mulf %131, %135 : vector<8x32xf32>
    %c0_50 = arith.constant 0 : index
    %c0_51 = arith.constant 0 : index
    %137 = vector.load %arg10[%c0_50, %c0_51] : memref<1x32xf32, #tpu.memory_space<vmem>>, vector<1x32xf32>
    %138 = vector.broadcast %137 : vector<1x32xf32> to vector<8x32xf32>
    %139 = arith.mulf %136, %138 : vector<8x32xf32>
    %c0_52 = arith.constant 0 : index
    %c0_53 = arith.constant 0 : index
    %140 = vector.load %arg11[%c0_52, %c0_53] : memref<1x32xf32, #tpu.memory_space<vmem>>, vector<1x32xf32>
    %141 = vector.broadcast %140 : vector<1x32xf32> to vector<8x32xf32>
    %142 = arith.addf %139, %141 : vector<8x32xf32>
    %c0_54 = arith.constant 0 : index
    %c0_55 = arith.constant 0 : index
    %c0_56 = arith.constant 0 : index
    %143 = vector.load %arg12[%c0_54, %c0_55, %c0_56] : memref<1x8x32xf32, #tpu.memory_space<vmem>>, vector<1x8x32xf32>
    %144 = vector.shape_cast %143 : vector<1x8x32xf32> to vector<8x32xf32>
    %145 = vector.shape_cast %142 : vector<8x32xf32> to vector<1x8x32xf32>
    tpu.vector_store %arg12[%c0_54, %c0_55, %c0_56], %145 {strides = array<i32>} : memref<1x8x32xf32, #tpu.memory_space<vmem>>, vector<1x8x32xf32>,
    return
  }
  func.func @transform_0(%arg0: i32) -> (i32, i32, i32) {
    %c0_i32 = arith.constant 0 : i32
    %c0_i32_0 = arith.constant 0 : i32
    %c0_i32_1 = arith.constant 0 : i32
    return %arg0, %c0_i32, %c0_i32_0 : i32, i32, i32
  }
  func.func @transform_1(%arg0: i32) -> (i32, i32, i32) {
    %c0_i32 = arith.constant 0 : i32
    %c0_i32_0 = arith.constant 0 : i32
    %c0_i32_1 = arith.constant 0 : i32
    return %arg0, %c0_i32, %c0_i32_0 : i32, i32, i32
  }
  func.func @transform_2(%arg0: i32) -> (i32, i32, i32) {
    %c0_i32 = arith.constant 0 : i32
    %c0_i32_0 = arith.constant 0 : i32
    %c0_i32_1 = arith.constant 0 : i32
    return %arg0, %c0_i32, %c0_i32_0 : i32, i32, i32
  }
  func.func @transform_3(%arg0: i32) -> (i32, i32) {
    %c0_i32 = arith.constant 0 : i32
    %c0_i32_0 = arith.constant 0 : i32
    %c0_i32_1 = arith.constant 0 : i32
    return %c0_i32, %c0_i32_0 : i32, i32
  }
  func.func @transform_4(%arg0: i32) -> (i32, i32) {
    %c0_i32 = arith.constant 0 : i32
    %c0_i32_0 = arith.constant 0 : i32
    %c0_i32_1 = arith.constant 0 : i32
    return %c0_i32, %c0_i32_0 : i32, i32
  }
  func.func @transform_5(%arg0: i32) -> (i32, i32) {
    %c0_i32 = arith.constant 0 : i32
    %c0_i32_0 = arith.constant 0 : i32
    %c0_i32_1 = arith.constant 0 : i32
    return %c0_i32, %c0_i32_0 : i32, i32
  }
  func.func @transform_6(%arg0: i32) -> (i32, i32) {
    %c0_i32 = arith.constant 0 : i32
    %c0_i32_0 = arith.constant 0 : i32
    %c0_i32_1 = arith.constant 0 : i32
    return %c0_i32, %c0_i32_0 : i32, i32
  }
  func.func @transform_7(%arg0: i32) -> (i32, i32) {
    %c0_i32 = arith.constant 0 : i32
    %c0_i32_0 = arith.constant 0 : i32
    %c0_i32_1 = arith.constant 0 : i32
    return %c0_i32, %c0_i32_0 : i32, i32
  }
  func.func @transform_8(%arg0: i32) -> (i32, i32) {
    %c0_i32 = arith.constant 0 : i32
    %c0_i32_0 = arith.constant 0 : i32
    %c0_i32_1 = arith.constant 0 : i32
    return %c0_i32, %c0_i32_0 : i32, i32
  }
  func.func @transform_9(%arg0: i32) -> (i32, i32) {
    %c0_i32 = arith.constant 0 : i32
    %c0_i32_0 = arith.constant 0 : i32
    %c0_i32_1 = arith.constant 0 : i32
    return %c0_i32, %c0_i32_0 : i32, i32
  }
  func.func @transform_10(%arg0: i32) -> (i32, i32) {
    %c0_i32 = arith.constant 0 : i32
    %c0_i32_0 = arith.constant 0 : i32
    %c0_i32_1 = arith.constant 0 : i32
    return %c0_i32, %c0_i32_0 : i32, i32
  }
  func.func @transform_11(%arg0: i32) -> (i32, i32, i32) {
    %c0_i32 = arith.constant 0 : i32
    %c0_i32_0 = arith.constant 0 : i32
    %c0_i32_1 = arith.constant 0 : i32
    return %arg0, %c0_i32, %c0_i32_0 : i32, i32, i32
  }
}

</mosaic_0001>

<bundles_post_ra>
// kernel: transformer_forward.13
= control target key start
LH: loop header
LB: loop body
LE: loop exit
PB: predicated region body
PF: predicated region fallthrough
CT: control target
= control target key end

     0   :  { %vm18_vm0 = vcmask 261120   ;;  %s55_s0 = inlined_call_operand.vmem [shape: f32[2,8,32], index: 0, kind: input, shape index: {}]   ;;  %s56_s1 = inlined_call_operand.vmem [shape: f32[1,8,32], index: 1, kind: input, shape index: {}]   ;;  %s57_s2 = inlined_call_operand.vmem [shape: f32[2,8,32], index: 2, kind: output, shape index: {}]  }
   0x1   :  { %v11_v0 = vld [vmem:[%s55_s0] sm:$0xff]  ;;  %v12_v2 = vld [vmem:[%s55_s0 + $0x8] sm:$0xff] }
   0x2   :  { %v15_v1 = vld [vmem:[%s56_s1] sm:$0xff]  ;;  %v13_v3 = vmul.f32 5.656854, %v11_v0  ;;  %v14_v4 = vmul.f32 5.656854, %v12_v2 }
   0x4   :  { %v16_v5 = vadd.f32 %v15_v1, %v13_v3  ;;  %v17_v6 = vadd.f32 %v15_v1, %v14_v4 }
   0x6   :  { %19 = vst.msk [vmem:[%s57_s2] sm:$0xff] %vm18_vm0, %v16_v5  ;;  %20 = vst.msk [vmem:[%s57_s2 + $0x8] sm:$0xff] %vm18_vm0, %v17_v6 }

// kernel: transformer_forward.15
= control target key start
LH: loop header
LB: loop body
LE: loop exit
PB: predicated region body
PF: predicated region fallthrough
CT: control target
= control target key end

     0   :  { %s1453_s17 = smov 0   ;;  %s1601_s0 = inlined_call_operand.vmem [shape: f32[2,8,32], index: 0, kind: input, shape index: {}, may-alias: {0,1}]   ;;  %s1602_s1 = inlined_call_operand.vmem [shape: f32[2,8,32], index: 1, kind: input, shape index: {}, may-alias: {0,1}]   ;;  %s1603_s2 = inlined_call_operand.vmem [shape: f32[2,1,8], index: 2, kind: input, shape index: {}]   ;;  %s1604_s3 = inlined_call_operand.vmem [shape: bf16[32,32], index: 3, kind: input, shape index: {}]   ;;  %s1605_s4 = inlined_call_operand.vmem [shape: f32[1,32], index: 4, kind: input, shape index: {}]   ;;  %s1606_s5 = inlined_call_operand.vmem [shape: bf16[32,64], index: 5, kind: input, shape index: {}]   ;;  %s1607_s6 = inlined_call_operand.vmem [shape: f32[1,64], index: 6, kind: input, shape index: {}]   ;;  %s1608_s7 = inlined_call_operand.vmem [shape: bf16[32,32], index: 7, kind: input, shape index: {}]   ;;  %s1609_s8 = inlined_call_operand.vmem [shape: f32[1,32], index: 8, kind: input, shape index: {}]   ;;  %s1610_s9 = inlined_call_operand.vmem [shape: f32[1,32], index: 9, kind: input, shape index: {}]   ;;  %s1611_s10 = inlined_call_operand.vmem [shape: f32[1,32], index: 10, kind: input, shape index: {}]   ;;  %s1612_s11 = inlined_call_operand.vmem [shape: f32[2,8,32], index: 11, kind: output, shape index: {}]  }
   0x1 LB: > { %s1200_s18 = sadd.s32 4294967295, %s1379_s17   ;;  %p1204_p0 = scmp.ge.s32.totalorder %s1379_s17, 1  ;;  %s1379_s17 = sphi %s1453_s17, %s21_s17  }
   0x2   : > { %p353_p1 = scmp.lt.s32.totalorder %s1379_s17, 3 }
   0x4   : > { %p354_p2 = pnand %p1204_p0, %p353_p1 }
   0x5   : > { %v1349_v0 = vld [vmem:[%s1606_s5] sm:$0xff] (!%p354_p2)   ;;  %v1381_v1 = vmov (!%p354_p2), 0.0   ;;  %v1351_v3 = vld [vmem:[%s1606_s5 + $0x8] sm:$0xff] (!%p354_p2)   ;;  %vm1382_vm0 = vmmov (!%p354_p2), 0   ;;  %p398_p3 = scmp.lt.s32.totalorder (!%p354_p2), %s1200_s18, 1  ;;  %vm440_vm1 = vcmask (!%p354_p2), 261120   ;;  %v605_v33 = vlaneseq (!%p354_p2) }
   0x6   : > { %357 = sbr.rel (%p354_p2) target bundleno = 1775 (0x6ef), region = 64  ;;  %1265 = vmatprep.subr.bf16.mxu1 (!%p354_p2), %v1381_v1  ;;  %1257 = vmatprep.subr.bf16.mxu0 (!%p354_p2), %v1381_v1  ;;  %v1350_v2 = vld [vmem:[%s1604_s3] sm:$0xff] (!%p354_p2)   ;;  %v1352_v4 = vld [vmem:[%s1604_s3 + $0x8] sm:$0xff] (!%p354_p2)   ;;  %vm556_vm2 = vcmask (!%p354_p2), 64512   ;;  %s1383_s21 = smov (!%p354_p2), 112   ;;  %vm629_vm4 = vcmask (!%p354_p2), 1043456  }
   0x7   : > { %1266 = vmatpush3.bf16.msra.mxu1 (!%p354_p2), %v1349_v0  ;;  %1269 = vmatprep.mubr.msk.bf16.mxu1 (!%p354_p2), %vm1382_vm0, %v1381_v1  ;;  %v1212_v9 = vld [vmem:[%s1607_s6] ss:$0 sm:$0xff] (!%p354_p2)  ;;  %s1384_s22 = smov (!%p354_p2), 120   ;;  %s1385_s23 = smov (!%p354_p2), 104   ;;  %v606_v35 = vshrl.u32 (!%p354_p2), %v605_v33, 7  ;;  %vm1023_vm5 = vcmask (!%p354_p2), 130048  }
   0x8   : > { %1267 = vmatprep.subr.bf16.mxu1 (!%p354_p2), %v1381_v1  ;;  %1258 = vmatpush3.bf16.msra.mxu0 (!%p354_p2), %v1350_v2  ;;  %v1208_v10 = vld [vmem:[%s1605_s4] ss:$0 sm:$0xff] (!%p354_p2)  ;;  %s1387_s28 = smov (!%p354_p2), 80   ;;  %s1388_s29 = smov (!%p354_p2), 72   ;;  %vm1025_vm6 = vcmask (!%p354_p2), 195584  }
   0x9   : > { %1259 = vmatprep.subr.bf16.mxu0 (!%p354_p2), %v1381_v1  ;;  %1261 = vmatprep.mubr.msk.bf16.mxu0 (!%p354_p2), %vm1382_vm0, %v1381_v1  ;;  %v607_v36 = vsub.s32 (!%p354_p2), 0, %v606_v35  ;;  %s1391_s19 = smov (!%p354_p2), 16   ;;  %s1392_s20 = smov (!%p354_p2), 24  }
   0xb   : > { %1268 = vmatpush3.bf16.msra.mxu1 (!%p354_p2), %v1351_v3 }
   0xc   : > { %1260 = vmatpush3.bf16.msra.mxu0 (!%p354_p2), %v1352_v4  ;;  %1279 = vmatprep.subr.bf16.mxu1 (!%p354_p2), %v1381_v1 }
   0xd   : > { %s1614_s18 = smov (!%p398_p3, %s1200_s18), 1  ;;  %1273 = vmatprep.subr.bf16.mxu0 %v1381_v1 }
   0xe   : > { %s1484_s27 = sshll.u32 %s1614_s18, 3  ;;  %s408_s26 = scalar_lea.vmem %s1603_s2, %s1614_s18 }
   0xf   : > { %s405_s30 = scalar_lea.vmem %s1602_s1, %s1484_s27  ;;  %s401_s14 = scalar_lea.vmem %s1601_s0, %s1484_s27  ;;  %v551_v34 = vld [vmem:[%s408_s26] sm:$0x1] }
  0x10   : > { %v415_v5 = vld [vmem:[%s405_s30] sm:$0xff]  ;;  %vm552_vm3 = vcmp.eq.f32.partialorder %v551_v34, 0.0  ;;  %s1386_s18 = smov 96   ;;  %s1389_s30 = smov 88  }
  0x11   : > { %v484_v6 = vpack.c.bf16 %v415_v5, %v415_v5  ;;  %v1496_v7 = vld [vmem:[%s401_s14] sm:$0xff]  ;;  %v553_v37 = vsel %vm552_vm3, -1e+09, %v1381_v1  ;;  %s1390_s14 = smov 8  }
  0x12   : > { %v416_v8 = vpack.c.bf16 %v1496_v7, %v1496_v7  ;;  %v608_v38 = vrot.slane %v553_v37, %v607_v36 }
  0x13   : > { %1270 = vmatmul.mubr.msk.bf16.vlgmr.msra.gmra.mrb[0].mxu1 %vm440_vm1, %v484_v6 }
  0x14   : > { %1262 = vmatmul.mubr.msk.bf16.vlgmr.msra.gmra.mrb[0].mxu0 %vm440_vm1, %v416_v8  ;;  %1281 = vmatprep.mubr.msk.bf16.mxu1 %vm1382_vm0, %v1381_v1 }
  0x15   : > { %1275 = vmatprep.mubr.msk.bf16.mxu0 %vm1382_vm0, %v1381_v1 }
  0xe6   : > { %v545_v11 = vpop.f32.mrb[0].mxu1 }
  0xe7   : > { %v546_v12 = vadd.f32 %v1212_v9, %v545_v11  ;;  %v1271_v13 = vpop.f32.mrb[1].mxu1  ;;  %v478_v14 = vpop.f32.mrb[0].mxu0 }
  0xe8   : > { %v548_v15 = vpop.f32.mrb[2].mxu1  ;;  %v479_v16 = vadd.f32 %v1208_v10, %v478_v14  ;;  %v1263_v17 = vpop.f32.mrb[1].mxu0 }
  0xe9   : > { %v1512_v18 = vpack.c.bf16 %v546_v12, %v546_v12  ;;  %v1272_v19 = vpop.f32.mrb[3].mxu1  ;;  %v481_v20 = vpop.f32.mrb[2].mxu0 }
  0xea   : > { %v1264_v21 = vpop.f32.mrb[3].mxu0  ;;  %v554_v22 = vpack.c.bf16 %v479_v16, %v479_v16 }
  0xeb   : > { %788 = vrot.lane.b32.xlu1 %v1512_v18, %s1383_s21  ;;  %676 = vrot.lane.b32.xlu0 %v1512_v18, %s1384_s22  ;;  %v561_v23 = vsel %vm556_vm2, %v1512_v18, 0 }
  0xec   : > { %1274 = vmatpush3.bf16.xpose.msra.mxu0 %v561_v23 }
  0xed   : > { %1285 = vmatprep.subr.bf16.mxu0 %v1381_v1 }
  0xef   : > { %786 = vrot.lane.b32.xlu1 %v554_v22, %s1383_s21  ;;  %674 = vrot.lane.b32.xlu0 %v554_v22, %s1384_s22 }
  0xf3   : > { %898 = vrot.lane.b32.xlu1 %v554_v22, %s1385_s23  ;;  %900 = vrot.lane.b32.xlu0 %v1512_v18, %s1385_s23 }
  0xf4   : > { %1276 = vmatmul.mubr.msk.bf16.vlgmr.msra.gmra.mrb[4].mxu0 %vm556_vm2, %v554_v22 }
  0xf5   : > { %1287 = vmatprep.mubr.msk.bf16.mxu0 %vm1382_vm0, %v1381_v1 }
 0x15d   : > { %v677_v24 = vpop.permute.xlu0 %676  ;;  %v789_v26 = vpop.permute.xlu1 %788 }
 0x15e   : > { %v682_v25 = vsel %vm556_vm2, %v677_v24, 0  ;;  %v794_v28 = vsel %vm556_vm2, %v789_v26, 0 }
 0x15f   : > { %1286 = vmatpush3.bf16.xpose.msra.mxu0 %v682_v25 }
 0x160   : > { %1297 = vmatprep.subr.bf16.mxu0 %v1381_v1 }
 0x161   : > { %v675_v27 = vpop.permute.xlu0 %674  ;;  %v787_v30 = vpop.permute.xlu1 %786 }
 0x165   : > { %v901_v29 = vpop.permute.xlu0 %900  ;;  %v899_v32 = vpop.permute.xlu1 %898 }
 0x166   : > { %1288 = vmatmul.mubr.msk.bf16.vlgmr.msra.gmra.mrb[8].mxu0 %vm556_vm2, %v675_v27  ;;  %v906_v31 = vsel %vm556_vm2, %v901_v29, 0 }
 0x167   : > { %1298 = vmatpush3.bf16.xpose.msra.mxu0 %v794_v28  ;;  %1299 = vmatprep.mubr.msk.bf16.mxu0 %vm1382_vm0, %v1381_v1 }
 0x168   : > { %1309 = vmatprep.subr.bf16.mxu0 %v1381_v1 }
 0x16e   : > { %1300 = vmatmul.mubr.msk.bf16.vlgmr.msra.gmra.mrb[12].mxu0 %vm556_vm2, %v787_v30 }
 0x16f   : > { %1310 = vmatpush3.bf16.xpose.msra.mxu0 %v906_v31  ;;  %1311 = vmatprep.mubr.msk.bf16.mxu0 %vm1382_vm0, %v1381_v1 }
 0x170   : > { %1321 = vmatprep.subr.bf16.mxu0 %v1381_v1 }
 0x176   : > { %1312 = vmatmul.mubr.msk.bf16.vlgmr.msra.gmra.mrb[16].mxu0 %vm556_vm2, %v899_v32 }
 0x177   : > { %1325 = vmatprep.mubr.msk.bf16.mxu0 %vm1382_vm0, %v1381_v1 }
 0x1c7   : > { %v597_v39 = vpop.f32.mrb[4].mxu0 }
 0x1c8   : > { %v603_v40 = vmul.f32 0.35355338, %v597_v39  ;;  %v1277_v41 = vpop.f32.mrb[5].mxu0 }
 0x1c9   : > { %v600_v42 = vpop.f32.mrb[6].mxu0 }
 0x1ca   : > { %v1278_v43 = vpop.f32.mrb[7].mxu0  ;;  %v610_v44 = vadd.f32 %v608_v38, %v603_v40 }
 0x1cc   : > { %v611_v45 = vsel %vm556_vm2, %v610_v44, -inf }
 0x1cd   : > { %612 = vmax.xlane.f32.xlu0 %v611_v45 }
 0x239   : > { %v718_v46 = vpop.f32.mrb[8].mxu0 }
 0x23a   : > { %v724_v47 = vmul.f32 0.35355338, %v718_v46  ;;  %v1289_v48 = vpop.f32.mrb[9].mxu0 }
 0x23b   : > { %v721_v49 = vpop.f32.mrb[10].mxu0 }
 0x23c   : > { %v1290_v50 = vpop.f32.mrb[11].mxu0  ;;  %v725_v51 = vadd.f32 %v724_v47, %v608_v38 }
 0x23e   : > { %v726_v52 = vsel %vm556_vm2, %v725_v51, -inf }
 0x23f   : > { %727 = vmax.xlane.f32.xlu1 %v726_v52 }
 0x241   : > { %v830_v53 = vpop.f32.mrb[12].mxu0 }
 0x242   : > { %v836_v54 = vmul.f32 0.35355338, %v830_v53  ;;  %v1301_v55 = vpop.f32.mrb[13].mxu0  ;;  %v1353_v53 = vld [vmem:[%s1608_s7] sm:$0xff]  }
 0x243   : > { %v833_v56 = vpop.f32.mrb[14].mxu0  ;;  %1322 = vmatpush3.bf16.msra.mxu0 %v1353_v53 }
 0x244   : > { %v1302_v57 = vpop.f32.mrb[15].mxu0  ;;  %v837_v58 = vadd.f32 %v836_v54, %v608_v38  ;;  %1323 = vmatprep.subr.bf16.mxu0 %v1381_v1 }
 0x246   : > { %v838_v59 = vsel %vm556_vm2, %v837_v58, -inf }
 0x247   : > { %839 = vmax.xlane.f32.xlu0 %v838_v59 }
 0x249   : > { %v942_v60 = vpop.f32.mrb[16].mxu0 }
 0x24a   : > { %v948_v61 = vmul.f32 0.35355338, %v942_v60  ;;  %v1313_v62 = vpop.f32.mrb[17].mxu0 }
 0x24b   : > { %v945_v63 = vpop.f32.mrb[18].mxu0 }
 0x24c   : > { %v1314_v0 = vpop.f32.mrb[19].mxu0  ;;  %v949_v2 = vadd.f32 %v948_v61, %v608_v38 }
 0x24e   : > { %v950_v3 = vsel %vm556_vm2, %v949_v2, -inf }
 0x24f   : > { %951 = vmax.xlane.f32.xlu0 %v950_v3 }
 0x25a   : > { %v613_v4 = vpop.xlane.xlu0 %612 }
 0x25b   : > { %v614_v5 = vsub.f32 %v610_v44, %v613_v4 }
 0x25d   : > { %v615_v6 = vmul.f32 1.442695, %v614_v5 }
 0x25f   : > { %1355 = vpow2.f32 %v615_v6 }
 0x269   : > { %v1356_v8 = vpop.eup %1355 }
 0x26a   : > { %v617_v9 = vsel %vm556_vm2, %v1356_v8, 0.0 }
 0x26b   : > { %618 = vadd.xlane.f32.xlu1 %v617_v9 }
 0x27c   : > { %624 = vrot.lane.b32.xlu1 %v1512_v18, %s1386_s18 }
 0x2cc   : > { %v728_v10 = vpop.xlane.xlu1 %727 }
 0x2cd   : > { %v729_v11 = vsub.f32 %v725_v51, %v728_v10 }
 0x2cf   : > { %v730_v12 = vmul.f32 1.442695, %v729_v11  ;;  %v1224_v11 = vld [vmem:[%s1609_s8] ss:$0 sm:$0xff] }
 0x2d1   : > { %1357 = vpow2.f32 %v730_v12 }
 0x2d4   : > { %v840_v13 = vpop.xlane.xlu0 %839 }
 0x2d5   : > { %v841_v14 = vsub.f32 %v837_v58, %v840_v13  ;;  %v1354_v58 = vld [vmem:[%s1608_s7 + $0x8] sm:$0xff]  }
 0x2d6   : > { %1324 = vmatpush3.bf16.msra.mxu0 %v1354_v58 }
 0x2d7   : > { %v842_v15 = vmul.f32 1.442695, %v841_v14 }
 0x2d9   : > { %1359 = vpow2.f32 %v842_v15 }
 0x2db   : > { %v1358_v16 = vpop.eup %1357 }
 0x2dc   : > { %v952_v17 = vpop.xlane.xlu0 %951  ;;  %v732_v19 = vsel %vm556_vm2, %v1358_v16, 0.0 }
 0x2dd   : > { %v953_v20 = vsub.f32 %v949_v2, %v952_v17  ;;  %733 = vadd.xlane.f32.xlu0 %v732_v19 }
 0x2df   : > { %v954_v21 = vmul.f32 1.442695, %v953_v20 }
 0x2e1   : > { %1361 = vpow2.f32 %v954_v21 }
 0x2e3   : > { %v1360_v22 = vpop.eup %1359 }
 0x2e4   : > { %v844_v23 = vsel %vm556_vm2, %v1360_v22, 0.0 }
 0x2e5   : > { %845 = vadd.xlane.f32.xlu1 %v844_v23 }
 0x2eb   : > { %v1362_v24 = vpop.eup %1361 }
 0x2ec   : > { %v956_v25 = vsel %vm556_vm2, %v1362_v24, 0.0 }
 0x2ed   : > { %957 = vadd.xlane.f32.xlu0 %v956_v25 }
 0x2f6   : > { %850 = vrot.lane.b32.xlu1 %v1512_v18, %s1387_s28 }
 0x2f8   : > { %v619_v26 = vpop.xlane.xlu1 %618 }
 0x2f9   : > { %1363 = vrcp.f32 %v619_v26 }
 0x2fa   : > { %962 = vrot.lane.b32.xlu1 %v1512_v18, %s1388_s29  ;;  %s412_s29 = scalar_lea.vmem %s1612_s11, %s1484_s27 }
 0x2fc   : > { %v625_v27 = vpop.permute.xlu1 %624 }
 0x2fd   : > { %v631_v28 = vsel %vm629_vm4, %v625_v27, 0 }
 0x2fe   : > { %1280 = vmatpush3.bf16.msra.mxu1 %v631_v28 }
 0x2ff   : > { %1291 = vmatprep.subr.bf16.mxu1 %v1381_v1 }
 0x303   : > { %v1364_v29 = vpop.eup %1363  ;;  %738 = vrot.lane.b32.xlu0 %v1512_v18, %s1389_s30 }
 0x304   : > { %v621_v30 = vmul.f32 %v1364_v29, %v1356_v8 }
 0x306   : > { %v622_v31 = vpack.c.bf16 %v621_v30, %v621_v30  ;;  %v1229_v30 = vld [vmem:[%s1611_s10] ss:$0 sm:$0xff] }
 0x308   : > { %1282 = vmatmul.mubr.msk.bf16.vlgmr.msra.gmra.mrb[4].mxu1 %vm556_vm2, %v622_v31 }
 0x309   : > { %1293 = vmatprep.mubr.msk.bf16.mxu1 %vm1382_vm0, %v1381_v1 }
 0x36a   : > { %v734_v32 = vpop.xlane.xlu0 %733 }
 0x36b   : > { %1365 = vrcp.f32 %v734_v32 }
 0x372   : > { %v846_v33 = vpop.xlane.xlu1 %845 }
 0x373   : > { %1367 = vrcp.f32 %v846_v33 }
 0x375   : > { %v1366_v34 = vpop.eup %1365 }
 0x376   : > { %v736_v36 = vmul.f32 %v1366_v34, %v1358_v16  ;;  %v851_v39 = vpop.permute.xlu1 %850 }
 0x377   : > { %v856_v41 = vsel %vm629_vm4, %v851_v39, 0 }
 0x378   : > { %v737_v18 = vpack.c.bf16 %v736_v36, %v736_v36 }
 0x37a   : > { %v958_v35 = vpop.xlane.xlu0 %957  ;;  %v963_v43 = vpop.permute.xlu1 %962 }
 0x37b   : > { %1369 = vrcp.f32 %v958_v35  ;;  %v968_v46 = vsel %vm629_vm4, %v963_v43, 0 }
 0x37d   : > { %v1368_v40 = vpop.eup %1367 }
 0x37e   : > { %v739_v37 = vpop.permute.xlu0 %738  ;;  %v848_v42 = vmul.f32 %v1368_v40, %v1360_v22 }
 0x37f   : > { %v744_v38 = vsel %vm629_vm4, %v739_v37, 0 }
 0x380   : > { %1292 = vmatpush3.bf16.msra.mxu1 %v744_v38  ;;  %v849_v44 = vpack.c.bf16 %v848_v42, %v848_v42 }
 0x381   : > { %1303 = vmatprep.subr.bf16.mxu1 %v1381_v1 }
 0x383   : > { %1294 = vmatmul.mubr.msk.bf16.vlgmr.msra.gmra.mrb[8].mxu1 %vm556_vm2, %v737_v18 }
 0x384   : > { %1304 = vmatpush3.bf16.msra.mxu1 %v856_v41  ;;  %1305 = vmatprep.mubr.msk.bf16.mxu1 %vm1382_vm0, %v1381_v1 }
 0x385   : > { %1315 = vmatprep.subr.bf16.mxu1 %v1381_v1  ;;  %v1370_v45 = vpop.eup %1369 }
 0x386   : > { %v960_v47 = vmul.f32 %v1370_v45, %v1362_v24 }
 0x388   : > { %v961_v48 = vpack.c.bf16 %v960_v47, %v960_v47 }
 0x38b   : > { %1306 = vmatmul.mubr.msk.bf16.vlgmr.msra.gmra.mrb[12].mxu1 %vm556_vm2, %v849_v44 }
 0x38c   : > { %1316 = vmatpush3.bf16.msra.mxu1 %v968_v46  ;;  %1317 = vmatprep.mubr.msk.bf16.mxu1 %vm1382_vm0, %v1381_v1 }
 0x393   : > { %1318 = vmatmul.mubr.msk.bf16.vlgmr.msra.gmra.mrb[16].mxu1 %vm556_vm2, %v961_v48 }
 0x3db   : > { %v667_v49 = vpop.f32.mrb[4].mxu1 }
 0x3dc   : > { %v1283_v50 = vpop.f32.mrb[5].mxu1 }
 0x3dd   : > { %v670_v51 = vpop.f32.mrb[6].mxu1 }
 0x3de   : > { %v1284_v52 = vpop.f32.mrb[7].mxu1 }
 0x456   : > { %v780_v54 = vpop.f32.mrb[8].mxu1 }
 0x457   : > { %1011 = vrot.lane.b32.xlu0 %v780_v54, %s1390_s14  ;;  %v1295_v55 = vpop.f32.mrb[9].mxu1 }
 0x458   : > { %v783_v56 = vpop.f32.mrb[10].mxu1 }
 0x459   : > { %v1296_v57 = vpop.f32.mrb[11].mxu1 }
 0x45e   : > { %v892_v59 = vpop.f32.mrb[12].mxu1 }
 0x45f   : > { %1015 = vrot.lane.b32.xlu1 %v892_v59, %s1391_s19  ;;  %v1307_v60 = vpop.f32.mrb[13].mxu1 }
 0x460   : > { %v895_v61 = vpop.f32.mrb[14].mxu1 }
 0x461   : > { %v1308_v62 = vpop.f32.mrb[15].mxu1 }
 0x466   : > { %v1004_v63 = vpop.f32.mrb[16].mxu1 }
 0x467   : > { %1019 = vrot.lane.b32.xlu0 %v1004_v63, %s1392_s20  ;;  %v1319_v1 = vpop.f32.mrb[17].mxu1 }
 0x468   : > { %v1007_v0 = vpop.f32.mrb[18].mxu1 }
 0x469   : > { %v1320_v2 = vpop.f32.mrb[19].mxu1 }
 0x4c9   : > { %v1012_v3 = vpop.permute.xlu0 %1011 }
 0x4ca   : > { %v1022_v5 = vsel %vm556_vm2, %v667_v49, %v1012_v3 }
 0x4d1   : > { %v1016_v4 = vpop.permute.xlu1 %1015 }
 0x4d2   : > { %v1024_v6 = vsel %vm1023_vm5, %v1022_v5, %v1016_v4 }
 0x4d9   : > { %v1020_v8 = vpop.permute.xlu0 %1019 }
 0x4da   : > { %v1026_v9 = vsel %vm1025_vm6, %v1024_v6, %v1020_v8 }
 0x4db   : > { %v1027_v10 = vpack.c.bf16 %v1026_v9, %v1026_v9 }
 0x4dd   : > { %1326 = vmatmul.mubr.msk.bf16.vlgmr.msra.gmra.mrb[20].mxu0 %vm440_vm1, %v1027_v10 }
 0x5b0   : > { %v1088_v12 = vpop.f32.mrb[20].mxu0 }
 0x5b1   : > { %v1089_v13 = vadd.f32 %v1224_v11, %v1088_v12  ;;  %v1327_v14 = vpop.f32.mrb[21].mxu0 }
 0x5b2   : > { %v1091_v15 = vpop.f32.mrb[22].mxu0 }
 0x5b3   : > { %v1328_v16 = vpop.f32.mrb[23].mxu0  ;;  %v1094_v17 = vadd.f32 %v1089_v13, %v1496_v7  ;;  %v1228_v7 = vld [vmem:[%s1610_s9] ss:$0 sm:$0xff] }
 0x5b5   : > { %v1095_v19 = vsel %vm440_vm1, %v1094_v17, 0.0 }
 0x5b6   : > { %1096 = vadd.xlane.f32.xlu1 %v1095_v19 }
 0x643   : > { %v1097_v20 = vpop.xlane.xlu1 %1096 }
 0x644   : > { %v1099_v21 = vmul.f32 0.03125, %v1097_v20 }
 0x646   : > { %v1100_v22 = vsub.f32 %v1094_v17, %v1099_v21 }
 0x648   : > { %v1101_v23 = vmul.f32 %v1100_v22, %v1100_v22 }
 0x64a   : > { %v1102_v24 = vsel %vm440_vm1, %v1101_v23, 0.0 }
 0x64b   : > { %1103 = vadd.xlane.f32.xlu0 %v1102_v24 }
 0x6d8   : > { %v1104_v25 = vpop.xlane.xlu0 %1103 }
 0x6d9   : > { %v1105_v26 = vmul.f32 0.03125, %v1104_v25 }
 0x6db   : > { %v1106_v27 = vadd.f32 1e-05, %v1105_v26 }
 0x6dd   : > { %1371 = vrsqrt.f32 %v1106_v27 }
 0x6e7   : > { %v1372_v28 = vpop.eup %1371 }
 0x6e8   : > { %v1108_v29 = vmul.f32 %v1372_v28, %v1100_v22 }
 0x6ea   : > { %v1116_v31 = vmul.f32 %v1228_v7, %v1108_v29 }
 0x6ec   : > { %v1124_v32 = vadd.f32 %v1229_v30, %v1116_v31 }
 0x6ee   : > { %1125 = vst.msk [vmem:[%s412_s29] sm:$0xff] %vm440_vm1, %v1124_v32 }
 0x6ef PF: > { %s21_s17 = sadd.s32 1, %s1379_s17  }
 0x6f0   : > { %p18_p4 = scmp.ge.s32.totalorder %s21_s17, 4  }
 0x6f2   :  { %20 = sbr.rel (!%p18_p4) target bundleno = 1 (0x1), region = 100 }

// kernel: transformer_forward.25
= control target key start
LH: loop header
LB: loop body
LE: loop exit
PB: predicated region body
PF: predicated region fallthrough
CT: control target
= control target key end

     0   :  { %v203_v0 = vmov 0.0   ;;  %vm204_vm0 = vmmov 0   ;;  %s264_s1 = inlined_call_operand.vmem [shape: bf16[128,128], index: 1, kind: input, shape index: {}]   ;;  %s265_s0 = inlined_call_operand.vmem [shape: f32[16,128], index: 0, kind: input, shape index: {}]   ;;  %s266_s2 = inlined_call_operand.vmem [shape: f32[1,128], index: 2, kind: input, shape index: {}]   ;;  %s267_s3 = inlined_call_operand.vmem [shape: f32[16,128], index: 3, kind: output, shape index: {}]  }
   0x1   :  { %173 = vmatprep.subr.bf16.mxu0 %v203_v0  ;;  %v195_v1 = vld [vmem:[%s264_s1] sm:$0xff]   ;;  %189 = vmatprep.mubr.msk.bf16.mxu0 %vm204_vm0, %v203_v0  ;;  %v196_v2 = vld [vmem:[%s264_s1 + $0x8] sm:$0xff]   ;;  %v197_v3 = vld [vmem:[%s264_s1 + $0x10] sm:$0xff]  }
   0x2   :  { %174 = vmatpush3.bf16.msra.mxu0 %v195_v1  ;;  %v198_v4 = vld [vmem:[%s264_s1 + $0x18] sm:$0xff]   ;;  %v199_v5 = vld [vmem:[%s264_s1 + $0x20] sm:$0xff]   ;;  %v200_v6 = vld [vmem:[%s264_s1 + $0x28] sm:$0xff]  }
   0x3   :  { %175 = vmatprep.subr.bf16.mxu0 %v203_v0  ;;  %v201_v7 = vld [vmem:[%s264_s1 + $0x30] sm:$0xff]   ;;  %v202_v8 = vld [vmem:[%s264_s1 + $0x38] sm:$0xff]   ;;  %v23_v9 = vld [vmem:[%s265_s0] sm:$0xff] }
   0x4   :  { %v24_v10 = vld [vmem:[%s265_s0 + $0x8] sm:$0xff]  ;;  %v163_v12 = vld [vmem:[%s266_s2] ss:$0 sm:$0xff] }
   0x5   :  { %v25_v11 = vpack.c.bf16 %v24_v10, %v23_v9 }
   0x6   :  { %176 = vmatpush3.bf16.msra.mxu0 %v196_v2 }
   0x7   :  { %177 = vmatprep.subr.bf16.mxu0 %v203_v0 }
   0xa   :  { %178 = vmatpush3.bf16.msra.mxu0 %v197_v3 }
   0xb   :  { %179 = vmatprep.subr.bf16.mxu0 %v203_v0 }
   0xe   :  { %180 = vmatpush3.bf16.msra.mxu0 %v198_v4 }
   0xf   :  { %181 = vmatprep.subr.bf16.mxu0 %v203_v0 }
  0x12   :  { %182 = vmatpush3.bf16.msra.mxu0 %v199_v5 }
  0x13   :  { %183 = vmatprep.subr.bf16.mxu0 %v203_v0 }
  0x16   :  { %184 = vmatpush3.bf16.msra.mxu0 %v200_v6 }
  0x17   :  { %185 = vmatprep.subr.bf16.mxu0 %v203_v0 }
  0x1a   :  { %186 = vmatpush3.bf16.msra.mxu0 %v201_v7 }
  0x1b   :  { %187 = vmatprep.subr.bf16.mxu0 %v203_v0 }
  0x1e   :  { %188 = vmatpush3.bf16.msra.mxu0 %v202_v8 }
  0x21   :  { %190 = vmatmul.mubr.bf16.vlgmr.msra.gmra.mrb[0].mxu0 %v25_v11 }
  0xf4   :  { %v124_v13 = vpop.f32.mrb[0].mxu0 }
  0xf5   :  { %v147_v14 = vadd.f32 %v163_v12, %v124_v13  ;;  %v191_v15 = vpop.f32.mrb[1].mxu0 }
  0xf6   :  { %v127_v16 = vpop.f32.mrb[2].mxu0 }
  0xf7   :  { %149 = vst [vmem:[%s267_s3] sm:$0xff] %v147_v14  ;;  %v148_v17 = vadd.f32 %v163_v12, %v127_v16  ;;  %v192_v18 = vpop.f32.mrb[3].mxu0 }
  0xf9   :  { %150 = vst [vmem:[%s267_s3 + $0x8] sm:$0xff] %v148_v17 }

// kernel: transformer_forward.19
= control target key start
LH: loop header
LB: loop body
LE: loop exit
PB: predicated region body
PF: predicated region fallthrough
CT: control target
= control target key end

     0   :  { %s1454_s17 = smov 0   ;;  %s1599_s0 = inlined_call_operand.vmem [shape: f32[2,8,32], index: 0, kind: input, shape index: {}, may-alias: {0,1}]   ;;  %s1600_s1 = inlined_call_operand.vmem [shape: f32[2,8,32], index: 1, kind: input, shape index: {}, may-alias: {0,1}]   ;;  %s1601_s2 = inlined_call_operand.vmem [shape: f32[2,8,8], index: 2, kind: input, shape index: {}]   ;;  %s1602_s3 = inlined_call_operand.vmem [shape: bf16[32,32], index: 3, kind: input, shape index: {}]   ;;  %s1603_s4 = inlined_call_operand.vmem [shape: f32[1,32], index: 4, kind: input, shape index: {}]   ;;  %s1604_s5 = inlined_call_operand.vmem [shape: bf16[32,64], index: 5, kind: input, shape index: {}]   ;;  %s1605_s6 = inlined_call_operand.vmem [shape: f32[1,64], index: 6, kind: input, shape index: {}]   ;;  %s1606_s7 = inlined_call_operand.vmem [shape: bf16[32,32], index: 7, kind: input, shape index: {}]   ;;  %s1607_s8 = inlined_call_operand.vmem [shape: f32[1,32], index: 8, kind: input, shape index: {}]   ;;  %s1608_s9 = inlined_call_operand.vmem [shape: f32[1,32], index: 9, kind: input, shape index: {}]   ;;  %s1609_s10 = inlined_call_operand.vmem [shape: f32[1,32], index: 10, kind: input, shape index: {}]   ;;  %s1610_s11 = inlined_call_operand.vmem [shape: f32[2,8,32], index: 11, kind: output, shape index: {}]  }
   0x1 LB: > { %s1200_s18 = sadd.s32 4294967295, %s1380_s17   ;;  %p1204_p0 = scmp.ge.s32.totalorder %s1380_s17, 1  ;;  %s1380_s17 = sphi %s1454_s17, %s21_s17  }
   0x2   : > { %p354_p1 = scmp.lt.s32.totalorder %s1380_s17, 3 }
   0x4   : > { %p355_p2 = pnand %p1204_p0, %p354_p1 }
   0x5   : > { %v1350_v0 = vld [vmem:[%s1604_s5] sm:$0xff] (!%p355_p2)   ;;  %v1382_v1 = vmov (!%p355_p2), 0.0   ;;  %v1352_v3 = vld [vmem:[%s1604_s5 + $0x8] sm:$0xff] (!%p355_p2)   ;;  %vm1383_vm0 = vmmov (!%p355_p2), 0   ;;  %p400_p3 = scmp.lt.s32.totalorder (!%p355_p2), %s1200_s18, 1  ;;  %vm443_vm1 = vcmask (!%p355_p2), 261120  }
   0x6   : > { %358 = sbr.rel (%p355_p2) target bundleno = 1775 (0x6ef), region = 64  ;;  %1266 = vmatprep.subr.bf16.mxu1 (!%p355_p2), %v1382_v1  ;;  %1258 = vmatprep.subr.bf16.mxu0 (!%p355_p2), %v1382_v1  ;;  %v1351_v2 = vld [vmem:[%s1602_s3] sm:$0xff] (!%p355_p2)   ;;  %v1353_v4 = vld [vmem:[%s1602_s3 + $0x8] sm:$0xff] (!%p355_p2)   ;;  %vm559_vm2 = vcmask (!%p355_p2), 64512   ;;  %s1384_s20 = smov (!%p355_p2), 112   ;;  %vm626_vm4 = vcmask (!%p355_p2), 1043456  }
   0x7   : > { %1267 = vmatpush3.bf16.msra.mxu1 (!%p355_p2), %v1350_v0  ;;  %1270 = vmatprep.mubr.msk.bf16.mxu1 (!%p355_p2), %vm1383_vm0, %v1382_v1  ;;  %v1213_v9 = vld [vmem:[%s1605_s6] ss:$0 sm:$0xff] (!%p355_p2)  ;;  %s1385_s21 = smov (!%p355_p2), 120   ;;  %s1386_s22 = smov (!%p355_p2), 104   ;;  %vm1020_vm5 = vcmask (!%p355_p2), 130048   ;;  %vm1022_vm6 = vcmask (!%p355_p2), 195584  }
   0x8   : > { %1268 = vmatprep.subr.bf16.mxu1 (!%p355_p2), %v1382_v1  ;;  %1259 = vmatpush3.bf16.msra.mxu0 (!%p355_p2), %v1351_v2  ;;  %v1209_v10 = vld [vmem:[%s1603_s4] ss:$0 sm:$0xff] (!%p355_p2)  ;;  %s1387_s26 = smov (!%p355_p2), 96   ;;  %s1388_s28 = smov (!%p355_p2), 80  }
   0x9   : > { %1260 = vmatprep.subr.bf16.mxu0 (!%p355_p2), %v1382_v1  ;;  %1262 = vmatprep.mubr.msk.bf16.mxu0 (!%p355_p2), %vm1383_vm0, %v1382_v1  ;;  %s1389_s29 = smov (!%p355_p2), 72   ;;  %s1393_s19 = smov (!%p355_p2), 24  }
   0xb   : > { %1269 = vmatpush3.bf16.msra.mxu1 (!%p355_p2), %v1352_v3 }
   0xc   : > { %1261 = vmatpush3.bf16.msra.mxu0 (!%p355_p2), %v1353_v4  ;;  %1280 = vmatprep.subr.bf16.mxu1 (!%p355_p2), %v1382_v1 }
   0xd   : > { %s1612_s18 = smov (!%p400_p3, %s1200_s18), 1  ;;  %1274 = vmatprep.subr.bf16.mxu0 %v1382_v1 }
   0xe   : > { %s1482_s27 = sshll.u32 %s1612_s18, 3  ;;  %s1392_s18 = smov 16  }
   0xf   : > { %s407_s30 = scalar_lea.vmem %s1600_s1, %s1482_s27  ;;  %s403_s14 = scalar_lea.vmem %s1599_s0, %s1482_s27 }
  0x10   : > { %v418_v5 = vld [vmem:[%s407_s30] sm:$0xff]  ;;  %s411_s25 = scalar_lea.vmem %s1601_s2, %s1482_s27  ;;  %s1390_s30 = smov 88  }
  0x11   : > { %v487_v6 = vpack.c.bf16 %v418_v5, %v418_v5  ;;  %v1494_v7 = vld [vmem:[%s403_s14] sm:$0xff]  ;;  %s1391_s14 = smov 8  }
  0x12   : > { %v419_v8 = vpack.c.bf16 %v1494_v7, %v1494_v7  ;;  %v554_v33 = vld [vmem:[%s411_s25] sm:$0xff] }
  0x13   : > { %1271 = vmatmul.mubr.msk.bf16.vlgmr.msra.gmra.mrb[0].mxu1 %vm443_vm1, %v487_v6  ;;  %vm555_vm3 = vcmp.eq.f32.partialorder %v554_v33, 0.0 }
  0x14   : > { %1263 = vmatmul.mubr.msk.bf16.vlgmr.msra.gmra.mrb[0].mxu0 %vm443_vm1, %v419_v8  ;;  %1282 = vmatprep.mubr.msk.bf16.mxu1 %vm1383_vm0, %v1382_v1  ;;  %v556_v35 = vsel %vm555_vm3, -1e+09, %v1382_v1 }
  0x15   : > { %1276 = vmatprep.mubr.msk.bf16.mxu0 %vm1383_vm0, %v1382_v1 }
  0xe6   : > { %v548_v11 = vpop.f32.mrb[0].mxu1 }
  0xe7   : > { %v549_v12 = vadd.f32 %v1213_v9, %v548_v11  ;;  %v1272_v13 = vpop.f32.mrb[1].mxu1  ;;  %v481_v14 = vpop.f32.mrb[0].mxu0 }
  0xe8   : > { %v551_v15 = vpop.f32.mrb[2].mxu1  ;;  %v482_v16 = vadd.f32 %v1209_v10, %v481_v14  ;;  %v1264_v17 = vpop.f32.mrb[1].mxu0 }
  0xe9   : > { %v1510_v18 = vpack.c.bf16 %v549_v12, %v549_v12  ;;  %v1273_v19 = vpop.f32.mrb[3].mxu1  ;;  %v484_v20 = vpop.f32.mrb[2].mxu0 }
  0xea   : > { %v1265_v21 = vpop.f32.mrb[3].mxu0  ;;  %v557_v22 = vpack.c.bf16 %v482_v16, %v482_v16 }
  0xeb   : > { %785 = vrot.lane.b32.xlu1 %v1510_v18, %s1384_s20  ;;  %673 = vrot.lane.b32.xlu0 %v1510_v18, %s1385_s21  ;;  %v564_v23 = vsel %vm559_vm2, %v1510_v18, 0 }
  0xec   : > { %1275 = vmatpush3.bf16.xpose.msra.mxu0 %v564_v23 }
  0xed   : > { %1286 = vmatprep.subr.bf16.mxu0 %v1382_v1 }
  0xef   : > { %783 = vrot.lane.b32.xlu1 %v557_v22, %s1384_s20  ;;  %671 = vrot.lane.b32.xlu0 %v557_v22, %s1385_s21 }
  0xf3   : > { %895 = vrot.lane.b32.xlu1 %v557_v22, %s1386_s22  ;;  %897 = vrot.lane.b32.xlu0 %v1510_v18, %s1386_s22 }
  0xf4   : > { %1277 = vmatmul.mubr.msk.bf16.vlgmr.msra.gmra.mrb[4].mxu0 %vm559_vm2, %v557_v22 }
  0xf5   : > { %1288 = vmatprep.mubr.msk.bf16.mxu0 %vm1383_vm0, %v1382_v1 }
 0x15d   : > { %v674_v24 = vpop.permute.xlu0 %673  ;;  %v786_v26 = vpop.permute.xlu1 %785 }
 0x15e   : > { %v679_v25 = vsel %vm559_vm2, %v674_v24, 0  ;;  %v791_v28 = vsel %vm559_vm2, %v786_v26, 0 }
 0x15f   : > { %1287 = vmatpush3.bf16.xpose.msra.mxu0 %v679_v25 }
 0x160   : > { %1298 = vmatprep.subr.bf16.mxu0 %v1382_v1 }
 0x161   : > { %v672_v27 = vpop.permute.xlu0 %671  ;;  %v784_v30 = vpop.permute.xlu1 %783 }
 0x165   : > { %v898_v29 = vpop.permute.xlu0 %897  ;;  %v896_v32 = vpop.permute.xlu1 %895 }
 0x166   : > { %1289 = vmatmul.mubr.msk.bf16.vlgmr.msra.gmra.mrb[8].mxu0 %vm559_vm2, %v672_v27  ;;  %v903_v31 = vsel %vm559_vm2, %v898_v29, 0 }
 0x167   : > { %1299 = vmatpush3.bf16.xpose.msra.mxu0 %v791_v28  ;;  %1300 = vmatprep.mubr.msk.bf16.mxu0 %vm1383_vm0, %v1382_v1 }
 0x168   : > { %1310 = vmatprep.subr.bf16.mxu0 %v1382_v1 }
 0x16e   : > { %1301 = vmatmul.mubr.msk.bf16.vlgmr.msra.gmra.mrb[12].mxu0 %vm559_vm2, %v784_v30 }
 0x16f   : > { %1311 = vmatpush3.bf16.xpose.msra.mxu0 %v903_v31  ;;  %1312 = vmatprep.mubr.msk.bf16.mxu0 %vm1383_vm0, %v1382_v1 }
 0x170   : > { %1322 = vmatprep.subr.bf16.mxu0 %v1382_v1 }
 0x176   : > { %1313 = vmatmul.mubr.msk.bf16.vlgmr.msra.gmra.mrb[16].mxu0 %vm559_vm2, %v896_v32 }
 0x177   : > { %1326 = vmatprep.mubr.msk.bf16.mxu0 %vm1383_vm0, %v1382_v1 }
 0x1c7   : > { %v600_v34 = vpop.f32.mrb[4].mxu0 }
 0x1c8   : > { %v606_v36 = vmul.f32 0.35355338, %v600_v34  ;;  %v1278_v37 = vpop.f32.mrb[5].mxu0 }
 0x1c9   : > { %v603_v38 = vpop.f32.mrb[6].mxu0 }
 0x1ca   : > { %v1279_v39 = vpop.f32.mrb[7].mxu0  ;;  %v607_v40 = vadd.f32 %v606_v36, %v556_v35 }
 0x1cc   : > { %v608_v41 = vsel %vm559_vm2, %v607_v40, -inf }
 0x1cd   : > { %609 = vmax.xlane.f32.xlu0 %v608_v41 }
 0x239   : > { %v715_v42 = vpop.f32.mrb[8].mxu0 }
 0x23a   : > { %v721_v43 = vmul.f32 0.35355338, %v715_v42  ;;  %v1290_v44 = vpop.f32.mrb[9].mxu0 }
 0x23b   : > { %v718_v45 = vpop.f32.mrb[10].mxu0 }
 0x23c   : > { %v1291_v46 = vpop.f32.mrb[11].mxu0  ;;  %v722_v47 = vadd.f32 %v721_v43, %v556_v35 }
 0x23e   : > { %v723_v48 = vsel %vm559_vm2, %v722_v47, -inf }
 0x23f   : > { %724 = vmax.xlane.f32.xlu1 %v723_v48 }
 0x241   : > { %v827_v49 = vpop.f32.mrb[12].mxu0 }
 0x242   : > { %v833_v50 = vmul.f32 0.35355338, %v827_v49  ;;  %v1302_v51 = vpop.f32.mrb[13].mxu0  ;;  %v1354_v49 = vld [vmem:[%s1606_s7] sm:$0xff]  }
 0x243   : > { %v830_v52 = vpop.f32.mrb[14].mxu0  ;;  %1323 = vmatpush3.bf16.msra.mxu0 %v1354_v49 }
 0x244   : > { %v1303_v53 = vpop.f32.mrb[15].mxu0  ;;  %v834_v54 = vadd.f32 %v833_v50, %v556_v35  ;;  %1324 = vmatprep.subr.bf16.mxu0 %v1382_v1 }
 0x246   : > { %v835_v55 = vsel %vm559_vm2, %v834_v54, -inf }
 0x247   : > { %836 = vmax.xlane.f32.xlu0 %v835_v55 }
 0x249   : > { %v939_v56 = vpop.f32.mrb[16].mxu0 }
 0x24a   : > { %v945_v57 = vmul.f32 0.35355338, %v939_v56  ;;  %v1314_v58 = vpop.f32.mrb[17].mxu0 }
 0x24b   : > { %v942_v59 = vpop.f32.mrb[18].mxu0 }
 0x24c   : > { %v1315_v60 = vpop.f32.mrb[19].mxu0  ;;  %v946_v61 = vadd.f32 %v945_v57, %v556_v35 }
 0x24e   : > { %v947_v62 = vsel %vm559_vm2, %v946_v61, -inf }
 0x24f   : > { %948 = vmax.xlane.f32.xlu0 %v947_v62 }
 0x25a   : > { %v610_v63 = vpop.xlane.xlu0 %609 }
 0x25b   : > { %v611_v0 = vsub.f32 %v607_v40, %v610_v63 }
 0x25d   : > { %v612_v2 = vmul.f32 1.442695, %v611_v0 }
 0x25f   : > { %1356 = vpow2.f32 %v612_v2 }
 0x269   : > { %v1357_v3 = vpop.eup %1356 }
 0x26a   : > { %v614_v4 = vsel %vm559_vm2, %v1357_v3, 0.0 }
 0x26b   : > { %615 = vadd.xlane.f32.xlu1 %v614_v4 }
 0x27c   : > { %621 = vrot.lane.b32.xlu1 %v1510_v18, %s1387_s26 }
 0x2cc   : > { %v725_v5 = vpop.xlane.xlu1 %724 }
 0x2cd   : > { %v726_v6 = vsub.f32 %v722_v47, %v725_v5 }
 0x2cf   : > { %v727_v8 = vmul.f32 1.442695, %v726_v6  ;;  %v1225_v6 = vld [vmem:[%s1607_s8] ss:$0 sm:$0xff] }
 0x2d1   : > { %1358 = vpow2.f32 %v727_v8 }
 0x2d4   : > { %v837_v9 = vpop.xlane.xlu0 %836 }
 0x2d5   : > { %v838_v10 = vsub.f32 %v834_v54, %v837_v9  ;;  %v1355_v54 = vld [vmem:[%s1606_s7 + $0x8] sm:$0xff]  }
 0x2d6   : > { %1325 = vmatpush3.bf16.msra.mxu0 %v1355_v54 }
 0x2d7   : > { %v839_v11 = vmul.f32 1.442695, %v838_v10 }
 0x2d9   : > { %1360 = vpow2.f32 %v839_v11 }
 0x2db   : > { %v1359_v12 = vpop.eup %1358 }
 0x2dc   : > { %v949_v13 = vpop.xlane.xlu0 %948  ;;  %v729_v14 = vsel %vm559_vm2, %v1359_v12, 0.0 }
 0x2dd   : > { %v950_v15 = vsub.f32 %v946_v61, %v949_v13  ;;  %730 = vadd.xlane.f32.xlu0 %v729_v14 }
 0x2df   : > { %v951_v16 = vmul.f32 1.442695, %v950_v15 }
 0x2e1   : > { %1362 = vpow2.f32 %v951_v16 }
 0x2e3   : > { %v1361_v17 = vpop.eup %1360 }
 0x2e4   : > { %v841_v19 = vsel %vm559_vm2, %v1361_v17, 0.0 }
 0x2e5   : > { %842 = vadd.xlane.f32.xlu1 %v841_v19 }
 0x2eb   : > { %v1363_v20 = vpop.eup %1362 }
 0x2ec   : > { %v953_v21 = vsel %vm559_vm2, %v1363_v20, 0.0 }
 0x2ed   : > { %954 = vadd.xlane.f32.xlu0 %v953_v21 }
 0x2f6   : > { %847 = vrot.lane.b32.xlu1 %v1510_v18, %s1388_s28 }
 0x2f8   : > { %v616_v22 = vpop.xlane.xlu1 %615 }
 0x2f9   : > { %1364 = vrcp.f32 %v616_v22 }
 0x2fa   : > { %959 = vrot.lane.b32.xlu1 %v1510_v18, %s1389_s29  ;;  %s415_s29 = scalar_lea.vmem %s1610_s11, %s1482_s27 }
 0x2fc   : > { %v622_v23 = vpop.permute.xlu1 %621 }
 0x2fd   : > { %v628_v24 = vsel %vm626_vm4, %v622_v23, 0 }
 0x2fe   : > { %1281 = vmatpush3.bf16.msra.mxu1 %v628_v24 }
 0x2ff   : > { %1292 = vmatprep.subr.bf16.mxu1 %v1382_v1 }
 0x303   : > { %v1365_v25 = vpop.eup %1364  ;;  %735 = vrot.lane.b32.xlu0 %v1510_v18, %s1390_s30 }
 0x304   : > { %v618_v26 = vmul.f32 %v1365_v25, %v1357_v3 }
 0x306   : > { %v619_v27 = vpack.c.bf16 %v618_v26, %v618_v26  ;;  %v1230_v26 = vld [vmem:[%s1609_s10] ss:$0 sm:$0xff] }
 0x308   : > { %1283 = vmatmul.mubr.msk.bf16.vlgmr.msra.gmra.mrb[4].mxu1 %vm559_vm2, %v619_v27 }
 0x309   : > { %1294 = vmatprep.mubr.msk.bf16.mxu1 %vm1383_vm0, %v1382_v1 }
 0x36a   : > { %v731_v28 = vpop.xlane.xlu0 %730 }
 0x36b   : > { %1366 = vrcp.f32 %v731_v28 }
 0x372   : > { %v843_v29 = vpop.xlane.xlu1 %842 }
 0x373   : > { %1368 = vrcp.f32 %v843_v29 }
 0x375   : > { %v1367_v30 = vpop.eup %1366 }
 0x376   : > { %v733_v32 = vmul.f32 %v1367_v30, %v1359_v12  ;;  %v848_v35 = vpop.permute.xlu1 %847 }
 0x377   : > { %v853_v37 = vsel %vm626_vm4, %v848_v35, 0 }
 0x378   : > { %v734_v18 = vpack.c.bf16 %v733_v32, %v733_v32 }
 0x37a   : > { %v955_v31 = vpop.xlane.xlu0 %954  ;;  %v960_v39 = vpop.permute.xlu1 %959 }
 0x37b   : > { %1370 = vrcp.f32 %v955_v31  ;;  %v965_v42 = vsel %vm626_vm4, %v960_v39, 0 }
 0x37d   : > { %v1369_v36 = vpop.eup %1368 }
 0x37e   : > { %v736_v33 = vpop.permute.xlu0 %735  ;;  %v845_v38 = vmul.f32 %v1369_v36, %v1361_v17 }
 0x37f   : > { %v741_v34 = vsel %vm626_vm4, %v736_v33, 0 }
 0x380   : > { %1293 = vmatpush3.bf16.msra.mxu1 %v741_v34  ;;  %v846_v40 = vpack.c.bf16 %v845_v38, %v845_v38 }
 0x381   : > { %1304 = vmatprep.subr.bf16.mxu1 %v1382_v1 }
 0x383   : > { %1295 = vmatmul.mubr.msk.bf16.vlgmr.msra.gmra.mrb[8].mxu1 %vm559_vm2, %v734_v18 }
 0x384   : > { %1305 = vmatpush3.bf16.msra.mxu1 %v853_v37  ;;  %1306 = vmatprep.mubr.msk.bf16.mxu1 %vm1383_vm0, %v1382_v1 }
 0x385   : > { %1316 = vmatprep.subr.bf16.mxu1 %v1382_v1  ;;  %v1371_v41 = vpop.eup %1370 }
 0x386   : > { %v957_v43 = vmul.f32 %v1371_v41, %v1363_v20 }
 0x388   : > { %v958_v44 = vpack.c.bf16 %v957_v43, %v957_v43 }
 0x38b   : > { %1307 = vmatmul.mubr.msk.bf16.vlgmr.msra.gmra.mrb[12].mxu1 %vm559_vm2, %v846_v40 }
 0x38c   : > { %1317 = vmatpush3.bf16.msra.mxu1 %v965_v42  ;;  %1318 = vmatprep.mubr.msk.bf16.mxu1 %vm1383_vm0, %v1382_v1 }
 0x393   : > { %1319 = vmatmul.mubr.msk.bf16.vlgmr.msra.gmra.mrb[16].mxu1 %vm559_vm2, %v958_v44 }
 0x3db   : > { %v664_v45 = vpop.f32.mrb[4].mxu1 }
 0x3dc   : > { %v1284_v46 = vpop.f32.mrb[5].mxu1 }
 0x3dd   : > { %v667_v47 = vpop.f32.mrb[6].mxu1 }
 0x3de   : > { %v1285_v48 = vpop.f32.mrb[7].mxu1 }
 0x456   : > { %v777_v50 = vpop.f32.mrb[8].mxu1 }
 0x457   : > { %1008 = vrot.lane.b32.xlu0 %v777_v50, %s1391_s14  ;;  %v1296_v51 = vpop.f32.mrb[9].mxu1 }
 0x458   : > { %v780_v52 = vpop.f32.mrb[10].mxu1 }
 0x459   : > { %v1297_v53 = vpop.f32.mrb[11].mxu1 }
 0x45e   : > { %v889_v55 = vpop.f32.mrb[12].mxu1 }
 0x45f   : > { %1012 = vrot.lane.b32.xlu1 %v889_v55, %s1392_s18  ;;  %v1308_v56 = vpop.f32.mrb[13].mxu1 }
 0x460   : > { %v892_v57 = vpop.f32.mrb[14].mxu1 }
 0x461   : > { %v1309_v58 = vpop.f32.mrb[15].mxu1 }
 0x466   : > { %v1001_v59 = vpop.f32.mrb[16].mxu1 }
 0x467   : > { %1016 = vrot.lane.b32.xlu0 %v1001_v59, %s1393_s19  ;;  %v1320_v1 = vpop.f32.mrb[17].mxu1 }
 0x468   : > { %v1004_v60 = vpop.f32.mrb[18].mxu1 }
 0x469   : > { %v1321_v61 = vpop.f32.mrb[19].mxu1 }
 0x4c9   : > { %v1009_v62 = vpop.permute.xlu0 %1008 }
 0x4ca   : > { %v1019_v0 = vsel %vm559_vm2, %v664_v45, %v1009_v62 }
 0x4d1   : > { %v1013_v63 = vpop.permute.xlu1 %1012 }
 0x4d2   : > { %v1021_v2 = vsel %vm1020_vm5, %v1019_v0, %v1013_v63 }
 0x4d9   : > { %v1017_v3 = vpop.permute.xlu0 %1016 }
 0x4da   : > { %v1023_v4 = vsel %vm1022_vm6, %v1021_v2, %v1017_v3 }
 0x4db   : > { %v1024_v5 = vpack.c.bf16 %v1023_v4, %v1023_v4 }
 0x4dd   : > { %1327 = vmatmul.mubr.msk.bf16.vlgmr.msra.gmra.mrb[20].mxu0 %vm443_vm1, %v1024_v5 }
 0x5b0   : > { %v1085_v8 = vpop.f32.mrb[20].mxu0 }
 0x5b1   : > { %v1086_v9 = vadd.f32 %v1225_v6, %v1085_v8  ;;  %v1328_v10 = vpop.f32.mrb[21].mxu0 }
 0x5b2   : > { %v1088_v11 = vpop.f32.mrb[22].mxu0 }
 0x5b3   : > { %v1329_v12 = vpop.f32.mrb[23].mxu0  ;;  %v1091_v13 = vadd.f32 %v1086_v9, %v1494_v7  ;;  %v1229_v7 = vld [vmem:[%s1608_s9] ss:$0 sm:$0xff] }
 0x5b5   : > { %v1092_v14 = vsel %vm443_vm1, %v1091_v13, 0.0 }
 0x5b6   : > { %1093 = vadd.xlane.f32.xlu1 %v1092_v14 }
 0x643   : > { %v1094_v15 = vpop.xlane.xlu1 %1093 }
 0x644   : > { %v1096_v16 = vmul.f32 0.03125, %v1094_v15 }
 0x646   : > { %v1097_v17 = vsub.f32 %v1091_v13, %v1096_v16 }
 0x648   : > { %v1098_v19 = vmul.f32 %v1097_v17, %v1097_v17 }
 0x64a   : > { %v1099_v20 = vsel %vm443_vm1, %v1098_v19, 0.0 }
 0x64b   : > { %1100 = vadd.xlane.f32.xlu0 %v1099_v20 }
 0x6d8   : > { %v1101_v21 = vpop.xlane.xlu0 %1100 }
 0x6d9   : > { %v1102_v22 = vmul.f32 0.03125, %v1101_v21 }
 0x6db   : > { %v1103_v23 = vadd.f32 1e-05, %v1102_v22 }
 0x6dd   : > { %1372 = vrsqrt.f32 %v1103_v23 }
 0x6e7   : > { %v1373_v24 = vpop.eup %1372 }
 0x6e8   : > { %v1105_v25 = vmul.f32 %v1373_v24, %v1097_v17 }
 0x6ea   : > { %v1113_v27 = vmul.f32 %v1229_v7, %v1105_v25 }
 0x6ec   : > { %v1121_v28 = vadd.f32 %v1230_v26, %v1113_v27 }
 0x6ee   : > { %1122 = vst.msk [vmem:[%s415_s29] sm:$0xff] %vm443_vm1, %v1121_v28 }
 0x6ef PF: > { %s21_s17 = sadd.s32 1, %s1380_s17  }
 0x6f0   : > { %p18_p4 = scmp.ge.s32.totalorder %s21_s17, 4  }
 0x6f2   :  { %20 = sbr.rel (!%p18_p4) target bundleno = 1 (0x1), region = 100 }

// kernel: transformer_forward.16
= control target key start
LH: loop header
LB: loop body
LE: loop exit
PB: predicated region body
PF: predicated region fallthrough
CT: control target
= control target key end

     0   :  { %s2898_s24 = smov 0   ;;  %s3530_s0 = inlined_call_operand.vmem [shape: f32[2,8,32], index: 0, kind: input, shape index: {}]   ;;  %s3531_s1 = inlined_call_operand.vmem [shape: bf16[32,2048], index: 1, kind: input, shape index: {}]   ;;  %s3532_s2 = inlined_call_operand.vmem [shape: f32[1,2048], index: 2, kind: input, shape index: {}]   ;;  %s3533_s3 = inlined_call_operand.vmem [shape: bf16[2048,32], index: 3, kind: input, shape index: {}]   ;;  %s3534_s4 = inlined_call_operand.vmem [shape: f32[1,32], index: 4, kind: input, shape index: {}]   ;;  %s3535_s5 = inlined_call_operand.vmem [shape: f32[1,32], index: 5, kind: input, shape index: {}]   ;;  %s3536_s6 = inlined_call_operand.vmem [shape: f32[1,32], index: 6, kind: input, shape index: {}]   ;;  %s3537_s7 = inlined_call_operand.vmem [shape: f32[2,8,32], index: 7, kind: output, shape index: {}]  }
   0x1 LB: > { %s2353_s25 = sadd.s32 4294967295, %s2855_s24   ;;  %p2357_p0 = scmp.ge.s32.totalorder %s2855_s24, 1  ;;  %s2855_s24 = sphi %s2898_s24, %s17_s24  }
   0x2   : > { %p236_p1 = scmp.lt.s32.totalorder %s2855_s24, 3 }
   0x4   : > { %p237_p2 = pnand %p2357_p0, %p236_p1 }
   0x5   : > { %v277_v0 = vld [vmem:[%s3531_s1] sm:$0xff] (!%p237_p2)  ;;  %v278_v2 = vld [vmem:[%s3531_s1 + $0x8] sm:$0xff] (!%p237_p2)  ;;  %p2915_p3 = scmp.lt.s32.totalorder (!%p237_p2), %s2353_s25, 1  ;;  %v2857_v8 = vmov (!%p237_p2), 0   ;;  %v279_v14 = vld [vmem:[%s3531_s1 + $0x10] sm:$0xff] (!%p237_p2)  ;;  %vm553_vm0 = vcmask (!%p237_p2), 261120  }
   0x6   : > { %240 = sbr.rel (%p237_p2) target bundleno = 870 (0x366), region = 48  ;;  %v285_v1 = vld [vmem:[%s3531_s1 + $0x40] sm:$0xff] (!%p237_p2)  ;;  %v286_v4 = vld [vmem:[%s3531_s1 + $0x48] sm:$0xff] (!%p237_p2)  ;;  %589 = vmatprep.mubr.bf16.mxu0 (!%p237_p2), %v2857_v8  ;;  %630 = vmatprep.mubr.bf16.mxu1 (!%p237_p2), %v2857_v8  ;;  %v287_v16 = vld [vmem:[%s3531_s1 + $0x50] sm:$0xff] (!%p237_p2) }
   0x7   : > { %v2361_v3 = vcombine.high (!%p237_p2), %v277_v0, %v285_v1  ;;  %v2360_v5 = vcombine.low (!%p237_p2), %v277_v0, %v285_v1  ;;  %v293_v6 = vld [vmem:[%s3531_s1 + $0x80] sm:$0xff] (!%p237_p2)  ;;  %v2363_v9 = vcombine.high (!%p237_p2), %v278_v2, %v286_v4  ;;  %v2362_v10 = vcombine.low (!%p237_p2), %v278_v2, %v286_v4  ;;  %v294_v12 = vld [vmem:[%s3531_s1 + $0x88] sm:$0xff] (!%p237_p2)  ;;  %v280_v17 = vld [vmem:[%s3531_s1 + $0x18] sm:$0xff] (!%p237_p2) }
   0x8   : > { %v301_v7 = vld [vmem:[%s3531_s1 + $0xc0] sm:$0xff] (!%p237_p2)  ;;  %v302_v13 = vld [vmem:[%s3531_s1 + $0xc8] sm:$0xff] (!%p237_p2)  ;;  %v288_v18 = vld [vmem:[%s3531_s1 + $0x58] sm:$0xff] (!%p237_p2)  ;;  %v2365_v21 = vcombine.high (!%p237_p2), %v279_v14, %v287_v16  ;;  %v2364_v29 = vcombine.low (!%p237_p2), %v279_v14, %v287_v16 }
   0x9   : > { %v2377_v11 = vcombine.high (!%p237_p2), %v293_v6, %v301_v7  ;;  %557 = vmatprep.subr.bf16.mxu0 (!%p237_p2), %v2361_v3  ;;  %v2379_v15 = vcombine.high (!%p237_p2), %v294_v12, %v302_v13  ;;  %598 = vmatprep.subr.bf16.mxu1 (!%p237_p2), %v2363_v9  ;;  %v2376_v19 = vcombine.low (!%p237_p2), %v293_v6, %v301_v7  ;;  %v295_v24 = vld [vmem:[%s3531_s1 + $0x90] sm:$0xff] (!%p237_p2)  ;;  %v296_v27 = vld [vmem:[%s3531_s1 + $0x98] sm:$0xff] (!%p237_p2)  ;;  %v281_v33 = vld [vmem:[%s3531_s1 + $0x20] sm:$0xff] (!%p237_p2) }
   0xa   : > { %558 = vmatpush1.bf16.msra.mxu0 (!%p237_p2), %v2360_v5  ;;  %599 = vmatpush1.bf16.msra.mxu1 (!%p237_p2), %v2362_v10  ;;  %v2378_v20 = vcombine.low (!%p237_p2), %v294_v12, %v302_v13  ;;  %v2367_v23 = vcombine.high (!%p237_p2), %v280_v17, %v288_v18  ;;  %v303_v25 = vld [vmem:[%s3531_s1 + $0xd0] sm:$0xff] (!%p237_p2)  ;;  %v304_v28 = vld [vmem:[%s3531_s1 + $0xd8] sm:$0xff] (!%p237_p2)  ;;  %v2366_v30 = vcombine.low (!%p237_p2), %v280_v17, %v288_v18  ;;  %v289_v34 = vld [vmem:[%s3531_s1 + $0x60] sm:$0xff] (!%p237_p2) }
   0xb   : > { %559 = vmatprep.subr.bf16.mxu0 (!%p237_p2), %v2377_v11  ;;  %600 = vmatprep.subr.bf16.mxu1 (!%p237_p2), %v2379_v15  ;;  %v2381_v31 = vcombine.high (!%p237_p2), %v295_v24, %v303_v25  ;;  %v2383_v32 = vcombine.high (!%p237_p2), %v296_v27, %v304_v28  ;;  %v282_v35 = vld [vmem:[%s3531_s1 + $0x28] sm:$0xff] (!%p237_p2)  ;;  %v2380_v37 = vcombine.low (!%p237_p2), %v295_v24, %v303_v25  ;;  %v297_v38 = vld [vmem:[%s3531_s1 + $0xa0] sm:$0xff] (!%p237_p2)  ;;  %v283_v46 = vld [vmem:[%s3531_s1 + $0x30] sm:$0xff] (!%p237_p2) }
   0xc   : > { %v290_v36 = vld [vmem:[%s3531_s1 + $0x68] sm:$0xff] (!%p237_p2)  ;;  %v2382_v39 = vcombine.low (!%p237_p2), %v296_v27, %v304_v28  ;;  %v2369_v40 = vcombine.high (!%p237_p2), %v281_v33, %v289_v34  ;;  %v305_v41 = vld [vmem:[%s3531_s1 + $0xe0] sm:$0xff] (!%p237_p2)  ;;  %v2368_v45 = vcombine.low (!%p237_p2), %v281_v33, %v289_v34  ;;  %v291_v49 = vld [vmem:[%s3531_s1 + $0x70] sm:$0xff] (!%p237_p2) }
   0xd   : > { %s3540_s25 = smov (!%p2915_p3, %s2353_s25), 1  ;;  %v2371_v42 = vcombine.high %v282_v35, %v290_v36  ;;  %v298_v43 = vld [vmem:[%s3531_s1 + $0xa8] sm:$0xff]  ;;  %v2370_v47 = vcombine.low %v282_v35, %v290_v36  ;;  %v2385_v48 = vcombine.high %v297_v38, %v305_v41  ;;  %v284_v51 = vld [vmem:[%s3531_s1 + $0x38] sm:$0xff]  ;;  %v2384_v53 = vcombine.low %v297_v38, %v305_v41  ;;  %v299_v54 = vld [vmem:[%s3531_s1 + $0xb0] sm:$0xff] }
   0xe   : > { %s2358_s30 = sshll.u32 %s3540_s25, 3  ;;  %560 = vmatpush1.bf16.msra.mxu0 %v2376_v19  ;;  %601 = vmatpush1.bf16.msra.mxu1 %v2378_v20  ;;  %v306_v44 = vld [vmem:[%s3531_s1 + $0xe8] sm:$0xff]  ;;  %v292_v52 = vld [vmem:[%s3531_s1 + $0x78] sm:$0xff]  ;;  %v2373_v56 = vcombine.high %v283_v46, %v291_v49  ;;  %v307_v57 = vld [vmem:[%s3531_s1 + $0xf0] sm:$0xff]  ;;  %v2372_v61 = vcombine.low %v283_v46, %v291_v49 }
   0xf   : > { %s2958_s10 = scalar_lea.vmem %s3530_s0, %s2358_s30  ;;  %639 = vmatprep.subr.bf16.mxu0 %v2365_v21  ;;  %680 = vmatprep.subr.bf16.mxu1 %v2367_v23  ;;  %v2387_v50 = vcombine.high %v298_v43, %v306_v44  ;;  %v2386_v55 = vcombine.low %v298_v43, %v306_v44  ;;  %v2375_v58 = vcombine.high %v284_v51, %v292_v52  ;;  %v300_v59 = vld [vmem:[%s3531_s1 + $0xb8] sm:$0xff]  ;;  %v2718_v2 = vld [vmem:[%s3533_s3 + $0x40] sm:$0xff]   ;;  %v2722_v7 = vld [vmem:[%s3533_s3 + $0x48] sm:$0xff]   ;;  %s273_s14 = scalar_lea.vmem %s3537_s7, %s2358_s30 }
  0x10   : > { %v275_v22 = vld [vmem:[%s2958_s10] sm:$0xff]  ;;  %v308_v60 = vld [vmem:[%s3531_s1 + $0xf8] sm:$0xff]  ;;  %v2374_v62 = vcombine.low %v284_v51, %v292_v52  ;;  %v2389_v63 = vcombine.high %v299_v54, %v307_v57  ;;  %v2388_v1 = vcombine.low %v299_v54, %v307_v57  ;;  %v2723_v9 = vld [vmem:[%s3533_s3 + $0xc8] sm:$0xff]  }
  0x11   : > { %v2967_v26 = vpack.c.bf16 %v275_v22, %v275_v22  ;;  %v2391_v0 = vcombine.high %v300_v59, %v308_v60  ;;  %v2390_v3 = vcombine.low %v300_v59, %v308_v60  ;;  %v2719_v4 = vld [vmem:[%s3533_s3 + $0xc0] sm:$0xff]   ;;  %v2725_v10 = vld [vmem:[%s3533_s3 + $0x88] sm:$0xff]   ;;  %v2726_v11 = vld [vmem:[%s3533_s3 + $0x50] sm:$0xff]  }
  0x12   : > { %v2720_v5 = vld [vmem:[%s3533_s3] sm:$0xff]   ;;  %v2727_v12 = vld [vmem:[%s3533_s3 + $0xd0] sm:$0xff]   ;;  %v2730_v15 = vld [vmem:[%s3533_s3 + $0x58] sm:$0xff]  }
  0x13   : > { %2392 = vmatmul.mubr.msk.bf16.vlgmr.msra.gmra.mrb[0].mxu0 %vm553_vm0, %v2967_v26  ;;  %2393 = vmatmul.mubr.msk.bf16.vlgmr.msra.gmra.mrb[0].mxu1 %vm553_vm0, %v2967_v26  ;;  %v2721_v6 = vld [vmem:[%s3533_s3 + $0x80] sm:$0xff]   ;;  %v2728_v13 = vld [vmem:[%s3533_s3 + $0x10] sm:$0xff]   ;;  %v2731_v16 = vld [vmem:[%s3533_s3 + $0xd8] sm:$0xff]  }
  0x14   : > { %640 = vmatpush1.bf16.msra.mxu0 %v2364_v29  ;;  %681 = vmatpush1.bf16.msra.mxu1 %v2366_v30  ;;  %v2729_v14 = vld [vmem:[%s3533_s3 + $0x90] sm:$0xff]   ;;  %v2732_v17 = vld [vmem:[%s3533_s3 + $0x18] sm:$0xff]   ;;  %v2734_v19 = vld [vmem:[%s3533_s3 + $0x60] sm:$0xff]  }
  0x15   : > { %641 = vmatprep.subr.bf16.mxu0 %v2381_v31  ;;  %682 = vmatprep.subr.bf16.mxu1 %v2383_v32  ;;  %v2733_v18 = vld [vmem:[%s3533_s3 + $0x98] sm:$0xff]   ;;  %v2735_v20 = vld [vmem:[%s3533_s3 + $0xe0] sm:$0xff]   ;;  %v2738_v23 = vld [vmem:[%s3533_s3 + $0x68] sm:$0xff]  }
  0x16   : > { %671 = vmatprep.mubr.bf16.mxu0 %v2857_v8  ;;  %712 = vmatprep.mubr.bf16.mxu1 %v2857_v8  ;;  %v2736_v21 = vld [vmem:[%s3533_s3 + $0x20] sm:$0xff]   ;;  %v2739_v24 = vld [vmem:[%s3533_s3 + $0xe8] sm:$0xff]   ;;  %v2742_v27 = vld [vmem:[%s3533_s3 + $0x70] sm:$0xff]  }
  0x17   : > { %v2737_v22 = vld [vmem:[%s3533_s3 + $0xa0] sm:$0xff]   ;;  %v2740_v25 = vld [vmem:[%s3533_s3 + $0x28] sm:$0xff]   ;;  %v2743_v28 = vld [vmem:[%s3533_s3 + $0xf0] sm:$0xff]  }
  0x18   : > { %642 = vmatpush1.bf16.msra.mxu0 %v2380_v37  ;;  %683 = vmatpush1.bf16.msra.mxu1 %v2382_v39  ;;  %v2744_v29 = vld [vmem:[%s3533_s3 + $0x30] sm:$0xff]   ;;  %v2746_v31 = vld [vmem:[%s3533_s3 + $0x78] sm:$0xff]   ;;  %v2750_v35 = vld [vmem:[%s3533_s3 + $0x140] sm:$0xff]   ;;  %v313_v37 = vlaneseq }
  0x19   : > { %721 = vmatprep.subr.bf16.mxu0 %v2369_v40  ;;  %762 = vmatprep.subr.bf16.mxu1 %v2371_v42  ;;  %v2745_v30 = vld [vmem:[%s3533_s3 + $0xb0] sm:$0xff]   ;;  %v2747_v32 = vld [vmem:[%s3533_s3 + $0xf8] sm:$0xff]   ;;  %v2751_v36 = vld [vmem:[%s3533_s3 + $0x1c0] sm:$0xff]  }
  0x1a   : > { %v2748_v33 = vld [vmem:[%s3533_s3 + $0x38] sm:$0xff]   ;;  %v3147_v38 = vshrl.u32 %v313_v37, 7  ;;  %v3153_v40 = vld [vmem:[%s3532_s2] sm:$0xff] }
  0x1b   : > { %2394 = vmatmul.mubr.msk.bf16.vlgmr.msra.gmra.mrb[4].mxu0 %vm553_vm0, %v2967_v26  ;;  %2395 = vmatmul.mubr.msk.bf16.vlgmr.msra.gmra.mrb[4].mxu1 %vm553_vm0, %v2967_v26  ;;  %v2749_v34 = vld [vmem:[%s3533_s3 + $0xb8] sm:$0xff]  }
  0x1c   : > { %722 = vmatpush1.bf16.msra.mxu0 %v2368_v45  ;;  %763 = vmatpush1.bf16.msra.mxu1 %v2370_v47  ;;  %v315_v39 = vsub.s32 0, %v3147_v38  ;;  %v323_v41 = vsub.s32 2, %v3147_v38  ;;  %v319_v42 = vsub.s32 1, %v3147_v38  ;;  %v327_v43 = vsub.s32 3, %v3147_v38 }
  0x1d   : > { %723 = vmatprep.subr.bf16.mxu0 %v2385_v48  ;;  %764 = vmatprep.subr.bf16.mxu1 %v2387_v50 }
  0x1e   : > { %753 = vmatprep.mubr.bf16.mxu0 %v2857_v8  ;;  %794 = vmatprep.mubr.bf16.mxu1 %v2857_v8  ;;  %v316_v44 = vrot.slane %v3153_v40, %v315_v39  ;;  %v324_v45 = vrot.slane %v3153_v40, %v323_v41  ;;  %v320_v46 = vrot.slane %v3153_v40, %v319_v42 }
  0x1f   : > { %v328_v47 = vrot.slane %v3153_v40, %v327_v43 }
  0x20   : > { %724 = vmatpush1.bf16.msra.mxu0 %v2384_v53  ;;  %765 = vmatpush1.bf16.msra.mxu1 %v2386_v55 }
  0x21   : > { %803 = vmatprep.subr.bf16.mxu0 %v2373_v56  ;;  %844 = vmatprep.subr.bf16.mxu1 %v2375_v58  ;;  %v335_v56 = vsub.s32 5, %v3147_v38 }
  0x23   : > { %2396 = vmatmul.mubr.msk.bf16.vlgmr.msra.gmra.mrb[8].mxu0 %vm553_vm0, %v2967_v26  ;;  %2397 = vmatmul.mubr.msk.bf16.vlgmr.msra.gmra.mrb[8].mxu1 %vm553_vm0, %v2967_v26 }
  0x24   : > { %804 = vmatpush1.bf16.msra.mxu0 %v2372_v61  ;;  %845 = vmatpush1.bf16.msra.mxu1 %v2374_v62  ;;  %v343_v61 = vsub.s32 7, %v3147_v38 }
  0x25   : > { %805 = vmatprep.subr.bf16.mxu0 %v2389_v63  ;;  %846 = vmatprep.subr.bf16.mxu1 %v2391_v0 }
  0x26   : > { %835 = vmatprep.mubr.bf16.mxu0 %v2857_v8  ;;  %876 = vmatprep.mubr.bf16.mxu1 %v2857_v8  ;;  %v2724_v8 = vld [vmem:[%s3533_s3 + $0x8] sm:$0xff]  }
  0x28   : > { %806 = vmatpush1.bf16.msra.mxu0 %v2388_v1  ;;  %847 = vmatpush1.bf16.msra.mxu1 %v2390_v3 }
  0x29   : > { %2533 = vmatprep.subr.bf16.mxu0 %v2718_v2  ;;  %2555 = vmatprep.subr.bf16.mxu1 %v2719_v4  ;;  %v2752_v4 = vld [vmem:[%s3533_s3 + $0x100] sm:$0xff]  }
  0x2b   : > { %2398 = vmatmul.mubr.msk.bf16.vlgmr.msra.gmra.mrb[12].mxu0 %vm553_vm0, %v2967_v26  ;;  %2399 = vmatmul.mubr.msk.bf16.vlgmr.msra.gmra.mrb[12].mxu1 %vm553_vm0, %v2967_v26  ;;  %v2741_v26 = vld [vmem:[%s3533_s3 + $0xa8] sm:$0xff]  }
  0x2c   : > { %2534 = vmatpush3.bf16.msra.mxu0 %v2720_v5  ;;  %2556 = vmatpush3.bf16.msra.mxu1 %v2721_v6  ;;  %v336_v5 = vrot.slane %v3153_v40, %v335_v56 }
  0x2d   : > { %2535 = vmatprep.subr.bf16.mxu0 %v2722_v7  ;;  %2557 = vmatprep.subr.bf16.mxu1 %v2723_v9  ;;  %v2753_v9 = vld [vmem:[%s3533_s3 + $0x180] sm:$0xff]  }
  0x30   : > { %2536 = vmatpush3.bf16.msra.mxu0 %v2724_v8  ;;  %2558 = vmatpush3.bf16.msra.mxu1 %v2725_v10  ;;  %v2754_v8 = vld [vmem:[%s3533_s3 + $0x148] sm:$0xff]   ;;  %v344_v10 = vrot.slane %v3153_v40, %v343_v61 }
  0x31   : > { %2537 = vmatprep.subr.bf16.mxu0 %v2726_v11  ;;  %2559 = vmatprep.subr.bf16.mxu1 %v2727_v12  ;;  %v2755_v11 = vld [vmem:[%s3533_s3 + $0x1c8] sm:$0xff]  }
  0x34   : > { %2538 = vmatpush3.bf16.msra.mxu0 %v2728_v13  ;;  %2560 = vmatpush3.bf16.msra.mxu1 %v2729_v14 }
  0x35   : > { %2539 = vmatprep.subr.bf16.mxu0 %v2730_v15  ;;  %2561 = vmatprep.subr.bf16.mxu1 %v2731_v16  ;;  %v2756_v15 = vld [vmem:[%s3533_s3 + $0x108] sm:$0xff]  }
  0x38   : > { %2540 = vmatpush3.bf16.msra.mxu0 %v2732_v17  ;;  %2562 = vmatpush3.bf16.msra.mxu1 %v2733_v18 }
  0x39   : > { %2541 = vmatprep.subr.bf16.mxu0 %v2734_v19  ;;  %2563 = vmatprep.subr.bf16.mxu1 %v2735_v20  ;;  %v3198_v19 = vld [vmem:[%s3532_s2 + $0x8] sm:$0xff] }
  0x3a   : > { %v2757_v20 = vld [vmem:[%s3533_s3 + $0x188] sm:$0xff]  }
  0x3c   : > { %2542 = vmatpush3.bf16.msra.mxu0 %v2736_v21  ;;  %2564 = vmatpush3.bf16.msra.mxu1 %v2737_v22  ;;  %v2758_v21 = vld [vmem:[%s3533_s3 + $0x150] sm:$0xff]  }
  0x3d   : > { %2543 = vmatprep.subr.bf16.mxu0 %v2738_v23  ;;  %2565 = vmatprep.subr.bf16.mxu1 %v2739_v24 }
  0x40   : > { %2544 = vmatpush3.bf16.msra.mxu0 %v2740_v25  ;;  %2566 = vmatpush3.bf16.msra.mxu1 %v2741_v26  ;;  %v2759_v25 = vld [vmem:[%s3533_s3 + $0x1d0] sm:$0xff]  }
  0x41   : > { %2545 = vmatprep.subr.bf16.mxu0 %v2742_v27  ;;  %2567 = vmatprep.subr.bf16.mxu1 %v2743_v28 }
  0x44   : > { %2546 = vmatpush3.bf16.msra.mxu0 %v2744_v29  ;;  %2568 = vmatpush3.bf16.msra.mxu1 %v2745_v30  ;;  %v348_v29 = vrot.slane %v3198_v19, %v315_v39  ;;  %v2760_v30 = vld [vmem:[%s3533_s3 + $0x110] sm:$0xff]  }
  0x45   : > { %2547 = vmatprep.subr.bf16.mxu0 %v2746_v31  ;;  %2569 = vmatprep.subr.bf16.mxu1 %v2747_v32  ;;  %v356_v32 = vrot.slane %v3198_v19, %v323_v41 }
  0x48   : > { %2548 = vmatpush3.bf16.msra.mxu0 %v2748_v33  ;;  %2570 = vmatpush3.bf16.msra.mxu1 %v2749_v34  ;;  %v2761_v33 = vld [vmem:[%s3533_s3 + $0x190] sm:$0xff]   ;;  %v2762_v34 = vld [vmem:[%s3533_s3 + $0x158] sm:$0xff]  }
  0x49   : > { %2577 = vmatprep.subr.bf16.mxu0 %v2750_v35  ;;  %2599 = vmatprep.subr.bf16.mxu1 %v2751_v36  ;;  %v2763_v36 = vld [vmem:[%s3533_s3 + $0x1d8] sm:$0xff]  }
  0xe6   : > { %v591_v48 = vpop.f32.mrb[0].mxu0  ;;  %v632_v50 = vpop.f32.mrb[0].mxu1 }
  0xe7   : > { %v592_v49 = vadd.f32 %v591_v48, %v316_v44  ;;  %v593_v51 = vpop.f32.mrb[1].mxu0  ;;  %v633_v52 = vadd.f32 %v632_v50, %v324_v45  ;;  %v634_v54 = vpop.f32.mrb[1].mxu1  ;;  %v2764_v45 = vld [vmem:[%s3533_s3 + $0x118] sm:$0xff]   ;;  %v2766_v50 = vld [vmem:[%s3533_s3 + $0x160] sm:$0xff]  }
  0xe8   : > { %v594_v53 = vadd.f32 %v593_v51, %v320_v46  ;;  %v595_v55 = vpop.f32.mrb[2].mxu0  ;;  %v635_v58 = vadd.f32 %v634_v54, %v328_v47  ;;  %v636_v59 = vpop.f32.mrb[2].mxu1  ;;  %v331_v51 = vsub.s32 4, %v3147_v38  ;;  %v2767_v54 = vld [vmem:[%s3533_s3 + $0x1e0] sm:$0xff]  }
  0xe9   : > { %v885_v57 = vmax.f32 %v592_v49, 0.0  ;;  %v596_v60 = vpop.f32.mrb[3].mxu0  ;;  %v887_v62 = vmax.f32 %v633_v52, 0.0  ;;  %v637_v0 = vpop.f32.mrb[3].mxu1  ;;  %v2765_v49 = vld [vmem:[%s3533_s3 + $0x198] sm:$0xff]   ;;  %v339_v55 = vsub.s32 6, %v3147_v38 }
  0xea   : > { %v886_v63 = vmax.f32 %v594_v53, 0.0  ;;  %v888_v1 = vmax.f32 %v635_v58, 0.0  ;;  %v364_v58 = vrot.slane %v3198_v19, %v331_v51  ;;  %v2768_v59 = vld [vmem:[%s3533_s3 + $0x120] sm:$0xff]   ;;  %v2771_v0 = vld [vmem:[%s3533_s3 + $0x1e8] sm:$0xff]   ;;  %v2811_v38 = vld [vmem:[%s3533_s3 + $0x2f8] sm:$0xff]  }
  0xeb   : > { %v903_v2 = vpack.c.bf16 %v887_v62, %v887_v62  ;;  %v901_v6 = vpack.c.bf16 %v885_v57, %v885_v57  ;;  %v372_v60 = vrot.slane %v3198_v19, %v339_v55  ;;  %v2769_v62 = vld [vmem:[%s3533_s3 + $0x1a0] sm:$0xff]  }
  0xec   : > { %v902_v3 = vpack.c.bf16 %v886_v63, %v886_v63  ;;  %v904_v7 = vpack.c.bf16 %v888_v1, %v888_v1  ;;  %v2770_v63 = vld [vmem:[%s3533_s3 + $0x168] sm:$0xff]  }
  0xee   : > { %1980 = vmatprep.mubr.bf16.mxu0 %v902_v3  ;;  %v3188_v12 = vpop.f32.mrb[4].mxu0  ;;  %2020 = vmatprep.mubr.bf16.mxu1 %v904_v7  ;;  %v3190_v14 = vpop.f32.mrb[4].mxu1  ;;  %v340_v7 = vrot.slane %v3153_v40, %v339_v55  ;;  %v2796_v55 = vld [vmem:[%s3533_s3 + $0x218] sm:$0xff]  }
  0xef   : > { %1981 = vmatmul.mubr.bf16.vlgmr.msra.gmra.mrb[16].mxu0 %v901_v6  ;;  %v675_v13 = vpop.f32.mrb[5].mxu0  ;;  %2021 = vmatmul.mubr.bf16.vlgmr.msra.gmra.mrb[16].mxu1 %v903_v2  ;;  %v716_v18 = vpop.f32.mrb[5].mxu1  ;;  %v332_v2 = vrot.slane %v3153_v40, %v331_v51  ;;  %v2772_v6 = vld [vmem:[%s3533_s3 + $0x128] sm:$0xff]   ;;  %v2775_v40 = vld [vmem:[%s3533_s3 + $0x1f0] sm:$0xff]  }
  0xf0   : > { %2578 = vmatpush3.bf16.msra.mxu0 %v2752_v4  ;;  %v676_v16 = vadd.f32 %v675_v13, %v336_v5  ;;  %v677_v17 = vpop.f32.mrb[6].mxu0  ;;  %2600 = vmatpush3.bf16.msra.mxu1 %v2753_v9  ;;  %v717_v23 = vadd.f32 %v716_v18, %v344_v10  ;;  %v718_v24 = vpop.f32.mrb[6].mxu1  ;;  %v2774_v13 = vld [vmem:[%s3533_s3 + $0x170] sm:$0xff]  }
  0xf1   : > { %2579 = vmatprep.subr.bf16.mxu0 %v2754_v8  ;;  %v678_v22 = vpop.f32.mrb[7].mxu0  ;;  %2601 = vmatprep.subr.bf16.mxu1 %v2755_v11  ;;  %v719_v27 = vpop.f32.mrb[7].mxu1  ;;  %v2773_v11 = vld [vmem:[%s3533_s3 + $0x1a8] sm:$0xff]   ;;  %v352_v17 = vrot.slane %v3198_v19, %v319_v42  ;;  %v2777_v42 = vld [vmem:[%s3533_s3 + $0x1b0] sm:$0xff]  }
  0xf2   : > { %v890_v26 = vmax.f32 %v676_v16, 0.0  ;;  %v892_v28 = vmax.f32 %v717_v23, 0.0  ;;  %v715_v22 = vadd.f32 %v3190_v14, %v340_v7  ;;  %v2776_v23 = vld [vmem:[%s3533_s3 + $0x130] sm:$0xff]   ;;  %v2780_v27 = vld [vmem:[%s3533_s3 + $0x138] sm:$0xff]   ;;  %v368_v7 = vrot.slane %v3198_v19, %v335_v56 }
  0xf3   : > { %v2792_v51 = vld [vmem:[%s3533_s3 + $0x210] sm:$0xff]  }
  0xf4   : > { %2580 = vmatpush3.bf16.msra.mxu0 %v2756_v15  ;;  %v906_v31 = vpack.c.bf16 %v890_v26, %v890_v26  ;;  %2602 = vmatpush3.bf16.msra.mxu1 %v2757_v20  ;;  %v908_v35 = vpack.c.bf16 %v892_v28, %v892_v28  ;;  %v674_v20 = vadd.f32 %v3188_v12, %v332_v2  ;;  %v2778_v12 = vld [vmem:[%s3533_s3 + $0x178] sm:$0xff]   ;;  %v891_v26 = vmax.f32 %v715_v22, 0.0  ;;  %v2805_v2 = vld [vmem:[%s3533_s3 + $0x2a8] sm:$0xff]   ;;  %v2817_v22 = vld [vmem:[%s3533_s3 + $0x380] sm:$0xff]  }
  0xf5   : > { %2581 = vmatprep.subr.bf16.mxu0 %v2758_v21  ;;  %2603 = vmatprep.subr.bf16.mxu1 %v2759_v25  ;;  %v360_v21 = vrot.slane %v3198_v19, %v327_v43  ;;  %v2779_v43 = vld [vmem:[%s3533_s3 + $0x1f8] sm:$0xff]  }
  0xf6   : > { %2060 = vmatprep.mubr.bf16.mxu0 %v906_v31  ;;  %v755_v37 = vpop.f32.mrb[8].mxu0  ;;  %2100 = vmatprep.mubr.bf16.mxu1 %v908_v35  ;;  %v796_v44 = vpop.f32.mrb[8].mxu1  ;;  %v889_v24 = vmax.f32 %v674_v20, 0.0  ;;  %v2781_v28 = vld [vmem:[%s3533_s3 + $0x1b8] sm:$0xff]   ;;  %v2784_v35 = vld [vmem:[%s3533_s3 + $0x200] sm:$0xff]  }
  0xf7   : > { %v3225_v39 = vadd.f32 %v755_v37, %v348_v29  ;;  %v757_v41 = vpop.f32.mrb[9].mxu0  ;;  %v3230_v47 = vadd.f32 %v796_v44, %v356_v32  ;;  %v798_v48 = vpop.f32.mrb[9].mxu1  ;;  %v2782_v29 = vld [vmem:[%s3533_s3 + $0x240] sm:$0xff]   ;;  %v2786_v37 = vld [vmem:[%s3533_s3 + $0x248] sm:$0xff]  }
  0xf8   : > { %2582 = vmatpush3.bf16.msra.mxu0 %v2760_v30  ;;  %v759_v46 = vpop.f32.mrb[10].mxu0  ;;  %2604 = vmatpush3.bf16.msra.mxu1 %v2761_v33  ;;  %v800_v53 = vpop.f32.mrb[10].mxu1  ;;  %v758_v14 = vadd.f32 %v757_v41, %v352_v17  ;;  %v799_v25 = vadd.f32 %v798_v48, %v360_v21  ;;  %v2783_v30 = vld [vmem:[%s3533_s3 + $0x2c0] sm:$0xff]   ;;  %v905_v32 = vpack.c.bf16 %v889_v24, %v889_v24  ;;  %v2787_v41 = vld [vmem:[%s3533_s3 + $0x2c8] sm:$0xff]   ;;  %v2813_v17 = vld [vmem:[%s3533_s3 + $0x2b8] sm:$0xff]  }
  0xf9   : > { %2583 = vmatprep.subr.bf16.mxu0 %v2762_v34  ;;  %v760_v52 = vpop.f32.mrb[11].mxu0  ;;  %2605 = vmatprep.subr.bf16.mxu1 %v2763_v36  ;;  %v801_v57 = vpop.f32.mrb[11].mxu1  ;;  %v907_v34 = vpack.c.bf16 %v891_v26, %v891_v26  ;;  %v2785_v36 = vld [vmem:[%s3533_s3 + $0x280] sm:$0xff]   ;;  %v2788_v46 = vld [vmem:[%s3533_s3 + $0x208] sm:$0xff]   ;;  %v2794_v53 = vld [vmem:[%s3533_s3 + $0x258] sm:$0xff]  }
  0xfa   : > { %v894_v31 = vmax.f32 %v758_v14, 0.0  ;;  %v896_v33 = vmax.f32 %v799_v25, 0.0  ;;  %v2789_v48 = vld [vmem:[%s3533_s3 + $0x288] sm:$0xff]   ;;  %v2793_v52 = vld [vmem:[%s3533_s3 + $0x290] sm:$0xff]   ;;  %v2797_v57 = vld [vmem:[%s3533_s3 + $0x298] sm:$0xff]  }
  0xfb   : > { %v2816_v21 = vld [vmem:[%s3533_s3 + $0x300] sm:$0xff]   ;;  %v2820_v14 = vld [vmem:[%s3533_s3 + $0x308] sm:$0xff]   ;;  %v2822_v25 = vld [vmem:[%s3533_s3 + $0x350] sm:$0xff]  }
  0xfc   : > { %2584 = vmatpush3.bf16.msra.mxu0 %v2764_v45  ;;  %2606 = vmatpush3.bf16.msra.mxu1 %v2765_v49  ;;  %v910_v44 = vpack.c.bf16 %v894_v31, %v894_v31  ;;  %v912_v45 = vpack.c.bf16 %v896_v33, %v896_v33  ;;  %v2790_v49 = vld [vmem:[%s3533_s3 + $0x250] sm:$0xff]   ;;  %v2821_v24 = vld [vmem:[%s3533_s3 + $0x388] sm:$0xff]   ;;  %v2828_v31 = vld [vmem:[%s3533_s3 + $0x318] sm:$0xff]  }
  0xfd   : > { %2585 = vmatprep.subr.bf16.mxu0 %v2766_v50  ;;  %2607 = vmatprep.subr.bf16.mxu1 %v2767_v54  ;;  %v2791_v50 = vld [vmem:[%s3533_s3 + $0x2d0] sm:$0xff]   ;;  %v2795_v54 = vld [vmem:[%s3533_s3 + $0x2d8] sm:$0xff]   ;;  %v2830_v33 = vld [vmem:[%s3533_s3 + $0x360] sm:$0xff]  }
  0xfe   : > { %v837_v1 = vpop.f32.mrb[12].mxu0  ;;  %v878_v5 = vpop.f32.mrb[12].mxu1  ;;  %v2823_v26 = vld [vmem:[%s3533_s3 + $0x3d0] sm:$0xff]  }
  0xff   : > { %v3258_v3 = vadd.f32 %v837_v1, %v364_v58  ;;  %v3260_v4 = vpop.f32.mrb[13].mxu0  ;;  %v3266_v8 = vadd.f32 %v878_v5, %v372_v60  ;;  %v3268_v10 = vpop.f32.mrb[13].mxu1  ;;  %v2798_v58 = vld [vmem:[%s3533_s3 + $0x260] sm:$0xff]   ;;  %v2804_v1 = vld [vmem:[%s3533_s3 + $0x228] sm:$0xff]   ;;  %v2806_v5 = vld [vmem:[%s3533_s3 + $0x270] sm:$0xff]  }
 0x100   : > { %2586 = vmatpush3.bf16.msra.mxu0 %v2768_v59  ;;  %v841_v9 = vpop.f32.mrb[14].mxu0  ;;  %2608 = vmatpush3.bf16.msra.mxu1 %v2769_v62  ;;  %v882_v16 = vpop.f32.mrb[14].mxu1  ;;  %v2799_v59 = vld [vmem:[%s3533_s3 + $0x2e0] sm:$0xff]   ;;  %v840_v56 = vadd.f32 %v3260_v4, %v368_v7 }
 0x101   : > { %2587 = vmatprep.subr.bf16.mxu0 %v2770_v63  ;;  %v842_v15 = vpop.f32.mrb[15].mxu0  ;;  %2609 = vmatprep.subr.bf16.mxu1 %v2771_v0  ;;  %v883_v18 = vpop.f32.mrb[15].mxu1  ;;  %v2800_v60 = vld [vmem:[%s3533_s3 + $0x220] sm:$0xff]   ;;  %v2802_v63 = vld [vmem:[%s3533_s3 + $0x268] sm:$0xff]   ;;  %v376_v9 = vrot.slane %v3198_v19, %v343_v61  ;;  %v893_v61 = vmax.f32 %v3225_v39, 0.0  ;;  %v895_v16 = vmax.f32 %v3230_v47, 0.0 }
 0x102   : > { %v2801_v62 = vld [vmem:[%s3533_s3 + $0x2a0] sm:$0xff]   ;;  %v2803_v0 = vld [vmem:[%s3533_s3 + $0x2e8] sm:$0xff]   ;;  %v2810_v15 = vld [vmem:[%s3533_s3 + $0x278] sm:$0xff]   ;;  %v898_v47 = vmax.f32 %v840_v56, 0.0 }
 0x103   : > { %v881_v19 = vadd.f32 %v3268_v10, %v376_v9  ;;  %v2814_v4 = vld [vmem:[%s3533_s3 + $0x340] sm:$0xff]   ;;  %v909_v10 = vpack.c.bf16 %v893_v61, %v893_v61  ;;  %v911_v20 = vpack.c.bf16 %v895_v16, %v895_v16 }
 0x104   : > { %2588 = vmatpush3.bf16.msra.mxu0 %v2772_v6  ;;  %2610 = vmatpush3.bf16.msra.mxu1 %v2773_v11  ;;  %v2807_v6 = vld [vmem:[%s3533_s3 + $0x2f0] sm:$0xff]   ;;  %v2815_v39 = vld [vmem:[%s3533_s3 + $0x3c0] sm:$0xff]  }
 0x105   : > { %2589 = vmatprep.subr.bf16.mxu0 %v2774_v13  ;;  %2611 = vmatprep.subr.bf16.mxu1 %v2775_v40  ;;  %v2808_v11 = vld [vmem:[%s3533_s3 + $0x230] sm:$0xff]   ;;  %v2812_v40 = vld [vmem:[%s3533_s3 + $0x238] sm:$0xff]   ;;  %v900_v18 = vmax.f32 %v881_v19, 0.0 }
 0x106   : > { %v2809_v13 = vld [vmem:[%s3533_s3 + $0x2b0] sm:$0xff]  }
 0x108   : > { %2590 = vmatpush3.bf16.msra.mxu0 %v2776_v23  ;;  %2612 = vmatpush3.bf16.msra.mxu1 %v2777_v42  ;;  %v2818_v23 = vld [vmem:[%s3533_s3 + $0x348] sm:$0xff]  }
 0x109   : > { %2591 = vmatprep.subr.bf16.mxu0 %v2778_v12  ;;  %2613 = vmatprep.subr.bf16.mxu1 %v2779_v43  ;;  %v2819_v42 = vld [vmem:[%s3533_s3 + $0x3c8] sm:$0xff]   ;;  %v914_v12 = vpack.c.bf16 %v898_v47, %v898_v47  ;;  %v916_v43 = vpack.c.bf16 %v900_v18, %v900_v18 }
 0x10c   : > { %2592 = vmatpush3.bf16.msra.mxu0 %v2780_v27  ;;  %2614 = vmatpush3.bf16.msra.mxu1 %v2781_v28  ;;  %v2824_v27 = vld [vmem:[%s3533_s3 + $0x310] sm:$0xff]  }
 0x10d   : > { %2621 = vmatprep.subr.bf16.mxu0 %v2782_v29  ;;  %2643 = vmatprep.subr.bf16.mxu1 %v2783_v30  ;;  %v2825_v28 = vld [vmem:[%s3533_s3 + $0x390] sm:$0xff]   ;;  %v2826_v29 = vld [vmem:[%s3533_s3 + $0x358] sm:$0xff]  }
 0x10e   : > { %v2827_v30 = vld [vmem:[%s3533_s3 + $0x3d8] sm:$0xff]  }
 0x10f   : > { %2061 = vmatmul.mubr.bf16.vlgmr.msra.gmra.mrb[20].mxu0 %v905_v32  ;;  %2101 = vmatmul.mubr.bf16.vlgmr.msra.gmra.mrb[20].mxu1 %v907_v34  ;;  %v2829_v32 = vld [vmem:[%s3533_s3 + $0x398] sm:$0xff]   ;;  %v2831_v34 = vld [vmem:[%s3533_s3 + $0x3e0] sm:$0xff]  }
 0x110   : > { %2622 = vmatpush3.bf16.msra.mxu0 %v2784_v35  ;;  %2644 = vmatpush3.bf16.msra.mxu1 %v2785_v36  ;;  %v2832_v35 = vld [vmem:[%s3533_s3 + $0x320] sm:$0xff]  }
 0x111   : > { %2623 = vmatprep.subr.bf16.mxu0 %v2786_v37  ;;  %2645 = vmatprep.subr.bf16.mxu1 %v2787_v41  ;;  %v2833_v36 = vld [vmem:[%s3533_s3 + $0x3a0] sm:$0xff]   ;;  %v2834_v37 = vld [vmem:[%s3533_s3 + $0x368] sm:$0xff]  }
 0x112   : > { %2140 = vmatprep.mubr.bf16.mxu0 %v910_v44  ;;  %2180 = vmatprep.mubr.bf16.mxu1 %v912_v45  ;;  %v2835_v41 = vld [vmem:[%s3533_s3 + $0x3e8] sm:$0xff]  }
 0x113   : > { %v2836_v44 = vld [vmem:[%s3533_s3 + $0x328] sm:$0xff]  }
 0x114   : > { %2624 = vmatpush3.bf16.msra.mxu0 %v2788_v46  ;;  %2646 = vmatpush3.bf16.msra.mxu1 %v2789_v48  ;;  %v2837_v45 = vld [vmem:[%s3533_s3 + $0x3a8] sm:$0xff]   ;;  %v2838_v46 = vld [vmem:[%s3533_s3 + $0x370] sm:$0xff]  }
 0x115   : > { %2625 = vmatprep.subr.bf16.mxu0 %v2790_v49  ;;  %2647 = vmatprep.subr.bf16.mxu1 %v2791_v50  ;;  %v2839_v48 = vld [vmem:[%s3533_s3 + $0x3f0] sm:$0xff]  }
 0x116   : > { %v2840_v49 = vld [vmem:[%s3533_s3 + $0x330] sm:$0xff]  }
 0x117   : > { %v2841_v50 = vld [vmem:[%s3533_s3 + $0x3b0] sm:$0xff]  }
 0x118   : > { %2626 = vmatpush3.bf16.msra.mxu0 %v2792_v51  ;;  %2648 = vmatpush3.bf16.msra.mxu1 %v2793_v52  ;;  %v2842_v51 = vld [vmem:[%s3533_s3 + $0x378] sm:$0xff]  }
 0x119   : > { %2627 = vmatprep.subr.bf16.mxu0 %v2794_v53  ;;  %2649 = vmatprep.subr.bf16.mxu1 %v2795_v54  ;;  %v2843_v52 = vld [vmem:[%s3533_s3 + $0x3f8] sm:$0xff]   ;;  %v899_v53 = vmax.f32 %v3266_v8, 0.0 }
 0x11a   : > { %v2844_v54 = vld [vmem:[%s3533_s3 + $0x338] sm:$0xff]  }
 0x11c   : > { %2628 = vmatpush3.bf16.msra.mxu0 %v2796_v55  ;;  %2650 = vmatpush3.bf16.msra.mxu1 %v2797_v57  ;;  %v897_v55 = vmax.f32 %v3258_v3, 0.0  ;;  %v2845_v57 = vld [vmem:[%s3533_s3 + $0x3b8] sm:$0xff]  }
 0x11d   : > { %2629 = vmatprep.subr.bf16.mxu0 %v2798_v58  ;;  %2651 = vmatprep.subr.bf16.mxu1 %v2799_v59  ;;  %v915_v58 = vpack.c.bf16 %v899_v53, %v899_v53 }
 0x11e   : > { %v913_v59 = vpack.c.bf16 %v897_v55, %v897_v55 }
 0x120   : > { %2630 = vmatpush3.bf16.msra.mxu0 %v2800_v60  ;;  %2652 = vmatpush3.bf16.msra.mxu1 %v2801_v62  ;;  %v2400_v62 = vld [vmem:[%s3534_s4] ss:$0 sm:$0xff] }
 0x121   : > { %2631 = vmatprep.subr.bf16.mxu0 %v2802_v63  ;;  %2653 = vmatprep.subr.bf16.mxu1 %v2803_v0 }
 0x124   : > { %2632 = vmatpush3.bf16.msra.mxu0 %v2804_v1  ;;  %2654 = vmatpush3.bf16.msra.mxu1 %v2805_v2 }
 0x125   : > { %2633 = vmatprep.subr.bf16.mxu0 %v2806_v5  ;;  %2655 = vmatprep.subr.bf16.mxu1 %v2807_v6 }
 0x128   : > { %2634 = vmatpush3.bf16.msra.mxu0 %v2808_v11  ;;  %2656 = vmatpush3.bf16.msra.mxu1 %v2809_v13 }
 0x129   : > { %2635 = vmatprep.subr.bf16.mxu0 %v2810_v15  ;;  %2657 = vmatprep.subr.bf16.mxu1 %v2811_v38 }
 0x12c   : > { %2636 = vmatpush3.bf16.msra.mxu0 %v2812_v40  ;;  %2658 = vmatpush3.bf16.msra.mxu1 %v2813_v17 }
 0x12d   : > { %2665 = vmatprep.subr.bf16.mxu0 %v2814_v4  ;;  %2687 = vmatprep.subr.bf16.mxu1 %v2815_v39 }
 0x12f   : > { %2141 = vmatmul.mubr.bf16.vlgmr.msra.gmra.mrb[24].mxu0 %v909_v10  ;;  %2181 = vmatmul.mubr.bf16.vlgmr.msra.gmra.mrb[24].mxu1 %v911_v20 }
 0x130   : > { %2666 = vmatpush3.bf16.msra.mxu0 %v2816_v21  ;;  %2688 = vmatpush3.bf16.msra.mxu1 %v2817_v22 }
 0x131   : > { %2667 = vmatprep.subr.bf16.mxu0 %v2818_v23  ;;  %2689 = vmatprep.subr.bf16.mxu1 %v2819_v42 }
 0x132   : > { %2220 = vmatprep.mubr.bf16.mxu0 %v914_v12  ;;  %2260 = vmatprep.mubr.bf16.mxu1 %v916_v43 }
 0x134   : > { %2668 = vmatpush3.bf16.msra.mxu0 %v2820_v14  ;;  %2690 = vmatpush3.bf16.msra.mxu1 %v2821_v24 }
 0x135   : > { %2669 = vmatprep.subr.bf16.mxu0 %v2822_v25  ;;  %2691 = vmatprep.subr.bf16.mxu1 %v2823_v26 }
 0x138   : > { %2670 = vmatpush3.bf16.msra.mxu0 %v2824_v27  ;;  %2692 = vmatpush3.bf16.msra.mxu1 %v2825_v28 }
 0x139   : > { %2671 = vmatprep.subr.bf16.mxu0 %v2826_v29  ;;  %2693 = vmatprep.subr.bf16.mxu1 %v2827_v30 }
 0x13c   : > { %2672 = vmatpush3.bf16.msra.mxu0 %v2828_v31  ;;  %2694 = vmatpush3.bf16.msra.mxu1 %v2829_v32 }
 0x13d   : > { %2673 = vmatprep.subr.bf16.mxu0 %v2830_v33  ;;  %2695 = vmatprep.subr.bf16.mxu1 %v2831_v34 }
 0x140   : > { %2674 = vmatpush3.bf16.msra.mxu0 %v2832_v35  ;;  %2696 = vmatpush3.bf16.msra.mxu1 %v2833_v36 }
 0x141   : > { %2675 = vmatprep.subr.bf16.mxu0 %v2834_v37  ;;  %2697 = vmatprep.subr.bf16.mxu1 %v2835_v41  ;;  %v2848_v41 = vld [vmem:[%s2958_s10] sm:$0xff] }
 0x144   : > { %2676 = vmatpush3.bf16.msra.mxu0 %v2836_v44  ;;  %2698 = vmatpush3.bf16.msra.mxu1 %v2837_v45 }
 0x145   : > { %2677 = vmatprep.subr.bf16.mxu0 %v2838_v46  ;;  %2699 = vmatprep.subr.bf16.mxu1 %v2839_v48 }
 0x148   : > { %2678 = vmatpush3.bf16.msra.mxu0 %v2840_v49  ;;  %2700 = vmatpush3.bf16.msra.mxu1 %v2841_v50 }
 0x149   : > { %2679 = vmatprep.subr.bf16.mxu0 %v2842_v51  ;;  %2701 = vmatprep.subr.bf16.mxu1 %v2843_v52 }
 0x14c   : > { %2680 = vmatpush3.bf16.msra.mxu0 %v2844_v54  ;;  %2702 = vmatpush3.bf16.msra.mxu1 %v2845_v57  ;;  %v2529_v57 = vld [vmem:[%s3535_s5] ss:$0 sm:$0xff] }
 0x14f   : > { %2221 = vmatmul.mubr.bf16.vlgmr.msra.gmra.mrb[28].mxu0 %v913_v59  ;;  %2261 = vmatmul.mubr.bf16.vlgmr.msra.gmra.mrb[28].mxu1 %v915_v58  ;;  %v2530_v59 = vld [vmem:[%s3536_s6] ss:$0 sm:$0xff] }
 0x1c2   : > { %v2549_v8 = vpop.f32.mrb[16].mxu0  ;;  %v2571_v60 = vpop.f32.mrb[16].mxu1 }
 0x1c3   : > { %v2550_v3 = vpop.f32.mrb[17].mxu0  ;;  %v2572_v0 = vpop.f32.mrb[17].mxu1 }
 0x1c4   : > { %v2551_v63 = vadd.f32 %v2550_v3, %v2549_v8  ;;  %v2552_v1 = vpop.f32.mrb[18].mxu0  ;;  %v2573_v2 = vadd.f32 %v2572_v0, %v2571_v60  ;;  %v2574_v5 = vpop.f32.mrb[18].mxu1 }
 0x1c5   : > { %v2553_v6 = vpop.f32.mrb[19].mxu0  ;;  %v2575_v9 = vpop.f32.mrb[19].mxu1 }
 0x1c6   : > { %v1983_v7 = vadd.f32 %v2551_v63, %v2400_v62 }
 0x1c8   : > { %v2023_v11 = vadd.f32 %v2573_v2, %v1983_v7 }
 0x1e2   : > { %v2593_v13 = vpop.f32.mrb[20].mxu0  ;;  %v2615_v15 = vpop.f32.mrb[20].mxu1 }
 0x1e3   : > { %v2594_v38 = vpop.f32.mrb[21].mxu0  ;;  %v2616_v61 = vpop.f32.mrb[21].mxu1 }
 0x1e4   : > { %v2595_v56 = vadd.f32 %v2594_v38, %v2593_v13  ;;  %v2596_v19 = vpop.f32.mrb[22].mxu0  ;;  %v2617_v16 = vadd.f32 %v2616_v61, %v2615_v15  ;;  %v2618_v40 = vpop.f32.mrb[22].mxu1 }
 0x1e5   : > { %v2597_v17 = vpop.f32.mrb[23].mxu0  ;;  %v2619_v39 = vpop.f32.mrb[23].mxu1 }
 0x1e6   : > { %v2063_v4 = vadd.f32 %v2595_v56, %v2023_v11 }
 0x1e8   : > { %v2103_v47 = vadd.f32 %v2617_v16, %v2063_v4 }
 0x202   : > { %v2637_v10 = vpop.f32.mrb[24].mxu0  ;;  %v2659_v18 = vpop.f32.mrb[24].mxu1 }
 0x203   : > { %v2638_v20 = vpop.f32.mrb[25].mxu0  ;;  %v2660_v22 = vpop.f32.mrb[25].mxu1 }
 0x204   : > { %v2639_v21 = vadd.f32 %v2638_v20, %v2637_v10  ;;  %v2640_v23 = vpop.f32.mrb[26].mxu0  ;;  %v2661_v42 = vadd.f32 %v2660_v22, %v2659_v18  ;;  %v2662_v12 = vpop.f32.mrb[26].mxu1 }
 0x205   : > { %v2641_v43 = vpop.f32.mrb[27].mxu0  ;;  %v2663_v24 = vpop.f32.mrb[27].mxu1 }
 0x206   : > { %v2143_v14 = vadd.f32 %v2639_v21, %v2103_v47 }
 0x208   : > { %v2183_v25 = vadd.f32 %v2661_v42, %v2143_v14 }
 0x222   : > { %v2681_v26 = vpop.f32.mrb[28].mxu0  ;;  %v2703_v27 = vpop.f32.mrb[28].mxu1 }
 0x223   : > { %v2682_v28 = vpop.f32.mrb[29].mxu0  ;;  %v2704_v30 = vpop.f32.mrb[29].mxu1 }
 0x224   : > { %v2683_v29 = vadd.f32 %v2682_v28, %v2681_v26  ;;  %v2684_v31 = vpop.f32.mrb[30].mxu0  ;;  %v2705_v32 = vadd.f32 %v2704_v30, %v2703_v27  ;;  %v2706_v33 = vpop.f32.mrb[30].mxu1 }
 0x225   : > { %v2685_v34 = vpop.f32.mrb[31].mxu0  ;;  %v2707_v36 = vpop.f32.mrb[31].mxu1 }
 0x226   : > { %v2223_v35 = vadd.f32 %v2683_v29, %v2183_v25 }
 0x228   : > { %v2263_v37 = vadd.f32 %v2705_v32, %v2223_v35 }
 0x22a   : > { %v2268_v44 = vadd.f32 %v2848_v41, %v2263_v37 }
 0x22c   : > { %v2269_v45 = vsel %vm553_vm0, %v2268_v44, 0.0 }
 0x22d   : > { %2270 = vadd.xlane.f32.xlu0 %v2269_v45 }
 0x2ba   : > { %v2271_v46 = vpop.xlane.xlu0 %2270 }
 0x2bb   : > { %v2273_v48 = vmul.f32 0.03125, %v2271_v46 }
 0x2bd   : > { %v2274_v49 = vsub.f32 %v2268_v44, %v2273_v48 }
 0x2bf   : > { %v2275_v50 = vmul.f32 %v2274_v49, %v2274_v49 }
 0x2c1   : > { %v2276_v51 = vsel %vm553_vm0, %v2275_v50, 0.0 }
 0x2c2   : > { %2277 = vadd.xlane.f32.xlu0 %v2276_v51 }
 0x34f   : > { %v2278_v52 = vpop.xlane.xlu0 %2277 }
 0x350   : > { %v2279_v53 = vmul.f32 0.03125, %v2278_v52 }
 0x352   : > { %v2280_v54 = vadd.f32 1e-05, %v2279_v53 }
 0x354   : > { %2846 = vrsqrt.f32 %v2280_v54 }
 0x35e   : > { %v2847_v55 = vpop.eup %2846 }
 0x35f   : > { %v2282_v58 = vmul.f32 %v2847_v55, %v2274_v49 }
 0x361   : > { %v2290_v8 = vmul.f32 %v2529_v57, %v2282_v58 }
 0x363   : > { %v2298_v60 = vadd.f32 %v2530_v59, %v2290_v8 }
 0x365   : > { %2299 = vst.msk [vmem:[%s273_s14] sm:$0xff] %vm553_vm0, %v2298_v60 }
 0x366 PF: > { %s17_s24 = sadd.s32 1, %s2855_s24  }
 0x367   : > { %p14_p4 = scmp.ge.s32.totalorder %s17_s24, 4  }
 0x369   :  { %16 = sbr.rel (!%p14_p4) target bundleno = 1 (0x1), region = 78 }

</bundles_post_ra>
